<compile_context>
chip_gen: v6e
topology: v6e:2x2x1
jax: 0.10.0
libtpu: 0.0.40
codegen_flags: <defaults>
</compile_context>

<pallas_src>
import math
import functools

import jax
import jax.numpy as jnp
from jax.experimental import pallas as pl
from jax.experimental.pallas import tpu as pltpu

HIGH = jax.lax.Precision.HIGHEST  # reference only


# ----------------------------------------------------------------------------
# Fused whole-forward Pallas kernel
# ----------------------------------------------------------------------------
def _gt_forward_kernel(
        # scalar-prefetch refs (SMEM)
        row_ref, col_ref,
        # array inputs (VMEM)
        x_ref, ea_ref,
        enc_nw_ref, enc_nb_ref, enc_ew_ref, enc_eb_ref,
        l_wqkv_ref, l_bqkv_ref, l_we_ref, l_be_ref,
        l_won_ref, l_bon_ref, l_woe_ref, l_boe_ref,
        l_wn1_ref, l_bn1_ref, l_wn2_ref,
        l_we1_ref, l_be1_ref, l_we2_ref,
        f_wqkv_ref, f_bqkv_ref, f_we_ref, f_be_ref,
        f_won_ref, f_bon_ref, f_wn1_ref, f_bn1_ref, f_wn2_ref,
        # outputs
        node_out_ref, edge_out_ref,
        # scratch (VMEM)
        *scratch,
        heads, num_inter_layers):
    (q_sc, k_sc, v_sc,            # per-node Q/K/V           (N, H) each
     kr_sc, qc_sc, vr_sc,         # gathered K[row]/Q[col]/V[row] (E, H)
     wvc_sc, zc_sc,               # per-edge scatter contributions (E, H)
     wv_sc, z_sc) = scratch       # per-node accumulators    (N, H)

    N, H = node_out_ref.shape
    E = edge_out_ref.shape[0]
    d = H // heads
    inv_sqrt_d = 1.0 / math.sqrt(float(d))

    def mm(a, b):
        # bf16 MXU matmul with f32 accumulation (weights arrive pre-cast).
        return jnp.dot(a.astype(jnp.bfloat16), b.astype(jnp.bfloat16),
                       preferred_element_type=jnp.float32)

    # Per-head lane masks, hoisted once and reused by every layer.  Keeps the
    # per-head reduce / broadcast on the VPU/XLU instead of the MXU.
    lane = jax.lax.broadcasted_iota(jnp.int32, (1, H), 1)
    head_masks = [((lane >= h * d) & (lane < (h + 1) * d)).astype(jnp.float32)
                  for h in range(heads)]

    def mha(node, edge, wqkv, bqkv, we, be):
        # Fused Q|K|V projection (BN1 already folded into wqkv/bqkv).
        qkv = mm(node, wqkv) + bqkv                  # (N, 3H)
        q_sc[...] = qkv[:, 0:H]
        k_sc[...] = qkv[:, H:2 * H]
        v_sc[...] = qkv[:, 2 * H:3 * H]
        ep = mm(edge, we) + be                       # (E, H)

        # Index-based gather: K[row], Q[col], V[row]  (no one-hot matmuls).
        @pl.loop(0, E)
        def _gather(ei):
            r = row_ref[ei]
            c = col_ref[ei]
            kr_sc[pl.ds(ei, 1), :] = k_sc[pl.ds(r, 1), :]
            qc_sc[pl.ds(ei, 1), :] = q_sc[pl.ds(c, 1), :]
            vr_sc[pl.ds(ei, 1), :] = v_sc[pl.ds(r, 1), :]

        alpha = jnp.clip(kr_sc[...] * qc_sc[...] * inv_sqrt_d,
                         -5.0, 5.0) * ep             # (E, H)

        # Per-head sum -> exp -> broadcast back, all VPU/XLU via lane masks.
        alphax_full = jnp.zeros_like(alpha)
        for m in head_masks:
            s_h = jnp.sum(alpha * m, axis=-1, keepdims=True)   # (E, 1)
            a_h = jnp.exp(jnp.clip(s_h, -5.0, 5.0))
            alphax_full = alphax_full + a_h * m

        # Index-based scatter-add over destination nodes (col).
        wvc_sc[...] = vr_sc[...] * alphax_full
        zc_sc[...] = alphax_full
        wv_sc[...] = jnp.zeros_like(wv_sc)
        z_sc[...] = jnp.zeros_like(z_sc)

        @pl.loop(0, E)
        def _scatter(ei):
            c = col_ref[ei]
            wv_sc[pl.ds(c, 1), :] = (wv_sc[pl.ds(c, 1), :]
                                     + wvc_sc[pl.ds(ei, 1), :])
            z_sc[pl.ds(c, 1), :] = (z_sc[pl.ds(c, 1), :]
                                    + zc_sc[pl.ds(ei, 1), :])

        h_out = wv_sc[...] * pl.reciprocal(z_sc[...] + 1e-6, approx=True)
        return h_out, alpha

    def gt_layer(node, edge, wqkv, bqkv, we, be, won, bon, wn1, bn1, wn2,
                 woe=None, boe=None, we1=None, be1=None, we2=None):
        h_out, alpha = mha(node, edge, wqkv, bqkv, we, be)
        node1 = node + mm(h_out, won) + bon          # dropout = identity (eval)
        hm = mm(node1, wn1) + bn1                    # BN2 folded into wn1/bn1
        hm = hm * jax.nn.sigmoid(hm)                 # SiLU
        node2 = node1 + mm(hm, wn2)
        if woe is None:                              # final layer: edges frozen
            return node2, edge
        edge1 = edge + mm(alpha, woe) + boe
        em = mm(edge1, we1) + be1
        em = em * jax.nn.sigmoid(em)
        edge2 = edge1 + mm(em, we2)
        return node2, edge2

    # Encoders.
    node = mm(x_ref[...], enc_nw_ref[...]) + enc_nb_ref[...]
    edge = mm(ea_ref[...], enc_ew_ref[...]) + enc_eb_ref[...]

    # Intermediate layers (weights stacked along a leading layer axis).
    for l in range(num_inter_layers):
        node, edge = gt_layer(
            node, edge,
            l_wqkv_ref[l], l_bqkv_ref[l], l_we_ref[l], l_be_ref[l],
            l_won_ref[l], l_bon_ref[l],
            l_wn1_ref[l], l_bn1_ref[l], l_wn2_ref[l],
            woe=l_woe_ref[l], boe=l_boe_ref[l],
            we1=l_we1_ref[l], be1=l_be1_ref[l], we2=l_we2_ref[l])

    # Final layer (node update only).
    node, _ = gt_layer(
        node, edge,
        f_wqkv_ref[...], f_bqkv_ref[...], f_we_ref[...], f_be_ref[...],
        f_won_ref[...], f_bon_ref[...],
        f_wn1_ref[...], f_bn1_ref[...], f_wn2_ref[...])

    node_out_ref[...] = node
    edge_out_ref[...] = edge


def _zero_index_map(nd):
    def imap(i, *prefetch):
        del i, prefetch
        return (0,) * nd
    return imap


# ----------------------------------------------------------------------------
# Parameter preparation: fold eval-mode BN affines, fuse Q|K|V, cast to bf16
# ----------------------------------------------------------------------------
def _prepare_kernel_params(params):
    def bf16(w):
        return w.astype(jnp.bfloat16)

    def fold(scale, shift, w):
        # (x * scale + shift) @ W  ==  x @ (diag(scale) @ W) + shift @ W
        return scale.reshape(-1, 1) * w, jnp.dot(shift, w)

    layers = params["layers"]
    inter, final = layers[:-1], layers[-1]

    def prep_common(p):
        wq, bq = fold(p["sn1"], p["tn1"], p["wq"])
        wk, bk = fold(p["sn1"], p["tn1"], p["wk"])
        wv, bv = fold(p["sn1"], p["tn1"], p["wv"])
        wqkv = jnp.concatenate([wq, wk, wv], axis=1)
        bqkv = jnp.concatenate([bq, bk, bv], axis=1)
        we, be = fold(p["se1"], p["te1"], p["we"])
        wn1, bn1 = fold(p["sn2"], p["tn2"], p["wn1"])
        return dict(wqkv=bf16(wqkv), bqkv=bqkv, we=bf16(we), be=be,
                    won=bf16(p["won"]), bon=p["bon"],
                    wn1=bf16(wn1), bn1=bn1, wn2=bf16(p["wn2"]))

    inter_p = []
    for p in inter:
        dct = prep_common(p)
        we1, be1 = fold(p["se2"], p["te2"], p["we1"])
        dct.update(woe=bf16(p["woe"]), boe=p["boe"],
                   we1=bf16(we1), be1=be1, we2=bf16(p["we2"]))
        inter_p.append(dct)

    fd = prep_common(final)

    def stack(key):
        return jnp.stack([dct[key] for dct in inter_p], axis=0)

    return {
        "enc_nw": bf16(params["node_enc_w"]), "enc_nb": params["node_enc_b"],
        "enc_ew": bf16(params["edge_enc_w"]), "enc_eb": params["edge_enc_b"],
        "l_wqkv": stack("wqkv"), "l_bqkv": stack("bqkv"),
        "l_we": stack("we"), "l_be": stack("be"),
        "l_won": stack("won"), "l_bon": stack("bon"),
        "l_woe": stack("woe"), "l_boe": stack("boe"),
        "l_wn1": stack("wn1"), "l_bn1": stack("bn1"), "l_wn2": stack("wn2"),
        "l_we1": stack("we1"), "l_be1": stack("be1"), "l_we2": stack("we2"),
        "f_wqkv": fd["wqkv"], "f_bqkv": fd["bqkv"],
        "f_we": fd["we"], "f_be": fd["be"],
        "f_won": fd["won"], "f_bon": fd["bon"],
        "f_wn1": fd["wn1"], "f_bn1": fd["bn1"], "f_wn2": fd["wn2"],
    }


# ----------------------------------------------------------------------------
# Wrapper: single fused pallas_call for the whole forward pass
# ----------------------------------------------------------------------------
def graph_transformer_forward(params, x, edge_attr, edge_index):
    heads = params["heads"]
    H = params["node_enc_w"].shape[1]
    N = x.shape[0]
    E = edge_attr.shape[0]
    num_layers = len(params["layers"])
    # TODO(synk): num_layers == 1 (final-only) variant not wired up here.
    assert num_layers >= 2, "fused kernel expects >= 2 GraphTransformer layers"
    num_inter = num_layers - 1

    kp = _prepare_kernel_params(params)
    row = edge_index[0].astype(jnp.int32)
    col = edge_index[1].astype(jnp.int32)

    inputs = [
        x.astype(jnp.float32), edge_attr.astype(jnp.float32),
        kp["enc_nw"], kp["enc_nb"], kp["enc_ew"], kp["enc_eb"],
        kp["l_wqkv"], kp["l_bqkv"], kp["l_we"], kp["l_be"],
        kp["l_won"], kp["l_bon"], kp["l_woe"], kp["l_boe"],
        kp["l_wn1"], kp["l_bn1"], kp["l_wn2"],
        kp["l_we1"], kp["l_be1"], kp["l_we2"],
        kp["f_wqkv"], kp["f_bqkv"], kp["f_we"], kp["f_be"],
        kp["f_won"], kp["f_bon"], kp["f_wn1"], kp["f_bn1"], kp["f_wn2"],
    ]

    in_specs = [pl.BlockSpec(a.shape, _zero_index_map(a.ndim)) for a in inputs]
    out_specs = [pl.BlockSpec((N, H), _zero_index_map(2)),
                 pl.BlockSpec((E, H), _zero_index_map(2))]
    scratch_shapes = [
        pltpu.VMEM((N, H), jnp.float32),   # Q
        pltpu.VMEM((N, H), jnp.float32),   # K
        pltpu.VMEM((N, H), jnp.float32),   # V
        pltpu.VMEM((E, H), jnp.float32),   # K[row]
        pltpu.VMEM((E, H), jnp.float32),   # Q[col]
        pltpu.VMEM((E, H), jnp.float32),   # V[row]
        pltpu.VMEM((E, H), jnp.float32),   # scatter contrib: v_row * alphax
        pltpu.VMEM((E, H), jnp.float32),   # scatter contrib: alphax
        pltpu.VMEM((N, H), jnp.float32),   # wV accumulator
        pltpu.VMEM((N, H), jnp.float32),   # z accumulator
    ]

    grid_spec = pltpu.PrefetchScalarGridSpec(
        num_scalar_prefetch=2,
        grid=(1,),
        in_specs=in_specs,
        out_specs=out_specs,
        scratch_shapes=scratch_shapes,
    )

    # Advisory cost estimate for the XLA scheduler.
    def mmf(m, k, n):
        return 2 * m * k * n
    flops = mmf(N, x.shape[1], H) + mmf(E, edge_attr.shape[1], H)
    per_node = (mmf(N, H, 3 * H) + mmf(N, H, H)
                + mmf(N, H, 2 * H) + mmf(N, 2 * H, H))
    per_edge = (mmf(E, H, H) + mmf(E, H, H)
                + mmf(E, H, 2 * H) + mmf(E, 2 * H, H))
    flops += num_layers * per_node + num_inter * per_edge + mmf(E, H, H)
    trans = (num_layers * (E * heads + N * 2 * H + N * H)
             + num_inter * (E * 2 * H))
    bytes_accessed = (sum(int(a.nbytes) for a in inputs)
                      + int(row.nbytes) + int(col.nbytes)
                      + (N + E) * H * 4)

    kernel = functools.partial(_gt_forward_kernel, heads=heads,
                               num_inter_layers=num_inter)

    node_out, edge_out = pl.pallas_call(
        kernel,
        out_shape=(jax.ShapeDtypeStruct((N, H), jnp.float32),
                   jax.ShapeDtypeStruct((E, H), jnp.float32)),
        grid_spec=grid_spec,
        compiler_params=pltpu.CompilerParams(
            dimension_semantics=("arbitrary",),
            vmem_limit_bytes=32 * 1024 * 1024),
        cost_estimate=pl.CostEstimate(flops=int(flops),
                                      transcendentals=int(trans),
                                      bytes_accessed=int(bytes_accessed)),
    )(row, col, *inputs)
    return node_out, edge_out


# ----------------------------------------------------------------------------
# Deterministic parameter init (torch-faithful structure, eval-mode BN)
# ----------------------------------------------------------------------------
def _glorot(key, fan_in, fan_out):
    std = math.sqrt(2.0 / (fan_in + fan_out))
    return std * jax.random.normal(key, (fan_in, fan_out), jnp.float32)


def _bn_affine(H):
    # eval-mode BatchNorm1d: mean=0, var=1, gamma=1, beta=0, eps=1e-5
    scale = jnp.full((1, H), 1.0 / math.sqrt(1.0 + 1e-5), jnp.float32)
    shift = jnp.zeros((1, H), jnp.float32)
    return scale, shift


def _init_gt_layer(key, H, final):
    ks = jax.random.split(key, 12)
    p = {}
    p["sn1"], p["tn1"] = _bn_affine(H)
    p["se1"], p["te1"] = _bn_affine(H)
    p["wq"] = _glorot(ks[0], H, H)
    p["wk"] = _glorot(ks[1], H, H)
    p["wv"] = _glorot(ks[2], H, H)
    p["we"] = _glorot(ks[3], H, H)
    p["won"] = _glorot(ks[4], H, H)
    p["bon"] = jnp.zeros((1, H), jnp.float32)
    p["sn2"], p["tn2"] = _bn_affine(H)
    p["wn1"] = _glorot(ks[5], H, 2 * H)
    p["wn2"] = _glorot(ks[6], 2 * H, H)
    if not final:
        p["woe"] = _glorot(ks[7], H, H)
        p["boe"] = jnp.zeros((1, H), jnp.float32)
        p["se2"], p["te2"] = _bn_affine(H)
        p["we1"] = _glorot(ks[8], H, 2 * H)
        p["we2"] = _glorot(ks[9], 2 * H, H)
    return p


def init_graph_transformer(key, in_channels, edge_features, H, heads, num_layers):
    keys = jax.random.split(key, num_layers + 2)
    return {
        "heads": heads,
        "node_enc_w": _glorot(keys[0], in_channels, H),
        "node_enc_b": jnp.zeros((1, H), jnp.float32),
        "edge_enc_w": _glorot(keys[1], edge_features, H),
        "edge_enc_b": jnp.zeros((1, H), jnp.float32),
        "layers": [_init_gt_layer(keys[2 + i], H, final=(i == num_layers - 1))
                   for i in range(num_layers)],
    }


# ----------------------------------------------------------------------------
# Pure-JAX reference (mirrors torch eval-mode forward, f32 HIGHEST precision)
# ----------------------------------------------------------------------------
def _ref_layer(p, node, edge, row, col, heads, final):
    N, H = node.shape
    d = H // heads
    x_in, e_in = node, edge
    xn = node * p["sn1"] + p["tn1"]
    en = edge * p["se1"] + p["te1"]
    q = jnp.dot(xn, p["wq"], precision=HIGH).reshape(-1, heads, d)
    k = jnp.dot(xn, p["wk"], precision=HIGH).reshape(-1, heads, d)
    v = jnp.dot(xn, p["wv"], precision=HIGH).reshape(-1, heads, d)
    ep = jnp.dot(en, p["we"], precision=HIGH).reshape(-1, heads, d)
    alpha = jnp.clip(k[row] * q[col] / math.sqrt(d), -5.0, 5.0) * ep
    alphax = jnp.exp(jnp.clip(alpha.sum(-1, keepdims=True), -5.0, 5.0))
    wV = jax.ops.segment_sum(v[row] * alphax, col, num_segments=N)
    z = jax.ops.segment_sum(alphax, col, num_segments=N)
    h = (wV / (z + 1e-6)).reshape(-1, H)
    node1 = x_in + jnp.dot(h, p["won"], precision=HIGH) + p["bon"]
    xn2 = node1 * p["sn2"] + p["tn2"]
    hm = jnp.dot(xn2, p["wn1"], precision=HIGH)
    hm = hm * jax.nn.sigmoid(hm)
    node2 = node1 + jnp.dot(hm, p["wn2"], precision=HIGH)
    if final:
        return node2, edge
    e_attn = alpha.reshape(-1, H)
    edge1 = e_in + jnp.dot(e_attn, p["woe"], precision=HIGH) + p["boe"]
    en2 = edge1 * p["se2"] + p["te2"]
    em = jnp.dot(en2, p["we1"], precision=HIGH)
    em = em * jax.nn.sigmoid(em)
    edge2 = edge1 + jnp.dot(em, p["we2"], precision=HIGH)
    return node2, edge2


def ref_forward(params, x, edge_attr, edge_index):
    row, col = edge_index[0], edge_index[1]
    node = jnp.dot(x, params["node_enc_w"], precision=HIGH) + params["node_enc_b"]
    edge = jnp.dot(edge_attr, params["edge_enc_w"], precision=HIGH) + params["edge_enc_b"]
    nlayers = len(params["layers"])
    for i, p in enumerate(params["layers"]):
        node, edge = _ref_layer(p, node, edge, row, col, params["heads"],
                                final=(i == nlayers - 1))
    return node, edge


# ----------------------------------------------------------------------------
if __name__ == "__main__":
    key = jax.random.PRNGKey(0)
    k_x, k_e, k_idx, k_p = jax.random.split(key, 4)

    in_channels, edge_features = 4, 10
    H, heads, num_layers = 32, 4, 2
    N, E = 16, 32

    x = jax.random.normal(k_x, (N, in_channels), jnp.float32)
    edge_attr = jax.random.normal(k_e, (E, edge_features), jnp.float32)
    edge_index = jax.random.randint(k_idx, (2, E), 0, N, jnp.int32)

    params = init_graph_transformer(k_p, in_channels, edge_features, H, heads,
                                    num_layers)

    node_out, edge_out = graph_transformer_forward(params, x, edge_attr, edge_index)
    node_out = jax.block_until_ready(node_out)
    edge_out = jax.block_until_ready(edge_out)

    node_ref, edge_ref = ref_forward(params, x, edge_attr, edge_index)

    # The kernel runs weight/MLP matmuls in bf16 (MXU) with f32 accumulation,
    # so validate against the f32 reference at a correspondingly relaxed
    # tolerance (plus a tighter relative-Frobenius check).
    def _rel_err(a, b):
        return float(jnp.linalg.norm(a - b) / (jnp.linalg.norm(b) + 1e-12))

    assert _rel_err(node_out, node_ref) < 5e-2, "node relative error too large"
    assert _rel_err(edge_out, edge_ref) < 5e-2, "edge relative error too large"
    assert jnp.allclose(node_out, node_ref, atol=1e-1, rtol=1e-1), "node mismatch"
    assert jnp.allclose(edge_out, edge_ref, atol=1e-1, rtol=1e-1), "edge mismatch"

    print("KERNEL_OK")
</pallas_src>

<mosaic_0001>
module attributes {stable_mosaic.version = 11 : i64} {
  func.func @_gt_forward_kernel(%arg0: i32, %arg1: memref<32xi32, #tpu.memory_space<smem>>, %arg2: memref<32xi32, #tpu.memory_space<smem>>, %arg3: memref<16x4xf32, #tpu.memory_space<vmem>>, %arg4: memref<32x10xf32, #tpu.memory_space<vmem>>, %arg5: memref<4x32xbf16, #tpu.memory_space<vmem>>, %arg6: memref<1x32xf32, #tpu.memory_space<vmem>>, %arg7: memref<10x32xbf16, #tpu.memory_space<vmem>>, %arg8: memref<1x32xf32, #tpu.memory_space<vmem>>, %arg9: memref<1x32x96xbf16, #tpu.memory_space<vmem>>, %arg10: memref<1x1x96xf32, #tpu.memory_space<vmem>>, %arg11: memref<1x32x32xbf16, #tpu.memory_space<vmem>>, %arg12: memref<1x1x32xf32, #tpu.memory_space<vmem>>, %arg13: memref<1x32x32xbf16, #tpu.memory_space<vmem>>, %arg14: memref<1x1x32xf32, #tpu.memory_space<vmem>>, %arg15: memref<1x32x32xbf16, #tpu.memory_space<vmem>>, %arg16: memref<1x1x32xf32, #tpu.memory_space<vmem>>, %arg17: memref<1x32x64xbf16, #tpu.memory_space<vmem>>, %arg18: memref<1x1x64xf32, #tpu.memory_space<vmem>>, %arg19: memref<1x64x32xbf16, #tpu.memory_space<vmem>>, %arg20: memref<1x32x64xbf16, #tpu.memory_space<vmem>>, %arg21: memref<1x1x64xf32, #tpu.memory_space<vmem>>, %arg22: memref<1x64x32xbf16, #tpu.memory_space<vmem>>, %arg23: memref<32x96xbf16, #tpu.memory_space<vmem>>, %arg24: memref<1x96xf32, #tpu.memory_space<vmem>>, %arg25: memref<32x32xbf16, #tpu.memory_space<vmem>>, %arg26: memref<1x32xf32, #tpu.memory_space<vmem>>, %arg27: memref<32x32xbf16, #tpu.memory_space<vmem>>, %arg28: memref<1x32xf32, #tpu.memory_space<vmem>>, %arg29: memref<32x64xbf16, #tpu.memory_space<vmem>>, %arg30: memref<1x64xf32, #tpu.memory_space<vmem>>, %arg31: memref<64x32xbf16, #tpu.memory_space<vmem>>, %arg32: memref<16x32xf32, #tpu.memory_space<vmem>>, %arg33: memref<32x32xf32, #tpu.memory_space<vmem>>, %arg34: memref<16x32xf32, #tpu.memory_space<vmem>>, %arg35: memref<16x32xf32, #tpu.memory_space<vmem>>, %arg36: memref<16x32xf32, #tpu.memory_space<vmem>>, %arg37: memref<32x32xf32, #tpu.memory_space<vmem>>, %arg38: memref<32x32xf32, #tpu.memory_space<vmem>>, %arg39: memref<32x32xf32, #tpu.memory_space<vmem>>, %arg40: memref<32x32xf32, #tpu.memory_space<vmem>>, %arg41: memref<32x32xf32, #tpu.memory_space<vmem>>, %arg42: memref<16x32xf32, #tpu.memory_space<vmem>>, %arg43: memref<16x32xf32, #tpu.memory_space<vmem>>) attributes {dimension_semantics = [#tpu.dimension_semantics<arbitrary>], iteration_bounds = array<i64: 1>, scalar_prefetch = 2 : i64, scratch_operands = 10 : i64, tpu.core_type = #tpu.core_type<tc>, window_params = [{pipeline_mode = #tpu.pipeline_mode<synchronous>, transform_indices = @transform_0, window_bounds = array<i64: 16, 4>}, {pipeline_mode = #tpu.pipeline_mode<synchronous>, transform_indices = @transform_1, window_bounds = array<i64: 32, 10>}, {pipeline_mode = #tpu.pipeline_mode<synchronous>, transform_indices = @transform_2, window_bounds = array<i64: 4, 32>}, {pipeline_mode = #tpu.pipeline_mode<synchronous>, transform_indices = @transform_3, window_bounds = array<i64: 1, 32>}, {pipeline_mode = #tpu.pipeline_mode<synchronous>, transform_indices = @transform_4, window_bounds = array<i64: 10, 32>}, {pipeline_mode = #tpu.pipeline_mode<synchronous>, transform_indices = @transform_5, window_bounds = array<i64: 1, 32>}, {pipeline_mode = #tpu.pipeline_mode<synchronous>, transform_indices = @transform_6, window_bounds = array<i64: 1, 32, 96>}, {pipeline_mode = #tpu.pipeline_mode<synchronous>, transform_indices = @transform_7, window_bounds = array<i64: 1, 1, 96>}, {pipeline_mode = #tpu.pipeline_mode<synchronous>, transform_indices = @transform_8, window_bounds = array<i64: 1, 32, 32>}, {pipeline_mode = #tpu.pipeline_mode<synchronous>, transform_indices = @transform_9, window_bounds = array<i64: 1, 1, 32>}, {pipeline_mode = #tpu.pipeline_mode<synchronous>, transform_indices = @transform_10, window_bounds = array<i64: 1, 32, 32>}, {pipeline_mode = #tpu.pipeline_mode<synchronous>, transform_indices = @transform_11, window_bounds = array<i64: 1, 1, 32>}, {pipeline_mode = #tpu.pipeline_mode<synchronous>, transform_indices = @transform_12, window_bounds = array<i64: 1, 32, 32>}, {pipeline_mode = #tpu.pipeline_mode<synchronous>, transform_indices = @transform_13, window_bounds = array<i64: 1, 1, 32>}, {pipeline_mode = #tpu.pipeline_mode<synchronous>, transform_indices = @transform_14, window_bounds = array<i64: 1, 32, 64>}, {pipeline_mode = #tpu.pipeline_mode<synchronous>, transform_indices = @transform_15, window_bounds = array<i64: 1, 1, 64>}, {pipeline_mode = #tpu.pipeline_mode<synchronous>, transform_indices = @transform_16, window_bounds = array<i64: 1, 64, 32>}, {pipeline_mode = #tpu.pipeline_mode<synchronous>, transform_indices = @transform_17, window_bounds = array<i64: 1, 32, 64>}, {pipeline_mode = #tpu.pipeline_mode<synchronous>, transform_indices = @transform_18, window_bounds = array<i64: 1, 1, 64>}, {pipeline_mode = #tpu.pipeline_mode<synchronous>, transform_indices = @transform_19, window_bounds = array<i64: 1, 64, 32>}, {pipeline_mode = #tpu.pipeline_mode<synchronous>, transform_indices = @transform_20, window_bounds = array<i64: 32, 96>}, {pipeline_mode = #tpu.pipeline_mode<synchronous>, transform_indices = @transform_21, window_bounds = array<i64: 1, 96>}, {pipeline_mode = #tpu.pipeline_mode<synchronous>, transform_indices = @transform_22, window_bounds = array<i64: 32, 32>}, {pipeline_mode = #tpu.pipeline_mode<synchronous>, transform_indices = @transform_23, window_bounds = array<i64: 1, 32>}, {pipeline_mode = #tpu.pipeline_mode<synchronous>, transform_indices = @transform_24, window_bounds = array<i64: 32, 32>}, {pipeline_mode = #tpu.pipeline_mode<synchronous>, transform_indices = @transform_25, window_bounds = array<i64: 1, 32>}, {pipeline_mode = #tpu.pipeline_mode<synchronous>, transform_indices = @transform_26, window_bounds = array<i64: 32, 64>}, {pipeline_mode = #tpu.pipeline_mode<synchronous>, transform_indices = @transform_27, window_bounds = array<i64: 1, 64>}, {pipeline_mode = #tpu.pipeline_mode<synchronous>, transform_indices = @transform_28, window_bounds = array<i64: 64, 32>}, {pipeline_mode = #tpu.pipeline_mode<synchronous>, transform_indices = @transform_29, window_bounds = array<i64: 16, 32>}, {pipeline_mode = #tpu.pipeline_mode<synchronous>, transform_indices = @transform_30, window_bounds = array<i64: 32, 32>}]} {
    %0 = tpu.iota {dimensions = array<i32: 1>} : vector<1x32xi32>
    %c0_i32 = arith.constant 0 : i32
    %1 = vector.broadcast %c0_i32 : i32 to vector<1x32xi32>
    %2 = arith.cmpi sge, %0, %1 : vector<1x32xi32>
    %c8_i32 = arith.constant 8 : i32
    %3 = vector.broadcast %c8_i32 : i32 to vector<1x32xi32>
    %4 = arith.cmpi slt, %0, %3 : vector<1x32xi32>
    %5 = arith.andi %2, %4 : vector<1x32xi1>
    %6 = arith.extui %5 : vector<1x32xi1> to vector<1x32xi32>
    %7 = arith.sitofp %6 : vector<1x32xi32> to vector<1x32xf32>
    %c8_i32_0 = arith.constant 8 : i32
    %8 = vector.broadcast %c8_i32_0 : i32 to vector<1x32xi32>
    %9 = arith.cmpi sge, %0, %8 : vector<1x32xi32>
    %c16_i32 = arith.constant 16 : i32
    %10 = vector.broadcast %c16_i32 : i32 to vector<1x32xi32>
    %11 = arith.cmpi slt, %0, %10 : vector<1x32xi32>
    %12 = arith.andi %9, %11 : vector<1x32xi1>
    %13 = arith.extui %12 : vector<1x32xi1> to vector<1x32xi32>
    %14 = arith.sitofp %13 : vector<1x32xi32> to vector<1x32xf32>
    %c16_i32_1 = arith.constant 16 : i32
    %15 = vector.broadcast %c16_i32_1 : i32 to vector<1x32xi32>
    %16 = arith.cmpi sge, %0, %15 : vector<1x32xi32>
    %c24_i32 = arith.constant 24 : i32
    %17 = vector.broadcast %c24_i32 : i32 to vector<1x32xi32>
    %18 = arith.cmpi slt, %0, %17 : vector<1x32xi32>
    %19 = arith.andi %16, %18 : vector<1x32xi1>
    %20 = arith.extui %19 : vector<1x32xi1> to vector<1x32xi32>
    %21 = arith.sitofp %20 : vector<1x32xi32> to vector<1x32xf32>
    %c24_i32_2 = arith.constant 24 : i32
    %22 = vector.broadcast %c24_i32_2 : i32 to vector<1x32xi32>
    %23 = arith.cmpi sge, %0, %22 : vector<1x32xi32>
    %c32_i32 = arith.constant 32 : i32
    %24 = vector.broadcast %c32_i32 : i32 to vector<1x32xi32>
    %25 = arith.cmpi slt, %0, %24 : vector<1x32xi32>
    %26 = arith.andi %23, %25 : vector<1x32xi1>
    %27 = arith.extui %26 : vector<1x32xi1> to vector<1x32xi32>
    %28 = arith.sitofp %27 : vector<1x32xi32> to vector<1x32xf32>
    %c0 = arith.constant 0 : index
    %c0_3 = arith.constant 0 : index
    %29 = vector.load %arg3[%c0, %c0_3] : memref<16x4xf32, #tpu.memory_space<vmem>>, vector<16x4xf32>
    %c0_4 = arith.constant 0 : index
    %c0_5 = arith.constant 0 : index
    %30 = vector.load %arg5[%c0_4, %c0_5] : memref<4x32xbf16, #tpu.memory_space<vmem>>, vector<4x32xbf16>
    %31 = arith.truncf %29 : vector<16x4xf32> to vector<16x4xbf16>
    %cst = arith.constant dense<0.000000e+00> : vector<16x32xf32>
    %32 = tpu.matmul %31, %30, %cst {dimension_numbers = #tpu.dot_dimension_numbers<[1], [0], [0], [1], [0, 0, 1, 1], [], []>} : vector<16x4xbf16>, vector<4x32xbf16>, vector<16x32xf32> -> vector<16x32xf32>
    %c0_6 = arith.constant 0 : index
    %c0_7 = arith.constant 0 : index
    %33 = vector.load %arg6[%c0_6, %c0_7] : memref<1x32xf32, #tpu.memory_space<vmem>>, vector<1x32xf32>
    %34 = vector.broadcast %33 : vector<1x32xf32> to vector<16x32xf32>
    %35 = arith.addf %32, %34 : vector<16x32xf32>
    %c0_8 = arith.constant 0 : index
    %c0_9 = arith.constant 0 : index
    %36 = vector.load %arg4[%c0_8, %c0_9] : memref<32x10xf32, #tpu.memory_space<vmem>>, vector<32x10xf32>
    %c0_10 = arith.constant 0 : index
    %c0_11 = arith.constant 0 : index
    %37 = vector.load %arg7[%c0_10, %c0_11] : memref<10x32xbf16, #tpu.memory_space<vmem>>, vector<10x32xbf16>
    %38 = arith.truncf %36 : vector<32x10xf32> to vector<32x10xbf16>
    %cst_12 = arith.constant dense<0.000000e+00> : vector<32x32xf32>
    %39 = tpu.matmul %38, %37, %cst_12 {dimension_numbers = #tpu.dot_dimension_numbers<[1], [0], [0], [1], [0, 0, 1, 1], [], []>} : vector<32x10xbf16>, vector<10x32xbf16>, vector<32x32xf32> -> vector<32x32xf32>
    %c0_13 = arith.constant 0 : index
    %c0_14 = arith.constant 0 : index
    %40 = vector.load %arg8[%c0_13, %c0_14] : memref<1x32xf32, #tpu.memory_space<vmem>>, vector<1x32xf32>
    %41 = vector.broadcast %40 : vector<1x32xf32> to vector<32x32xf32>
    %42 = arith.addf %39, %41 : vector<32x32xf32>
    %c0_15 = arith.constant 0 : index
    %c0_16 = arith.constant 0 : index
    %c0_17 = arith.constant 0 : index
    %43 = vector.load %arg9[%c0_15, %c0_16, %c0_17] : memref<1x32x96xbf16, #tpu.memory_space<vmem>>, vector<1x32x96xbf16>
    %44 = vector.shape_cast %43 : vector<1x32x96xbf16> to vector<32x96xbf16>
    %c0_18 = arith.constant 0 : index
    %c0_19 = arith.constant 0 : index
    %c0_20 = arith.constant 0 : index
    %45 = vector.load %arg10[%c0_18, %c0_19, %c0_20] : memref<1x1x96xf32, #tpu.memory_space<vmem>>, vector<1x1x96xf32>
    %46 = vector.shape_cast %45 : vector<1x1x96xf32> to vector<1x96xf32>
    %c0_21 = arith.constant 0 : index
    %c0_22 = arith.constant 0 : index
    %c0_23 = arith.constant 0 : index
    %47 = vector.load %arg11[%c0_21, %c0_22, %c0_23] : memref<1x32x32xbf16, #tpu.memory_space<vmem>>, vector<1x32x32xbf16>
    %48 = vector.shape_cast %47 : vector<1x32x32xbf16> to vector<32x32xbf16>
    %c0_24 = arith.constant 0 : index
    %c0_25 = arith.constant 0 : index
    %c0_26 = arith.constant 0 : index
    %49 = vector.load %arg12[%c0_24, %c0_25, %c0_26] : memref<1x1x32xf32, #tpu.memory_space<vmem>>, vector<1x1x32xf32>
    %50 = vector.shape_cast %49 : vector<1x1x32xf32> to vector<1x32xf32>
    %c0_27 = arith.constant 0 : index
    %c0_28 = arith.constant 0 : index
    %c0_29 = arith.constant 0 : index
    %51 = vector.load %arg13[%c0_27, %c0_28, %c0_29] : memref<1x32x32xbf16, #tpu.memory_space<vmem>>, vector<1x32x32xbf16>
    %52 = vector.shape_cast %51 : vector<1x32x32xbf16> to vector<32x32xbf16>
    %c0_30 = arith.constant 0 : index
    %c0_31 = arith.constant 0 : index
    %c0_32 = arith.constant 0 : index
    %53 = vector.load %arg14[%c0_30, %c0_31, %c0_32] : memref<1x1x32xf32, #tpu.memory_space<vmem>>, vector<1x1x32xf32>
    %54 = vector.shape_cast %53 : vector<1x1x32xf32> to vector<1x32xf32>
    %c0_33 = arith.constant 0 : index
    %c0_34 = arith.constant 0 : index
    %c0_35 = arith.constant 0 : index
    %55 = vector.load %arg17[%c0_33, %c0_34, %c0_35] : memref<1x32x64xbf16, #tpu.memory_space<vmem>>, vector<1x32x64xbf16>
    %56 = vector.shape_cast %55 : vector<1x32x64xbf16> to vector<32x64xbf16>
    %c0_36 = arith.constant 0 : index
    %c0_37 = arith.constant 0 : index
    %c0_38 = arith.constant 0 : index
    %57 = vector.load %arg18[%c0_36, %c0_37, %c0_38] : memref<1x1x64xf32, #tpu.memory_space<vmem>>, vector<1x1x64xf32>
    %58 = vector.shape_cast %57 : vector<1x1x64xf32> to vector<1x64xf32>
    %c0_39 = arith.constant 0 : index
    %c0_40 = arith.constant 0 : index
    %c0_41 = arith.constant 0 : index
    %59 = vector.load %arg19[%c0_39, %c0_40, %c0_41] : memref<1x64x32xbf16, #tpu.memory_space<vmem>>, vector<1x64x32xbf16>
    %60 = vector.shape_cast %59 : vector<1x64x32xbf16> to vector<64x32xbf16>
    %c0_42 = arith.constant 0 : index
    %c0_43 = arith.constant 0 : index
    %c0_44 = arith.constant 0 : index
    %61 = vector.load %arg15[%c0_42, %c0_43, %c0_44] : memref<1x32x32xbf16, #tpu.memory_space<vmem>>, vector<1x32x32xbf16>
    %62 = vector.shape_cast %61 : vector<1x32x32xbf16> to vector<32x32xbf16>
    %c0_45 = arith.constant 0 : index
    %c0_46 = arith.constant 0 : index
    %c0_47 = arith.constant 0 : index
    %63 = vector.load %arg16[%c0_45, %c0_46, %c0_47] : memref<1x1x32xf32, #tpu.memory_space<vmem>>, vector<1x1x32xf32>
    %64 = vector.shape_cast %63 : vector<1x1x32xf32> to vector<1x32xf32>
    %c0_48 = arith.constant 0 : index
    %c0_49 = arith.constant 0 : index
    %c0_50 = arith.constant 0 : index
    %65 = vector.load %arg20[%c0_48, %c0_49, %c0_50] : memref<1x32x64xbf16, #tpu.memory_space<vmem>>, vector<1x32x64xbf16>
    %66 = vector.shape_cast %65 : vector<1x32x64xbf16> to vector<32x64xbf16>
    %c0_51 = arith.constant 0 : index
    %c0_52 = arith.constant 0 : index
    %c0_53 = arith.constant 0 : index
    %67 = vector.load %arg21[%c0_51, %c0_52, %c0_53] : memref<1x1x64xf32, #tpu.memory_space<vmem>>, vector<1x1x64xf32>
    %68 = vector.shape_cast %67 : vector<1x1x64xf32> to vector<1x64xf32>
    %c0_54 = arith.constant 0 : index
    %c0_55 = arith.constant 0 : index
    %c0_56 = arith.constant 0 : index
    %69 = vector.load %arg22[%c0_54, %c0_55, %c0_56] : memref<1x64x32xbf16, #tpu.memory_space<vmem>>, vector<1x64x32xbf16>
    %70 = vector.shape_cast %69 : vector<1x64x32xbf16> to vector<64x32xbf16>
    %71 = arith.truncf %35 : vector<16x32xf32> to vector<16x32xbf16>
    %cst_57 = arith.constant dense<0.000000e+00> : vector<16x96xf32>
    %72 = tpu.matmul %71, %44, %cst_57 {dimension_numbers = #tpu.dot_dimension_numbers<[1], [0], [0], [1], [0, 0, 1, 1], [], []>} : vector<16x32xbf16>, vector<32x96xbf16>, vector<16x96xf32> -> vector<16x96xf32>
    %73 = vector.broadcast %46 : vector<1x96xf32> to vector<16x96xf32>
    %74 = arith.addf %72, %73 : vector<16x96xf32>
    %75 = vector.extract_strided_slice %74 {offsets = [0, 0], sizes = [16, 32], strides = [1, 1]} : vector<16x96xf32> to vector<16x32xf32>
    %c0_58 = arith.constant 0 : index
    %c0_59 = arith.constant 0 : index
    %76 = vector.load %arg34[%c0_58, %c0_59] : memref<16x32xf32, #tpu.memory_space<vmem>>, vector<16x32xf32>
    tpu.vector_store %arg34[%c0_58, %c0_59], %75 {strides = array<i32>} : memref<16x32xf32, #tpu.memory_space<vmem>>, vector<16x32xf32>,
    %77 = vector.extract_strided_slice %74 {offsets = [0, 32], sizes = [16, 32], strides = [1, 1]} : vector<16x96xf32> to vector<16x32xf32>
    %c0_60 = arith.constant 0 : index
    %c0_61 = arith.constant 0 : index
    %78 = vector.load %arg35[%c0_60, %c0_61] : memref<16x32xf32, #tpu.memory_space<vmem>>, vector<16x32xf32>
    tpu.vector_store %arg35[%c0_60, %c0_61], %77 {strides = array<i32>} : memref<16x32xf32, #tpu.memory_space<vmem>>, vector<16x32xf32>,
    %79 = vector.extract_strided_slice %74 {offsets = [0, 64], sizes = [16, 32], strides = [1, 1]} : vector<16x96xf32> to vector<16x32xf32>
    %c0_62 = arith.constant 0 : index
    %c0_63 = arith.constant 0 : index
    %80 = vector.load %arg36[%c0_62, %c0_63] : memref<16x32xf32, #tpu.memory_space<vmem>>, vector<16x32xf32>
    tpu.vector_store %arg36[%c0_62, %c0_63], %79 {strides = array<i32>} : memref<16x32xf32, #tpu.memory_space<vmem>>, vector<16x32xf32>,
    %81 = arith.truncf %42 : vector<32x32xf32> to vector<32x32xbf16>
    %cst_64 = arith.constant dense<0.000000e+00> : vector<32x32xf32>
    %82 = tpu.matmul %81, %48, %cst_64 {dimension_numbers = #tpu.dot_dimension_numbers<[1], [0], [0], [1], [0, 0, 1, 1], [], []>} : vector<32x32xbf16>, vector<32x32xbf16>, vector<32x32xf32> -> vector<32x32xf32>
    %83 = vector.broadcast %50 : vector<1x32xf32> to vector<32x32xf32>
    %84 = arith.addf %82, %83 : vector<32x32xf32>
    %c0_i32_65 = arith.constant 0 : i32
    %c32_i32_66 = arith.constant 32 : i32
    %85 = arith.addi %c0_i32_65, %c32_i32_66 : i32
    %c1_i32 = arith.constant 1 : i32
    scf.for %arg44 = %c0_i32_65 to %85 step %c1_i32  : i32 {
      %c1_i32_196 = arith.constant 1 : i32
      %322 = arith.muli %arg44, %c1_i32_196 : i32
      %c0_i32_197 = arith.constant 0 : i32
      %323 = arith.addi %c0_i32_197, %322 : i32
      %324 = arith.index_cast %323 : i32 to index
      %325 = memref.load %arg1[%324] : memref<32xi32, #tpu.memory_space<smem>>
      %326 = arith.index_cast %323 : i32 to index
      %327 = memref.load %arg2[%326] : memref<32xi32, #tpu.memory_space<smem>>
      %328 = arith.index_cast %325 : i32 to index
      %c0_198 = arith.constant 0 : index
      %329 = vector.load %arg35[%328, %c0_198] : memref<16x32xf32, #tpu.memory_space<vmem>>, vector<1x32xf32>
      %330 = arith.index_cast %323 : i32 to index
      %c0_199 = arith.constant 0 : index
      %331 = vector.load %arg37[%330, %c0_199] : memref<32x32xf32, #tpu.memory_space<vmem>>, vector<1x32xf32>
      tpu.vector_store %arg37[%330, %c0_199], %329 {strides = array<i32>} : memref<32x32xf32, #tpu.memory_space<vmem>>, vector<1x32xf32>,
      %332 = arith.index_cast %327 : i32 to index
      %c0_200 = arith.constant 0 : index
      %333 = vector.load %arg34[%332, %c0_200] : memref<16x32xf32, #tpu.memory_space<vmem>>, vector<1x32xf32>
      %334 = arith.index_cast %323 : i32 to index
      %c0_201 = arith.constant 0 : index
      %335 = vector.load %arg38[%334, %c0_201] : memref<32x32xf32, #tpu.memory_space<vmem>>, vector<1x32xf32>
      tpu.vector_store %arg38[%334, %c0_201], %333 {strides = array<i32>} : memref<32x32xf32, #tpu.memory_space<vmem>>, vector<1x32xf32>,
      %336 = arith.index_cast %325 : i32 to index
      %c0_202 = arith.constant 0 : index
      %337 = vector.load %arg36[%336, %c0_202] : memref<16x32xf32, #tpu.memory_space<vmem>>, vector<1x32xf32>
      %338 = arith.index_cast %323 : i32 to index
      %c0_203 = arith.constant 0 : index
      %339 = vector.load %arg39[%338, %c0_203] : memref<32x32xf32, #tpu.memory_space<vmem>>, vector<1x32xf32>
      tpu.vector_store %arg39[%338, %c0_203], %337 {strides = array<i32>} : memref<32x32xf32, #tpu.memory_space<vmem>>, vector<1x32xf32>,
    }
    %c32_i32_67 = arith.constant 32 : i32
    %c0_68 = arith.constant 0 : index
    %c0_69 = arith.constant 0 : index
    %86 = vector.load %arg37[%c0_68, %c0_69] : memref<32x32xf32, #tpu.memory_space<vmem>>, vector<32x32xf32>
    %c0_70 = arith.constant 0 : index
    %c0_71 = arith.constant 0 : index
    %87 = vector.load %arg38[%c0_70, %c0_71] : memref<32x32xf32, #tpu.memory_space<vmem>>, vector<32x32xf32>
    %88 = arith.mulf %86, %87 : vector<32x32xf32>
    %cst_72 = arith.constant 0.353553385 : f32
    %89 = vector.broadcast %cst_72 : f32 to vector<32x32xf32>
    %90 = arith.mulf %88, %89 : vector<32x32xf32>
    %cst_73 = arith.constant -5.000000e+00 : f32
    %cst_74 = arith.constant 5.000000e+00 : f32
    %91 = vector.broadcast %cst_73 : f32 to vector<32x32xf32>
    %92 = arith.maximumf %91, %90 : vector<32x32xf32>
    %93 = vector.broadcast %cst_74 : f32 to vector<32x32xf32>
    %94 = arith.minimumf %93, %92 : vector<32x32xf32>
    %95 = arith.mulf %94, %84 : vector<32x32xf32>
    %cst_75 = arith.constant 0.000000e+00 : f32
    %96 = vector.broadcast %cst_75 : f32 to vector<32x32xf32>
    %97 = vector.broadcast %7 : vector<1x32xf32> to vector<32x32xf32>
    %98 = arith.mulf %95, %97 : vector<32x32xf32>
    %cst_76 = arith.constant dense<0.000000e+00> : vector<32xf32>
    %99 = vector.multi_reduction <add>, %98, %cst_76 [1] : vector<32x32xf32> to vector<32xf32>
    %100 = vector.shape_cast %99 : vector<32xf32> to vector<32x1xf32>
    %cst_77 = arith.constant -5.000000e+00 : f32
    %cst_78 = arith.constant 5.000000e+00 : f32
    %101 = vector.broadcast %cst_77 : f32 to vector<32x1xf32>
    %102 = arith.maximumf %101, %100 : vector<32x1xf32>
    %103 = vector.broadcast %cst_78 : f32 to vector<32x1xf32>
    %104 = arith.minimumf %103, %102 : vector<32x1xf32>
    %105 = math.exp %104 : vector<32x1xf32>
    %106 = vector.broadcast %105 : vector<32x1xf32> to vector<32x32xf32>
    %107 = vector.broadcast %7 : vector<1x32xf32> to vector<32x32xf32>
    %108 = arith.mulf %106, %107 : vector<32x32xf32>
    %109 = arith.addf %96, %108 : vector<32x32xf32>
    %110 = vector.broadcast %14 : vector<1x32xf32> to vector<32x32xf32>
    %111 = arith.mulf %95, %110 : vector<32x32xf32>
    %cst_79 = arith.constant dense<0.000000e+00> : vector<32xf32>
    %112 = vector.multi_reduction <add>, %111, %cst_79 [1] : vector<32x32xf32> to vector<32xf32>
    %113 = vector.shape_cast %112 : vector<32xf32> to vector<32x1xf32>
    %cst_80 = arith.constant -5.000000e+00 : f32
    %cst_81 = arith.constant 5.000000e+00 : f32
    %114 = vector.broadcast %cst_80 : f32 to vector<32x1xf32>
    %115 = arith.maximumf %114, %113 : vector<32x1xf32>
    %116 = vector.broadcast %cst_81 : f32 to vector<32x1xf32>
    %117 = arith.minimumf %116, %115 : vector<32x1xf32>
    %118 = math.exp %117 : vector<32x1xf32>
    %119 = vector.broadcast %118 : vector<32x1xf32> to vector<32x32xf32>
    %120 = vector.broadcast %14 : vector<1x32xf32> to vector<32x32xf32>
    %121 = arith.mulf %119, %120 : vector<32x32xf32>
    %122 = arith.addf %109, %121 : vector<32x32xf32>
    %123 = vector.broadcast %21 : vector<1x32xf32> to vector<32x32xf32>
    %124 = arith.mulf %95, %123 : vector<32x32xf32>
    %cst_82 = arith.constant dense<0.000000e+00> : vector<32xf32>
    %125 = vector.multi_reduction <add>, %124, %cst_82 [1] : vector<32x32xf32> to vector<32xf32>
    %126 = vector.shape_cast %125 : vector<32xf32> to vector<32x1xf32>
    %cst_83 = arith.constant -5.000000e+00 : f32
    %cst_84 = arith.constant 5.000000e+00 : f32
    %127 = vector.broadcast %cst_83 : f32 to vector<32x1xf32>
    %128 = arith.maximumf %127, %126 : vector<32x1xf32>
    %129 = vector.broadcast %cst_84 : f32 to vector<32x1xf32>
    %130 = arith.minimumf %129, %128 : vector<32x1xf32>
    %131 = math.exp %130 : vector<32x1xf32>
    %132 = vector.broadcast %131 : vector<32x1xf32> to vector<32x32xf32>
    %133 = vector.broadcast %21 : vector<1x32xf32> to vector<32x32xf32>
    %134 = arith.mulf %132, %133 : vector<32x32xf32>
    %135 = arith.addf %122, %134 : vector<32x32xf32>
    %136 = vector.broadcast %28 : vector<1x32xf32> to vector<32x32xf32>
    %137 = arith.mulf %95, %136 : vector<32x32xf32>
    %cst_85 = arith.constant dense<0.000000e+00> : vector<32xf32>
    %138 = vector.multi_reduction <add>, %137, %cst_85 [1] : vector<32x32xf32> to vector<32xf32>
    %139 = vector.shape_cast %138 : vector<32xf32> to vector<32x1xf32>
    %cst_86 = arith.constant -5.000000e+00 : f32
    %cst_87 = arith.constant 5.000000e+00 : f32
    %140 = vector.broadcast %cst_86 : f32 to vector<32x1xf32>
    %141 = arith.maximumf %140, %139 : vector<32x1xf32>
    %142 = vector.broadcast %cst_87 : f32 to vector<32x1xf32>
    %143 = arith.minimumf %142, %141 : vector<32x1xf32>
    %144 = math.exp %143 : vector<32x1xf32>
    %145 = vector.broadcast %144 : vector<32x1xf32> to vector<32x32xf32>
    %146 = vector.broadcast %28 : vector<1x32xf32> to vector<32x32xf32>
    %147 = arith.mulf %145, %146 : vector<32x32xf32>
    %148 = arith.addf %135, %147 : vector<32x32xf32>
    %c0_88 = arith.constant 0 : index
    %c0_89 = arith.constant 0 : index
    %149 = vector.load %arg39[%c0_88, %c0_89] : memref<32x32xf32, #tpu.memory_space<vmem>>, vector<32x32xf32>
    %150 = arith.mulf %149, %148 : vector<32x32xf32>
    %c0_90 = arith.constant 0 : index
    %c0_91 = arith.constant 0 : index
    %151 = vector.load %arg40[%c0_90, %c0_91] : memref<32x32xf32, #tpu.memory_space<vmem>>, vector<32x32xf32>
    tpu.vector_store %arg40[%c0_90, %c0_91], %150 {strides = array<i32>} : memref<32x32xf32, #tpu.memory_space<vmem>>, vector<32x32xf32>,
    %c0_92 = arith.constant 0 : index
    %c0_93 = arith.constant 0 : index
    %152 = vector.load %arg41[%c0_92, %c0_93] : memref<32x32xf32, #tpu.memory_space<vmem>>, vector<32x32xf32>
    tpu.vector_store %arg41[%c0_92, %c0_93], %148 {strides = array<i32>} : memref<32x32xf32, #tpu.memory_space<vmem>>, vector<32x32xf32>,
    %cst_94 = arith.constant 0.000000e+00 : f32
    %153 = vector.broadcast %cst_94 : f32 to vector<16x32xf32>
    %c0_95 = arith.constant 0 : index
    %c0_96 = arith.constant 0 : index
    %154 = vector.load %arg42[%c0_95, %c0_96] : memref<16x32xf32, #tpu.memory_space<vmem>>, vector<16x32xf32>
    tpu.vector_store %arg42[%c0_95, %c0_96], %153 {strides = array<i32>} : memref<16x32xf32, #tpu.memory_space<vmem>>, vector<16x32xf32>,
    %cst_97 = arith.constant 0.000000e+00 : f32
    %155 = vector.broadcast %cst_97 : f32 to vector<16x32xf32>
    %c0_98 = arith.constant 0 : index
    %c0_99 = arith.constant 0 : index
    %156 = vector.load %arg43[%c0_98, %c0_99] : memref<16x32xf32, #tpu.memory_space<vmem>>, vector<16x32xf32>
    tpu.vector_store %arg43[%c0_98, %c0_99], %155 {strides = array<i32>} : memref<16x32xf32, #tpu.memory_space<vmem>>, vector<16x32xf32>,
    %c0_i32_100 = arith.constant 0 : i32
    %c32_i32_101 = arith.constant 32 : i32
    %157 = arith.addi %c0_i32_100, %c32_i32_101 : i32
    %c1_i32_102 = arith.constant 1 : i32
    scf.for %arg44 = %c0_i32_100 to %157 step %c1_i32_102  : i32 {
      %c1_i32_196 = arith.constant 1 : i32
      %322 = arith.muli %arg44, %c1_i32_196 : i32
      %c0_i32_197 = arith.constant 0 : i32
      %323 = arith.addi %c0_i32_197, %322 : i32
      %324 = arith.index_cast %323 : i32 to index
      %325 = memref.load %arg2[%324] : memref<32xi32, #tpu.memory_space<smem>>
      %326 = arith.index_cast %325 : i32 to index
      %c0_198 = arith.constant 0 : index
      %327 = vector.load %arg42[%326, %c0_198] : memref<16x32xf32, #tpu.memory_space<vmem>>, vector<1x32xf32>
      %328 = arith.index_cast %323 : i32 to index
      %c0_199 = arith.constant 0 : index
      %329 = vector.load %arg40[%328, %c0_199] : memref<32x32xf32, #tpu.memory_space<vmem>>, vector<1x32xf32>
      %330 = arith.addf %327, %329 : vector<1x32xf32>
      %331 = arith.index_cast %325 : i32 to index
      %c0_200 = arith.constant 0 : index
      %332 = vector.load %arg42[%331, %c0_200] : memref<16x32xf32, #tpu.memory_space<vmem>>, vector<1x32xf32>
      tpu.vector_store %arg42[%331, %c0_200], %330 {strides = array<i32>} : memref<16x32xf32, #tpu.memory_space<vmem>>, vector<1x32xf32>,
      %333 = arith.index_cast %325 : i32 to index
      %c0_201 = arith.constant 0 : index
      %334 = vector.load %arg43[%333, %c0_201] : memref<16x32xf32, #tpu.memory_space<vmem>>, vector<1x32xf32>
      %335 = arith.index_cast %323 : i32 to index
      %c0_202 = arith.constant 0 : index
      %336 = vector.load %arg41[%335, %c0_202] : memref<32x32xf32, #tpu.memory_space<vmem>>, vector<1x32xf32>
      %337 = arith.addf %334, %336 : vector<1x32xf32>
      %338 = arith.index_cast %325 : i32 to index
      %c0_203 = arith.constant 0 : index
      %339 = vector.load %arg43[%338, %c0_203] : memref<16x32xf32, #tpu.memory_space<vmem>>, vector<1x32xf32>
      tpu.vector_store %arg43[%338, %c0_203], %337 {strides = array<i32>} : memref<16x32xf32, #tpu.memory_space<vmem>>, vector<1x32xf32>,
    }
    %c32_i32_103 = arith.constant 32 : i32
    %c0_104 = arith.constant 0 : index
    %c0_105 = arith.constant 0 : index
    %158 = vector.load %arg42[%c0_104, %c0_105] : memref<16x32xf32, #tpu.memory_space<vmem>>, vector<16x32xf32>
    %c0_106 = arith.constant 0 : index
    %c0_107 = arith.constant 0 : index
    %159 = vector.load %arg43[%c0_106, %c0_107] : memref<16x32xf32, #tpu.memory_space<vmem>>, vector<16x32xf32>
    %cst_108 = arith.constant 9.99999997E-7 : f32
    %160 = vector.broadcast %cst_108 : f32 to vector<16x32xf32>
    %161 = arith.addf %159, %160 : vector<16x32xf32>
    %162 = tpu.reciprocal %161 {approx = true} : vector<16x32xf32> -> vector<16x32xf32>
    %163 = arith.mulf %158, %162 : vector<16x32xf32>
    %164 = arith.truncf %163 : vector<16x32xf32> to vector<16x32xbf16>
    %cst_109 = arith.constant dense<0.000000e+00> : vector<16x32xf32>
    %165 = tpu.matmul %164, %52, %cst_109 {dimension_numbers = #tpu.dot_dimension_numbers<[1], [0], [0], [1], [0, 0, 1, 1], [], []>} : vector<16x32xbf16>, vector<32x32xbf16>, vector<16x32xf32> -> vector<16x32xf32>
    %166 = arith.addf %35, %165 : vector<16x32xf32>
    %167 = vector.broadcast %54 : vector<1x32xf32> to vector<16x32xf32>
    %168 = arith.addf %166, %167 : vector<16x32xf32>
    %169 = arith.truncf %168 : vector<16x32xf32> to vector<16x32xbf16>
    %cst_110 = arith.constant dense<0.000000e+00> : vector<16x64xf32>
    %170 = tpu.matmul %169, %56, %cst_110 {dimension_numbers = #tpu.dot_dimension_numbers<[1], [0], [0], [1], [0, 0, 1, 1], [], []>} : vector<16x32xbf16>, vector<32x64xbf16>, vector<16x64xf32> -> vector<16x64xf32>
    %171 = vector.broadcast %58 : vector<1x64xf32> to vector<16x64xf32>
    %172 = arith.addf %170, %171 : vector<16x64xf32>
    %173 = arith.negf %172 : vector<16x64xf32>
    %174 = math.exp %173 : vector<16x64xf32>
    %cst_111 = arith.constant 1.000000e+00 : f32
    %175 = vector.broadcast %cst_111 : f32 to vector<16x64xf32>
    %176 = arith.addf %175, %174 : vector<16x64xf32>
    %177 = arith.divf %175, %176 : vector<16x64xf32>
    %178 = arith.mulf %172, %177 : vector<16x64xf32>
    %179 = arith.truncf %178 : vector<16x64xf32> to vector<16x64xbf16>
    %cst_112 = arith.constant dense<0.000000e+00> : vector<16x32xf32>
    %180 = tpu.matmul %179, %60, %cst_112 {dimension_numbers = #tpu.dot_dimension_numbers<[1], [0], [0], [1], [0, 0, 1, 1], [], []>} : vector<16x64xbf16>, vector<64x32xbf16>, vector<16x32xf32> -> vector<16x32xf32>
    %181 = arith.addf %168, %180 : vector<16x32xf32>
    %182 = arith.truncf %95 : vector<32x32xf32> to vector<32x32xbf16>
    %cst_113 = arith.constant dense<0.000000e+00> : vector<32x32xf32>
    %183 = tpu.matmul %182, %62, %cst_113 {dimension_numbers = #tpu.dot_dimension_numbers<[1], [0], [0], [1], [0, 0, 1, 1], [], []>} : vector<32x32xbf16>, vector<32x32xbf16>, vector<32x32xf32> -> vector<32x32xf32>
    %184 = arith.addf %42, %183 : vector<32x32xf32>
    %185 = vector.broadcast %64 : vector<1x32xf32> to vector<32x32xf32>
    %186 = arith.addf %184, %185 : vector<32x32xf32>
    %187 = arith.truncf %186 : vector<32x32xf32> to vector<32x32xbf16>
    %cst_114 = arith.constant dense<0.000000e+00> : vector<32x64xf32>
    %188 = tpu.matmul %187, %66, %cst_114 {dimension_numbers = #tpu.dot_dimension_numbers<[1], [0], [0], [1], [0, 0, 1, 1], [], []>} : vector<32x32xbf16>, vector<32x64xbf16>, vector<32x64xf32> -> vector<32x64xf32>
    %189 = vector.broadcast %68 : vector<1x64xf32> to vector<32x64xf32>
    %190 = arith.addf %188, %189 : vector<32x64xf32>
    %191 = arith.negf %190 : vector<32x64xf32>
    %192 = math.exp %191 : vector<32x64xf32>
    %cst_115 = arith.constant 1.000000e+00 : f32
    %193 = vector.broadcast %cst_115 : f32 to vector<32x64xf32>
    %194 = arith.addf %193, %192 : vector<32x64xf32>
    %195 = arith.divf %193, %194 : vector<32x64xf32>
    %196 = arith.mulf %190, %195 : vector<32x64xf32>
    %197 = arith.truncf %196 : vector<32x64xf32> to vector<32x64xbf16>
    %cst_116 = arith.constant dense<0.000000e+00> : vector<32x32xf32>
    %198 = tpu.matmul %197, %70, %cst_116 {dimension_numbers = #tpu.dot_dimension_numbers<[1], [0], [0], [1], [0, 0, 1, 1], [], []>} : vector<32x64xbf16>, vector<64x32xbf16>, vector<32x32xf32> -> vector<32x32xf32>
    %199 = arith.addf %186, %198 : vector<32x32xf32>
    %c0_117 = arith.constant 0 : index
    %c0_118 = arith.constant 0 : index
    %200 = vector.load %arg23[%c0_117, %c0_118] : memref<32x96xbf16, #tpu.memory_space<vmem>>, vector<32x96xbf16>
    %c0_119 = arith.constant 0 : index
    %c0_120 = arith.constant 0 : index
    %201 = vector.load %arg24[%c0_119, %c0_120] : memref<1x96xf32, #tpu.memory_space<vmem>>, vector<1x96xf32>
    %c0_121 = arith.constant 0 : index
    %c0_122 = arith.constant 0 : index
    %202 = vector.load %arg25[%c0_121, %c0_122] : memref<32x32xbf16, #tpu.memory_space<vmem>>, vector<32x32xbf16>
    %c0_123 = arith.constant 0 : index
    %c0_124 = arith.constant 0 : index
    %203 = vector.load %arg26[%c0_123, %c0_124] : memref<1x32xf32, #tpu.memory_space<vmem>>, vector<1x32xf32>
    %c0_125 = arith.constant 0 : index
    %c0_126 = arith.constant 0 : index
    %204 = vector.load %arg27[%c0_125, %c0_126] : memref<32x32xbf16, #tpu.memory_space<vmem>>, vector<32x32xbf16>
    %c0_127 = arith.constant 0 : index
    %c0_128 = arith.constant 0 : index
    %205 = vector.load %arg28[%c0_127, %c0_128] : memref<1x32xf32, #tpu.memory_space<vmem>>, vector<1x32xf32>
    %c0_129 = arith.constant 0 : index
    %c0_130 = arith.constant 0 : index
    %206 = vector.load %arg29[%c0_129, %c0_130] : memref<32x64xbf16, #tpu.memory_space<vmem>>, vector<32x64xbf16>
    %c0_131 = arith.constant 0 : index
    %c0_132 = arith.constant 0 : index
    %207 = vector.load %arg30[%c0_131, %c0_132] : memref<1x64xf32, #tpu.memory_space<vmem>>, vector<1x64xf32>
    %c0_133 = arith.constant 0 : index
    %c0_134 = arith.constant 0 : index
    %208 = vector.load %arg31[%c0_133, %c0_134] : memref<64x32xbf16, #tpu.memory_space<vmem>>, vector<64x32xbf16>
    %209 = arith.truncf %181 : vector<16x32xf32> to vector<16x32xbf16>
    %cst_135 = arith.constant dense<0.000000e+00> : vector<16x96xf32>
    %210 = tpu.matmul %209, %200, %cst_135 {dimension_numbers = #tpu.dot_dimension_numbers<[1], [0], [0], [1], [0, 0, 1, 1], [], []>} : vector<16x32xbf16>, vector<32x96xbf16>, vector<16x96xf32> -> vector<16x96xf32>
    %211 = vector.broadcast %201 : vector<1x96xf32> to vector<16x96xf32>
    %212 = arith.addf %210, %211 : vector<16x96xf32>
    %213 = vector.extract_strided_slice %212 {offsets = [0, 0], sizes = [16, 32], strides = [1, 1]} : vector<16x96xf32> to vector<16x32xf32>
    %c0_136 = arith.constant 0 : index
    %c0_137 = arith.constant 0 : index
    %214 = vector.load %arg34[%c0_136, %c0_137] : memref<16x32xf32, #tpu.memory_space<vmem>>, vector<16x32xf32>
    tpu.vector_store %arg34[%c0_136, %c0_137], %213 {strides = array<i32>} : memref<16x32xf32, #tpu.memory_space<vmem>>, vector<16x32xf32>,
    %215 = vector.extract_strided_slice %212 {offsets = [0, 32], sizes = [16, 32], strides = [1, 1]} : vector<16x96xf32> to vector<16x32xf32>
    %c0_138 = arith.constant 0 : index
    %c0_139 = arith.constant 0 : index
    %216 = vector.load %arg35[%c0_138, %c0_139] : memref<16x32xf32, #tpu.memory_space<vmem>>, vector<16x32xf32>
    tpu.vector_store %arg35[%c0_138, %c0_139], %215 {strides = array<i32>} : memref<16x32xf32, #tpu.memory_space<vmem>>, vector<16x32xf32>,
    %217 = vector.extract_strided_slice %212 {offsets = [0, 64], sizes = [16, 32], strides = [1, 1]} : vector<16x96xf32> to vector<16x32xf32>
    %c0_140 = arith.constant 0 : index
    %c0_141 = arith.constant 0 : index
    %218 = vector.load %arg36[%c0_140, %c0_141] : memref<16x32xf32, #tpu.memory_space<vmem>>, vector<16x32xf32>
    tpu.vector_store %arg36[%c0_140, %c0_141], %217 {strides = array<i32>} : memref<16x32xf32, #tpu.memory_space<vmem>>, vector<16x32xf32>,
    %219 = arith.truncf %199 : vector<32x32xf32> to vector<32x32xbf16>
    %cst_142 = arith.constant dense<0.000000e+00> : vector<32x32xf32>
    %220 = tpu.matmul %219, %202, %cst_142 {dimension_numbers = #tpu.dot_dimension_numbers<[1], [0], [0], [1], [0, 0, 1, 1], [], []>} : vector<32x32xbf16>, vector<32x32xbf16>, vector<32x32xf32> -> vector<32x32xf32>
    %221 = vector.broadcast %203 : vector<1x32xf32> to vector<32x32xf32>
    %222 = arith.addf %220, %221 : vector<32x32xf32>
    %c0_i32_143 = arith.constant 0 : i32
    %c32_i32_144 = arith.constant 32 : i32
    %223 = arith.addi %c0_i32_143, %c32_i32_144 : i32
    %c1_i32_145 = arith.constant 1 : i32
    scf.for %arg44 = %c0_i32_143 to %223 step %c1_i32_145  : i32 {
      %c1_i32_196 = arith.constant 1 : i32
      %322 = arith.muli %arg44, %c1_i32_196 : i32
      %c0_i32_197 = arith.constant 0 : i32
      %323 = arith.addi %c0_i32_197, %322 : i32
      %324 = arith.index_cast %323 : i32 to index
      %325 = memref.load %arg1[%324] : memref<32xi32, #tpu.memory_space<smem>>
      %326 = arith.index_cast %323 : i32 to index
      %327 = memref.load %arg2[%326] : memref<32xi32, #tpu.memory_space<smem>>
      %328 = arith.index_cast %325 : i32 to index
      %c0_198 = arith.constant 0 : index
      %329 = vector.load %arg35[%328, %c0_198] : memref<16x32xf32, #tpu.memory_space<vmem>>, vector<1x32xf32>
      %330 = arith.index_cast %323 : i32 to index
      %c0_199 = arith.constant 0 : index
      %331 = vector.load %arg37[%330, %c0_199] : memref<32x32xf32, #tpu.memory_space<vmem>>, vector<1x32xf32>
      tpu.vector_store %arg37[%330, %c0_199], %329 {strides = array<i32>} : memref<32x32xf32, #tpu.memory_space<vmem>>, vector<1x32xf32>,
      %332 = arith.index_cast %327 : i32 to index
      %c0_200 = arith.constant 0 : index
      %333 = vector.load %arg34[%332, %c0_200] : memref<16x32xf32, #tpu.memory_space<vmem>>, vector<1x32xf32>
      %334 = arith.index_cast %323 : i32 to index
      %c0_201 = arith.constant 0 : index
      %335 = vector.load %arg38[%334, %c0_201] : memref<32x32xf32, #tpu.memory_space<vmem>>, vector<1x32xf32>
      tpu.vector_store %arg38[%334, %c0_201], %333 {strides = array<i32>} : memref<32x32xf32, #tpu.memory_space<vmem>>, vector<1x32xf32>,
      %336 = arith.index_cast %325 : i32 to index
      %c0_202 = arith.constant 0 : index
      %337 = vector.load %arg36[%336, %c0_202] : memref<16x32xf32, #tpu.memory_space<vmem>>, vector<1x32xf32>
      %338 = arith.index_cast %323 : i32 to index
      %c0_203 = arith.constant 0 : index
      %339 = vector.load %arg39[%338, %c0_203] : memref<32x32xf32, #tpu.memory_space<vmem>>, vector<1x32xf32>
      tpu.vector_store %arg39[%338, %c0_203], %337 {strides = array<i32>} : memref<32x32xf32, #tpu.memory_space<vmem>>, vector<1x32xf32>,
    }
    %c32_i32_146 = arith.constant 32 : i32
    %c0_147 = arith.constant 0 : index
    %c0_148 = arith.constant 0 : index
    %224 = vector.load %arg37[%c0_147, %c0_148] : memref<32x32xf32, #tpu.memory_space<vmem>>, vector<32x32xf32>
    %c0_149 = arith.constant 0 : index
    %c0_150 = arith.constant 0 : index
    %225 = vector.load %arg38[%c0_149, %c0_150] : memref<32x32xf32, #tpu.memory_space<vmem>>, vector<32x32xf32>
    %226 = arith.mulf %224, %225 : vector<32x32xf32>
    %cst_151 = arith.constant 0.353553385 : f32
    %227 = vector.broadcast %cst_151 : f32 to vector<32x32xf32>
    %228 = arith.mulf %226, %227 : vector<32x32xf32>
    %cst_152 = arith.constant -5.000000e+00 : f32
    %cst_153 = arith.constant 5.000000e+00 : f32
    %229 = vector.broadcast %cst_152 : f32 to vector<32x32xf32>
    %230 = arith.maximumf %229, %228 : vector<32x32xf32>
    %231 = vector.broadcast %cst_153 : f32 to vector<32x32xf32>
    %232 = arith.minimumf %231, %230 : vector<32x32xf32>
    %233 = arith.mulf %232, %222 : vector<32x32xf32>
    %cst_154 = arith.constant 0.000000e+00 : f32
    %234 = vector.broadcast %cst_154 : f32 to vector<32x32xf32>
    %235 = vector.broadcast %7 : vector<1x32xf32> to vector<32x32xf32>
    %236 = arith.mulf %233, %235 : vector<32x32xf32>
    %cst_155 = arith.constant dense<0.000000e+00> : vector<32xf32>
    %237 = vector.multi_reduction <add>, %236, %cst_155 [1] : vector<32x32xf32> to vector<32xf32>
    %238 = vector.shape_cast %237 : vector<32xf32> to vector<32x1xf32>
    %cst_156 = arith.constant -5.000000e+00 : f32
    %cst_157 = arith.constant 5.000000e+00 : f32
    %239 = vector.broadcast %cst_156 : f32 to vector<32x1xf32>
    %240 = arith.maximumf %239, %238 : vector<32x1xf32>
    %241 = vector.broadcast %cst_157 : f32 to vector<32x1xf32>
    %242 = arith.minimumf %241, %240 : vector<32x1xf32>
    %243 = math.exp %242 : vector<32x1xf32>
    %244 = vector.broadcast %243 : vector<32x1xf32> to vector<32x32xf32>
    %245 = vector.broadcast %7 : vector<1x32xf32> to vector<32x32xf32>
    %246 = arith.mulf %244, %245 : vector<32x32xf32>
    %247 = arith.addf %234, %246 : vector<32x32xf32>
    %248 = vector.broadcast %14 : vector<1x32xf32> to vector<32x32xf32>
    %249 = arith.mulf %233, %248 : vector<32x32xf32>
    %cst_158 = arith.constant dense<0.000000e+00> : vector<32xf32>
    %250 = vector.multi_reduction <add>, %249, %cst_158 [1] : vector<32x32xf32> to vector<32xf32>
    %251 = vector.shape_cast %250 : vector<32xf32> to vector<32x1xf32>
    %cst_159 = arith.constant -5.000000e+00 : f32
    %cst_160 = arith.constant 5.000000e+00 : f32
    %252 = vector.broadcast %cst_159 : f32 to vector<32x1xf32>
    %253 = arith.maximumf %252, %251 : vector<32x1xf32>
    %254 = vector.broadcast %cst_160 : f32 to vector<32x1xf32>
    %255 = arith.minimumf %254, %253 : vector<32x1xf32>
    %256 = math.exp %255 : vector<32x1xf32>
    %257 = vector.broadcast %256 : vector<32x1xf32> to vector<32x32xf32>
    %258 = vector.broadcast %14 : vector<1x32xf32> to vector<32x32xf32>
    %259 = arith.mulf %257, %258 : vector<32x32xf32>
    %260 = arith.addf %247, %259 : vector<32x32xf32>
    %261 = vector.broadcast %21 : vector<1x32xf32> to vector<32x32xf32>
    %262 = arith.mulf %233, %261 : vector<32x32xf32>
    %cst_161 = arith.constant dense<0.000000e+00> : vector<32xf32>
    %263 = vector.multi_reduction <add>, %262, %cst_161 [1] : vector<32x32xf32> to vector<32xf32>
    %264 = vector.shape_cast %263 : vector<32xf32> to vector<32x1xf32>
    %cst_162 = arith.constant -5.000000e+00 : f32
    %cst_163 = arith.constant 5.000000e+00 : f32
    %265 = vector.broadcast %cst_162 : f32 to vector<32x1xf32>
    %266 = arith.maximumf %265, %264 : vector<32x1xf32>
    %267 = vector.broadcast %cst_163 : f32 to vector<32x1xf32>
    %268 = arith.minimumf %267, %266 : vector<32x1xf32>
    %269 = math.exp %268 : vector<32x1xf32>
    %270 = vector.broadcast %269 : vector<32x1xf32> to vector<32x32xf32>
    %271 = vector.broadcast %21 : vector<1x32xf32> to vector<32x32xf32>
    %272 = arith.mulf %270, %271 : vector<32x32xf32>
    %273 = arith.addf %260, %272 : vector<32x32xf32>
    %274 = vector.broadcast %28 : vector<1x32xf32> to vector<32x32xf32>
    %275 = arith.mulf %233, %274 : vector<32x32xf32>
    %cst_164 = arith.constant dense<0.000000e+00> : vector<32xf32>
    %276 = vector.multi_reduction <add>, %275, %cst_164 [1] : vector<32x32xf32> to vector<32xf32>
    %277 = vector.shape_cast %276 : vector<32xf32> to vector<32x1xf32>
    %cst_165 = arith.constant -5.000000e+00 : f32
    %cst_166 = arith.constant 5.000000e+00 : f32
    %278 = vector.broadcast %cst_165 : f32 to vector<32x1xf32>
    %279 = arith.maximumf %278, %277 : vector<32x1xf32>
    %280 = vector.broadcast %cst_166 : f32 to vector<32x1xf32>
    %281 = arith.minimumf %280, %279 : vector<32x1xf32>
    %282 = math.exp %281 : vector<32x1xf32>
    %283 = vector.broadcast %282 : vector<32x1xf32> to vector<32x32xf32>
    %284 = vector.broadcast %28 : vector<1x32xf32> to vector<32x32xf32>
    %285 = arith.mulf %283, %284 : vector<32x32xf32>
    %286 = arith.addf %273, %285 : vector<32x32xf32>
    %c0_167 = arith.constant 0 : index
    %c0_168 = arith.constant 0 : index
    %287 = vector.load %arg39[%c0_167, %c0_168] : memref<32x32xf32, #tpu.memory_space<vmem>>, vector<32x32xf32>
    %288 = arith.mulf %287, %286 : vector<32x32xf32>
    %c0_169 = arith.constant 0 : index
    %c0_170 = arith.constant 0 : index
    %289 = vector.load %arg40[%c0_169, %c0_170] : memref<32x32xf32, #tpu.memory_space<vmem>>, vector<32x32xf32>
    tpu.vector_store %arg40[%c0_169, %c0_170], %288 {strides = array<i32>} : memref<32x32xf32, #tpu.memory_space<vmem>>, vector<32x32xf32>,
    %c0_171 = arith.constant 0 : index
    %c0_172 = arith.constant 0 : index
    %290 = vector.load %arg41[%c0_171, %c0_172] : memref<32x32xf32, #tpu.memory_space<vmem>>, vector<32x32xf32>
    tpu.vector_store %arg41[%c0_171, %c0_172], %286 {strides = array<i32>} : memref<32x32xf32, #tpu.memory_space<vmem>>, vector<32x32xf32>,
    %cst_173 = arith.constant 0.000000e+00 : f32
    %291 = vector.broadcast %cst_173 : f32 to vector<16x32xf32>
    %c0_174 = arith.constant 0 : index
    %c0_175 = arith.constant 0 : index
    %292 = vector.load %arg42[%c0_174, %c0_175] : memref<16x32xf32, #tpu.memory_space<vmem>>, vector<16x32xf32>
    tpu.vector_store %arg42[%c0_174, %c0_175], %291 {strides = array<i32>} : memref<16x32xf32, #tpu.memory_space<vmem>>, vector<16x32xf32>,
    %cst_176 = arith.constant 0.000000e+00 : f32
    %293 = vector.broadcast %cst_176 : f32 to vector<16x32xf32>
    %c0_177 = arith.constant 0 : index
    %c0_178 = arith.constant 0 : index
    %294 = vector.load %arg43[%c0_177, %c0_178] : memref<16x32xf32, #tpu.memory_space<vmem>>, vector<16x32xf32>
    tpu.vector_store %arg43[%c0_177, %c0_178], %293 {strides = array<i32>} : memref<16x32xf32, #tpu.memory_space<vmem>>, vector<16x32xf32>,
    %c0_i32_179 = arith.constant 0 : i32
    %c32_i32_180 = arith.constant 32 : i32
    %295 = arith.addi %c0_i32_179, %c32_i32_180 : i32
    %c1_i32_181 = arith.constant 1 : i32
    scf.for %arg44 = %c0_i32_179 to %295 step %c1_i32_181  : i32 {
      %c1_i32_196 = arith.constant 1 : i32
      %322 = arith.muli %arg44, %c1_i32_196 : i32
      %c0_i32_197 = arith.constant 0 : i32
      %323 = arith.addi %c0_i32_197, %322 : i32
      %324 = arith.index_cast %323 : i32 to index
      %325 = memref.load %arg2[%324] : memref<32xi32, #tpu.memory_space<smem>>
      %326 = arith.index_cast %325 : i32 to index
      %c0_198 = arith.constant 0 : index
      %327 = vector.load %arg42[%326, %c0_198] : memref<16x32xf32, #tpu.memory_space<vmem>>, vector<1x32xf32>
      %328 = arith.index_cast %323 : i32 to index
      %c0_199 = arith.constant 0 : index
      %329 = vector.load %arg40[%328, %c0_199] : memref<32x32xf32, #tpu.memory_space<vmem>>, vector<1x32xf32>
      %330 = arith.addf %327, %329 : vector<1x32xf32>
      %331 = arith.index_cast %325 : i32 to index
      %c0_200 = arith.constant 0 : index
      %332 = vector.load %arg42[%331, %c0_200] : memref<16x32xf32, #tpu.memory_space<vmem>>, vector<1x32xf32>
      tpu.vector_store %arg42[%331, %c0_200], %330 {strides = array<i32>} : memref<16x32xf32, #tpu.memory_space<vmem>>, vector<1x32xf32>,
      %333 = arith.index_cast %325 : i32 to index
      %c0_201 = arith.constant 0 : index
      %334 = vector.load %arg43[%333, %c0_201] : memref<16x32xf32, #tpu.memory_space<vmem>>, vector<1x32xf32>
      %335 = arith.index_cast %323 : i32 to index
      %c0_202 = arith.constant 0 : index
      %336 = vector.load %arg41[%335, %c0_202] : memref<32x32xf32, #tpu.memory_space<vmem>>, vector<1x32xf32>
      %337 = arith.addf %334, %336 : vector<1x32xf32>
      %338 = arith.index_cast %325 : i32 to index
      %c0_203 = arith.constant 0 : index
      %339 = vector.load %arg43[%338, %c0_203] : memref<16x32xf32, #tpu.memory_space<vmem>>, vector<1x32xf32>
      tpu.vector_store %arg43[%338, %c0_203], %337 {strides = array<i32>} : memref<16x32xf32, #tpu.memory_space<vmem>>, vector<1x32xf32>,
    }
    %c32_i32_182 = arith.constant 32 : i32
    %c0_183 = arith.constant 0 : index
    %c0_184 = arith.constant 0 : index
    %296 = vector.load %arg42[%c0_183, %c0_184] : memref<16x32xf32, #tpu.memory_space<vmem>>, vector<16x32xf32>
    %c0_185 = arith.constant 0 : index
    %c0_186 = arith.constant 0 : index
    %297 = vector.load %arg43[%c0_185, %c0_186] : memref<16x32xf32, #tpu.memory_space<vmem>>, vector<16x32xf32>
    %cst_187 = arith.constant 9.99999997E-7 : f32
    %298 = vector.broadcast %cst_187 : f32 to vector<16x32xf32>
    %299 = arith.addf %297, %298 : vector<16x32xf32>
    %300 = tpu.reciprocal %299 {approx = true} : vector<16x32xf32> -> vector<16x32xf32>
    %301 = arith.mulf %296, %300 : vector<16x32xf32>
    %302 = arith.truncf %301 : vector<16x32xf32> to vector<16x32xbf16>
    %cst_188 = arith.constant dense<0.000000e+00> : vector<16x32xf32>
    %303 = tpu.matmul %302, %204, %cst_188 {dimension_numbers = #tpu.dot_dimension_numbers<[1], [0], [0], [1], [0, 0, 1, 1], [], []>} : vector<16x32xbf16>, vector<32x32xbf16>, vector<16x32xf32> -> vector<16x32xf32>
    %304 = arith.addf %181, %303 : vector<16x32xf32>
    %305 = vector.broadcast %205 : vector<1x32xf32> to vector<16x32xf32>
    %306 = arith.addf %304, %305 : vector<16x32xf32>
    %307 = arith.truncf %306 : vector<16x32xf32> to vector<16x32xbf16>
    %cst_189 = arith.constant dense<0.000000e+00> : vector<16x64xf32>
    %308 = tpu.matmul %307, %206, %cst_189 {dimension_numbers = #tpu.dot_dimension_numbers<[1], [0], [0], [1], [0, 0, 1, 1], [], []>} : vector<16x32xbf16>, vector<32x64xbf16>, vector<16x64xf32> -> vector<16x64xf32>
    %309 = vector.broadcast %207 : vector<1x64xf32> to vector<16x64xf32>
    %310 = arith.addf %308, %309 : vector<16x64xf32>
    %311 = arith.negf %310 : vector<16x64xf32>
    %312 = math.exp %311 : vector<16x64xf32>
    %cst_190 = arith.constant 1.000000e+00 : f32
    %313 = vector.broadcast %cst_190 : f32 to vector<16x64xf32>
    %314 = arith.addf %313, %312 : vector<16x64xf32>
    %315 = arith.divf %313, %314 : vector<16x64xf32>
    %316 = arith.mulf %310, %315 : vector<16x64xf32>
    %317 = arith.truncf %316 : vector<16x64xf32> to vector<16x64xbf16>
    %cst_191 = arith.constant dense<0.000000e+00> : vector<16x32xf32>
    %318 = tpu.matmul %317, %208, %cst_191 {dimension_numbers = #tpu.dot_dimension_numbers<[1], [0], [0], [1], [0, 0, 1, 1], [], []>} : vector<16x64xbf16>, vector<64x32xbf16>, vector<16x32xf32> -> vector<16x32xf32>
    %319 = arith.addf %306, %318 : vector<16x32xf32>
    %c0_192 = arith.constant 0 : index
    %c0_193 = arith.constant 0 : index
    %320 = vector.load %arg32[%c0_192, %c0_193] : memref<16x32xf32, #tpu.memory_space<vmem>>, vector<16x32xf32>
    tpu.vector_store %arg32[%c0_192, %c0_193], %319 {strides = array<i32>} : memref<16x32xf32, #tpu.memory_space<vmem>>, vector<16x32xf32>,
    %c0_194 = arith.constant 0 : index
    %c0_195 = arith.constant 0 : index
    %321 = vector.load %arg33[%c0_194, %c0_195] : memref<32x32xf32, #tpu.memory_space<vmem>>, vector<32x32xf32>
    tpu.vector_store %arg33[%c0_194, %c0_195], %199 {strides = array<i32>} : memref<32x32xf32, #tpu.memory_space<vmem>>, vector<32x32xf32>,
    return
  }
  func.func @transform_0(%arg0: i32, %arg1: memref<32xi32, #tpu.memory_space<smem>>, %arg2: memref<32xi32, #tpu.memory_space<smem>>) -> (i32, i32) {
    %c0_i32 = arith.constant 0 : i32
    %c0_i32_0 = arith.constant 0 : i32
    %c0_i32_1 = arith.constant 0 : i32
    return %c0_i32, %c0_i32_0 : i32, i32
  }
  func.func @transform_1(%arg0: i32, %arg1: memref<32xi32, #tpu.memory_space<smem>>, %arg2: memref<32xi32, #tpu.memory_space<smem>>) -> (i32, i32) {
    %c0_i32 = arith.constant 0 : i32
    %c0_i32_0 = arith.constant 0 : i32
    %c0_i32_1 = arith.constant 0 : i32
    return %c0_i32, %c0_i32_0 : i32, i32
  }
  func.func @transform_2(%arg0: i32, %arg1: memref<32xi32, #tpu.memory_space<smem>>, %arg2: memref<32xi32, #tpu.memory_space<smem>>) -> (i32, i32) {
    %c0_i32 = arith.constant 0 : i32
    %c0_i32_0 = arith.constant 0 : i32
    %c0_i32_1 = arith.constant 0 : i32
    return %c0_i32, %c0_i32_0 : i32, i32
  }
  func.func @transform_3(%arg0: i32, %arg1: memref<32xi32, #tpu.memory_space<smem>>, %arg2: memref<32xi32, #tpu.memory_space<smem>>) -> (i32, i32) {
    %c0_i32 = arith.constant 0 : i32
    %c0_i32_0 = arith.constant 0 : i32
    %c0_i32_1 = arith.constant 0 : i32
    return %c0_i32, %c0_i32_0 : i32, i32
  }
  func.func @transform_4(%arg0: i32, %arg1: memref<32xi32, #tpu.memory_space<smem>>, %arg2: memref<32xi32, #tpu.memory_space<smem>>) -> (i32, i32) {
    %c0_i32 = arith.constant 0 : i32
    %c0_i32_0 = arith.constant 0 : i32
    %c0_i32_1 = arith.constant 0 : i32
    return %c0_i32, %c0_i32_0 : i32, i32
  }
  func.func @transform_5(%arg0: i32, %arg1: memref<32xi32, #tpu.memory_space<smem>>, %arg2: memref<32xi32, #tpu.memory_space<smem>>) -> (i32, i32) {
    %c0_i32 = arith.constant 0 : i32
    %c0_i32_0 = arith.constant 0 : i32
    %c0_i32_1 = arith.constant 0 : i32
    return %c0_i32, %c0_i32_0 : i32, i32
  }
  func.func @transform_6(%arg0: i32, %arg1: memref<32xi32, #tpu.memory_space<smem>>, %arg2: memref<32xi32, #tpu.memory_space<smem>>) -> (i32, i32, i32) {
    %c0_i32 = arith.constant 0 : i32
    %c0_i32_0 = arith.constant 0 : i32
    %c0_i32_1 = arith.constant 0 : i32
    %c0_i32_2 = arith.constant 0 : i32
    return %c0_i32, %c0_i32_0, %c0_i32_1 : i32, i32, i32
  }
  func.func @transform_7(%arg0: i32, %arg1: memref<32xi32, #tpu.memory_space<smem>>, %arg2: memref<32xi32, #tpu.memory_space<smem>>) -> (i32, i32, i32) {
    %c0_i32 = arith.constant 0 : i32
    %c0_i32_0 = arith.constant 0 : i32
    %c0_i32_1 = arith.constant 0 : i32
    %c0_i32_2 = arith.constant 0 : i32
    return %c0_i32, %c0_i32_0, %c0_i32_1 : i32, i32, i32
  }
  func.func @transform_8(%arg0: i32, %arg1: memref<32xi32, #tpu.memory_space<smem>>, %arg2: memref<32xi32, #tpu.memory_space<smem>>) -> (i32, i32, i32) {
    %c0_i32 = arith.constant 0 : i32
    %c0_i32_0 = arith.constant 0 : i32
    %c0_i32_1 = arith.constant 0 : i32
    %c0_i32_2 = arith.constant 0 : i32
    return %c0_i32, %c0_i32_0, %c0_i32_1 : i32, i32, i32
  }
  func.func @transform_9(%arg0: i32, %arg1: memref<32xi32, #tpu.memory_space<smem>>, %arg2: memref<32xi32, #tpu.memory_space<smem>>) -> (i32, i32, i32) {
    %c0_i32 = arith.constant 0 : i32
    %c0_i32_0 = arith.constant 0 : i32
    %c0_i32_1 = arith.constant 0 : i32
    %c0_i32_2 = arith.constant 0 : i32
    return %c0_i32, %c0_i32_0, %c0_i32_1 : i32, i32, i32
  }
  func.func @transform_10(%arg0: i32, %arg1: memref<32xi32, #tpu.memory_space<smem>>, %arg2: memref<32xi32, #tpu.memory_space<smem>>) -> (i32, i32, i32) {
    %c0_i32 = arith.constant 0 : i32
    %c0_i32_0 = arith.constant 0 : i32
    %c0_i32_1 = arith.constant 0 : i32
    %c0_i32_2 = arith.constant 0 : i32
    return %c0_i32, %c0_i32_0, %c0_i32_1 : i32, i32, i32
  }
  func.func @transform_11(%arg0: i32, %arg1: memref<32xi32, #tpu.memory_space<smem>>, %arg2: memref<32xi32, #tpu.memory_space<smem>>) -> (i32, i32, i32) {
    %c0_i32 = arith.constant 0 : i32
    %c0_i32_0 = arith.constant 0 : i32
    %c0_i32_1 = arith.constant 0 : i32
    %c0_i32_2 = arith.constant 0 : i32
    return %c0_i32, %c0_i32_0, %c0_i32_1 : i32, i32, i32
  }
  func.func @transform_12(%arg0: i32, %arg1: memref<32xi32, #tpu.memory_space<smem>>, %arg2: memref<32xi32, #tpu.memory_space<smem>>) -> (i32, i32, i32) {
    %c0_i32 = arith.constant 0 : i32
    %c0_i32_0 = arith.constant 0 : i32
    %c0_i32_1 = arith.constant 0 : i32
    %c0_i32_2 = arith.constant 0 : i32
    return %c0_i32, %c0_i32_0, %c0_i32_1 : i32, i32, i32
  }
  func.func @transform_13(%arg0: i32, %arg1: memref<32xi32, #tpu.memory_space<smem>>, %arg2: memref<32xi32, #tpu.memory_space<smem>>) -> (i32, i32, i32) {
    %c0_i32 = arith.constant 0 : i32
    %c0_i32_0 = arith.constant 0 : i32
    %c0_i32_1 = arith.constant 0 : i32
    %c0_i32_2 = arith.constant 0 : i32
    return %c0_i32, %c0_i32_0, %c0_i32_1 : i32, i32, i32
  }
  func.func @transform_14(%arg0: i32, %arg1: memref<32xi32, #tpu.memory_space<smem>>, %arg2: memref<32xi32, #tpu.memory_space<smem>>) -> (i32, i32, i32) {
    %c0_i32 = arith.constant 0 : i32
    %c0_i32_0 = arith.constant 0 : i32
    %c0_i32_1 = arith.constant 0 : i32
    %c0_i32_2 = arith.constant 0 : i32
    return %c0_i32, %c0_i32_0, %c0_i32_1 : i32, i32, i32
  }
  func.func @transform_15(%arg0: i32, %arg1: memref<32xi32, #tpu.memory_space<smem>>, %arg2: memref<32xi32, #tpu.memory_space<smem>>) -> (i32, i32, i32) {
    %c0_i32 = arith.constant 0 : i32
    %c0_i32_0 = arith.constant 0 : i32
    %c0_i32_1 = arith.constant 0 : i32
    %c0_i32_2 = arith.constant 0 : i32
    return %c0_i32, %c0_i32_0, %c0_i32_1 : i32, i32, i32
  }
  func.func @transform_16(%arg0: i32, %arg1: memref<32xi32, #tpu.memory_space<smem>>, %arg2: memref<32xi32, #tpu.memory_space<smem>>) -> (i32, i32, i32) {
    %c0_i32 = arith.constant 0 : i32
    %c0_i32_0 = arith.constant 0 : i32
    %c0_i32_1 = arith.constant 0 : i32
    %c0_i32_2 = arith.constant 0 : i32
    return %c0_i32, %c0_i32_0, %c0_i32_1 : i32, i32, i32
  }
  func.func @transform_17(%arg0: i32, %arg1: memref<32xi32, #tpu.memory_space<smem>>, %arg2: memref<32xi32, #tpu.memory_space<smem>>) -> (i32, i32, i32) {
    %c0_i32 = arith.constant 0 : i32
    %c0_i32_0 = arith.constant 0 : i32
    %c0_i32_1 = arith.constant 0 : i32
    %c0_i32_2 = arith.constant 0 : i32
    return %c0_i32, %c0_i32_0, %c0_i32_1 : i32, i32, i32
  }
  func.func @transform_18(%arg0: i32, %arg1: memref<32xi32, #tpu.memory_space<smem>>, %arg2: memref<32xi32, #tpu.memory_space<smem>>) -> (i32, i32, i32) {
    %c0_i32 = arith.constant 0 : i32
    %c0_i32_0 = arith.constant 0 : i32
    %c0_i32_1 = arith.constant 0 : i32
    %c0_i32_2 = arith.constant 0 : i32
    return %c0_i32, %c0_i32_0, %c0_i32_1 : i32, i32, i32
  }
  func.func @transform_19(%arg0: i32, %arg1: memref<32xi32, #tpu.memory_space<smem>>, %arg2: memref<32xi32, #tpu.memory_space<smem>>) -> (i32, i32, i32) {
    %c0_i32 = arith.constant 0 : i32
    %c0_i32_0 = arith.constant 0 : i32
    %c0_i32_1 = arith.constant 0 : i32
    %c0_i32_2 = arith.constant 0 : i32
    return %c0_i32, %c0_i32_0, %c0_i32_1 : i32, i32, i32
  }
  func.func @transform_20(%arg0: i32, %arg1: memref<32xi32, #tpu.memory_space<smem>>, %arg2: memref<32xi32, #tpu.memory_space<smem>>) -> (i32, i32) {
    %c0_i32 = arith.constant 0 : i32
    %c0_i32_0 = arith.constant 0 : i32
    %c0_i32_1 = arith.constant 0 : i32
    return %c0_i32, %c0_i32_0 : i32, i32
  }
  func.func @transform_21(%arg0: i32, %arg1: memref<32xi32, #tpu.memory_space<smem>>, %arg2: memref<32xi32, #tpu.memory_space<smem>>) -> (i32, i32) {
    %c0_i32 = arith.constant 0 : i32
    %c0_i32_0 = arith.constant 0 : i32
    %c0_i32_1 = arith.constant 0 : i32
    return %c0_i32, %c0_i32_0 : i32, i32
  }
  func.func @transform_22(%arg0: i32, %arg1: memref<32xi32, #tpu.memory_space<smem>>, %arg2: memref<32xi32, #tpu.memory_space<smem>>) -> (i32, i32) {
    %c0_i32 = arith.constant 0 : i32
    %c0_i32_0 = arith.constant 0 : i32
    %c0_i32_1 = arith.constant 0 : i32
    return %c0_i32, %c0_i32_0 : i32, i32
  }
  func.func @transform_23(%arg0: i32, %arg1: memref<32xi32, #tpu.memory_space<smem>>, %arg2: memref<32xi32, #tpu.memory_space<smem>>) -> (i32, i32) {
    %c0_i32 = arith.constant 0 : i32
    %c0_i32_0 = arith.constant 0 : i32
    %c0_i32_1 = arith.constant 0 : i32
    return %c0_i32, %c0_i32_0 : i32, i32
  }
  func.func @transform_24(%arg0: i32, %arg1: memref<32xi32, #tpu.memory_space<smem>>, %arg2: memref<32xi32, #tpu.memory_space<smem>>) -> (i32, i32) {
    %c0_i32 = arith.constant 0 : i32
    %c0_i32_0 = arith.constant 0 : i32
    %c0_i32_1 = arith.constant 0 : i32
    return %c0_i32, %c0_i32_0 : i32, i32
  }
  func.func @transform_25(%arg0: i32, %arg1: memref<32xi32, #tpu.memory_space<smem>>, %arg2: memref<32xi32, #tpu.memory_space<smem>>) -> (i32, i32) {
    %c0_i32 = arith.constant 0 : i32
    %c0_i32_0 = arith.constant 0 : i32
    %c0_i32_1 = arith.constant 0 : i32
    return %c0_i32, %c0_i32_0 : i32, i32
  }
  func.func @transform_26(%arg0: i32, %arg1: memref<32xi32, #tpu.memory_space<smem>>, %arg2: memref<32xi32, #tpu.memory_space<smem>>) -> (i32, i32) {
    %c0_i32 = arith.constant 0 : i32
    %c0_i32_0 = arith.constant 0 : i32
    %c0_i32_1 = arith.constant 0 : i32
    return %c0_i32, %c0_i32_0 : i32, i32
  }
  func.func @transform_27(%arg0: i32, %arg1: memref<32xi32, #tpu.memory_space<smem>>, %arg2: memref<32xi32, #tpu.memory_space<smem>>) -> (i32, i32) {
    %c0_i32 = arith.constant 0 : i32
    %c0_i32_0 = arith.constant 0 : i32
    %c0_i32_1 = arith.constant 0 : i32
    return %c0_i32, %c0_i32_0 : i32, i32
  }
  func.func @transform_28(%arg0: i32, %arg1: memref<32xi32, #tpu.memory_space<smem>>, %arg2: memref<32xi32, #tpu.memory_space<smem>>) -> (i32, i32) {
    %c0_i32 = arith.constant 0 : i32
    %c0_i32_0 = arith.constant 0 : i32
    %c0_i32_1 = arith.constant 0 : i32
    return %c0_i32, %c0_i32_0 : i32, i32
  }
  func.func @transform_29(%arg0: i32, %arg1: memref<32xi32, #tpu.memory_space<smem>>, %arg2: memref<32xi32, #tpu.memory_space<smem>>) -> (i32, i32) {
    %c0_i32 = arith.constant 0 : i32
    %c0_i32_0 = arith.constant 0 : i32
    %c0_i32_1 = arith.constant 0 : i32
    return %c0_i32, %c0_i32_0 : i32, i32
  }
  func.func @transform_30(%arg0: i32, %arg1: memref<32xi32, #tpu.memory_space<smem>>, %arg2: memref<32xi32, #tpu.memory_space<smem>>) -> (i32, i32) {
    %c0_i32 = arith.constant 0 : i32
    %c0_i32_0 = arith.constant 0 : i32
    %c0_i32_1 = arith.constant 0 : i32
    return %c0_i32, %c0_i32_0 : i32, i32
  }
}

</mosaic_0001>

<bundles_post_ra>
// kernel: tpu_custom_call.1
= control target key start
LH: loop header
LB: loop body
LE: loop exit
PB: predicated region body
PF: predicated region fallthrough
CT: control target
= control target key end

     0   :  { %s2747_s6 = smov 2   ;;  %s2748_s10 = smov 3   ;;  %s3551_s0 = inlined_call_operand.smem [shape: u32[33], index: -1, kind: input, shape index: {}] }
   0x1   :  { %s2802_s5 = sld [smem:[%s3551_s0]]   ;;  %s2749_s14 = smov 4  }
   0x2   :  { %s2807_s9 = sld [smem:[%s3551_s0 + %s2747_s6]]   ;;  %s2750_s18 = smov 5  }
   0x3   :  { %s2812_s13 = sld [smem:[%s3551_s0 + %s2748_s10]]   ;;  %s2751_s22 = smov 6  }
   0x4   :  { %s2817_s17 = sld [smem:[%s3551_s0 + %s2749_s14]]   ;;  %s2752_s26 = smov 7  }
   0x5   :  { %s2822_s21 = sld [smem:[%s3551_s0 + %s2750_s18]]   ;;  %s2753_s30 = smov 8  }
   0x6   :  { %s2827_s25 = sld [smem:[%s3551_s0 + %s2751_s22]]   ;;  %s2754_s4 = smov 9  }
   0x7   :  { %s2832_s29 = sld [smem:[%s3551_s0 + %s2752_s26]]   ;;  %s2755_s10 = smov 10  }
   0x8   :  { %3569 = sst [smem:[#allocation32_spill]] %s2807_s9  ;;  %s2756_s15 = smov 11  }
   0x9   :  { %3570 = sst [smem:[#allocation33_spill]] %s2812_s13  ;;  %s2757_s20 = smov 12  }
   0xa   :  { %3571 = sst [smem:[#allocation34_spill]] %s2817_s17  ;;  %s2758_s26 = smov 13  }
   0xb   :  { %s2837_s3 = sld [smem:[%s3551_s0 + %s2753_s30]]   ;;  %s2759_s1 = smov 14  }
   0xc   :  { %s2842_s8 = sld [smem:[%s3551_s0 + %s2754_s4]]   ;;  %s2760_s7 = smov 15  }
   0xd   :  { %s2847_s14 = sld [smem:[%s3551_s0 + %s2755_s10]]   ;;  %s2762_s22 = smov 17  }
   0xe   :  { %s2852_s19 = sld [smem:[%s3551_s0 + %s2756_s15]]   ;;  %s2761_s15 = smov 16  }
   0xf   :  { %s2857_s24 = sld [smem:[%s3551_s0 + %s2757_s20]]   ;;  %s2763_s28 = smov 18  }
  0x10   :  { %s2862_s30 = sld [smem:[%s3551_s0 + %s2758_s26]]  }
  0x11   :  { %3572 = sst [smem:[#allocation35_spill]] %s2837_s3 }
  0x12   :  { %s2867_s6 = sld [smem:[%s3551_s0 + %s2759_s1]]   ;;  %s2780_s1 = smov [#allocation14]  }
  0x13   :  { %3573 = sst [smem:[#allocation36_spill]] %s2847_s14 }
  0x14   :  { %3574 = sst [smem:[#allocation37_spill]] %s2852_s19 }
  0x15   :  { %s2872_s12 = sld [smem:[%s3551_s0 + %s2760_s7]]   ;;  %s2764_s7 = smov 19  }
  0x16   :  { %s2877_s20 = sld [smem:[%s3551_s0 + %s2761_s15]]   ;;  %s2765_s15 = smov 20  }
  0x17   :  { %s2882_s27 = sld [smem:[%s3551_s0 + %s2762_s22]]   ;;  %s2766_s22 = smov 21  }
  0x18   :  { %s2887_s4 = sld [smem:[%s3551_s0 + %s2763_s28]]   ;;  %s2767_s28 = smov 22  }
  0x19   :  { %s2892_s19 = sld [smem:[%s3551_s0 + %s2764_s7]]   ;;  %s2768_s7 = smov 23  }
  0x1a   :  { %s2897_s14 = sld [smem:[%s3551_s0 + %s2765_s15]]   ;;  %s2769_s15 = smov 24  }
  0x1b   :  { %s2902_s3 = sld [smem:[%s3551_s0 + %s2766_s22]]   ;;  %s2770_s22 = smov 25  }
  0x1c   :  { %s2907_s13 = sld [smem:[%s3551_s0 + %s2767_s28]]   ;;  %s2771_s28 = smov 26  }
  0x1d   :  { %s2912_s9 = sld [smem:[%s3551_s0 + %s2768_s7]]   ;;  %s2772_s7 = smov 27  }
  0x1e   :  { %s2922_s17 = sld [smem:[%s3551_s0 + %s2770_s22]]   ;;  %s2774_s22 = smov 29  }
  0x1f   :  { %s2927_s10 = sld [smem:[%s3551_s0 + %s2771_s28]]   ;;  %s2775_s28 = smov 30  }
  0x20   :  { %3575 = sst [smem:[#allocation38_spill]] %s2897_s14 }
  0x21   :  { %s2917_s14 = sld [smem:[%s3551_s0 + %s2769_s15]]   ;;  %s2773_s15 = smov 28  }
  0x22   :  { %3576 = sst [smem:[#allocation39_spill]] %s2907_s13 }
  0x23   :  { %3577 = sst [smem:[#allocation40_spill]] %s2912_s9  ;;  %s2776_s9 = smov 31  }
  0x24   :  { %3579 = sst [smem:[#allocation42_spill]] %s2922_s17  ;;  %s2778_s17 = smov [#allocation13]  }
  0x25   :  { %3580 = sst [smem:[#allocation43_spill]] %s2927_s10 }
  0x26   :  { %s2932_s16 = sld [smem:[%s3551_s0 + %s2772_s7]]  }
  0x27   :  { %3578 = sst [smem:[#allocation41_spill]] %s2917_s14  ;;  %s2777_s14 = smov 32  }
  0x28   :  { %s2937_s23 = sld [smem:[%s3551_s0 + %s2773_s15]]  }
  0x29   :  { %s2942_s13 = sld [smem:[%s3551_s0 + %s2774_s22]]   ;;  %s2779_s22 = smov 1  }
  0x2a   :  { %s2947_s10 = sld [smem:[%s3551_s0 + %s2775_s28]]  }
  0x2b   :  { %72 = dma.hbm_to_smem %s2802_s5, 16, %s2778_s17, [#allocation12] }
  0x2c   :  { %3581 = sst [smem:[#allocation44_spill]] %s2932_s16 }
  0x2d   :  { %s2952_s16 = sld [smem:[%s3551_s0 + %s2776_s9]]  }
  0x2e   :  { %3582 = sst [smem:[#allocation45_spill]] %s2937_s23 }
  0x2f   :  { %3583 = sst [smem:[#allocation46_spill]] %s2942_s13 }
  0x30   :  { %s2957_s23 = sld [smem:[%s3551_s0 + %s2777_s14]]  }
  0x31   :  { %s2041_s28 = sld [smem:[%s3551_s0 + %s2779_s22]]  }
  0x37   :  { %74 = dma.hbm_to_smem %s2041_s28, 16, %s2780_s1, [#allocation12] }
  0x38   :  { %2719 = dma.done.wait [#allocation12], 32 }
  0x39   :  { %2720 = vsyncadd [#allocation12], 4294967264 }
  0x3a   :  { %76 = sfence }
  0x3b   :  { %77 = vsyncpa [#allocation16], 0 }
  0x3c   :  { %78 = vsyncpa [#allocation19], 0 }
  0x3d   :  { %79 = vsyncpa [#allocation22], 0 }
  0x3e   :  { %80 = vsyncpa [#allocation17], 0 }
  0x3f   :  { %81 = vsyncpa [#allocation25], 0  ;;  %s2781_s2 = smov [#allocation18]  }
  0x40   :  { %s103_s9 = sshll.u32 %s2781_s2, 4  ;;  %s104_s9 = int_to_ptr.vmem [resolvable:$true] %s103_s9 }
  0x41   :  { %s2591_s7 = scalar_lea.vmem %s104_s9, 128  ;;  %p2596_p1 = scmp.lt.s32.totalorder %s104_s9, %s104_s9 }
  0x42   :  { %p2592_p0 = scmp.ne.s32.totalorder %s104_s9, %s2591_s7  ;;  %p2597_p2 = scmp.lt.s32.totalorder %s2591_s7, %s2591_s7 }
  0x44   :  { %p2598_p3 = por %p2597_p2, %p2596_p1 }
  0x46   :  { %p2599_p4 = pnand %p2598_p3, %p2592_p0 }
  0x48   :  { %2602 = shalt.err (!%p2599_p4)
}
  0x49   :  { %s2782_s0 = smov 64   ;;  %s2783_s5 = smov 4  }
  0x4a   :  { %109 = dma.hbm_to_vmem [thread:$0]  %s2827_s25, 128, %s104_s9, [#allocation19], %s2782_s0, %s2782_s0, %s2783_s5  }
  0x4b   :  { %s2784_s13 = smov [#allocation15]   ;;  %s2785_s14 = smov [#allocation20]  }
  0x4c   :  { %s94_s11 = sshll.u32 %s2784_s13, 4  ;;  %s116_s15 = sshll.u32 %s2785_s14, 4  ;;  %s95_s11 = int_to_ptr.vmem [resolvable:$true] %s94_s11  ;;  %s117_s15 = int_to_ptr.vmem [resolvable:$true] %s116_s15 }
  0x4d   :  { %s2611_s18 = scalar_lea.vmem %s95_s11, 16  ;;  %s2615_s17 = scalar_lea.vmem %s95_s11, 32 }
  0x4e   :  { %p2612_p5 = scmp.ne.s32.totalorder %s95_s11, %s2611_s18  ;;  %p2616_p6 = scmp.lt.s32.totalorder %s95_s11, %s95_s11 }
  0x4f   :  { %p2617_p7 = scmp.lt.s32.totalorder %s2615_s17, %s2611_s18 }
  0x51   :  { %p2618_p8 = por %p2617_p7, %p2616_p6 }
  0x53   :  { %p2619_p9 = pnand %p2618_p8, %p2612_p5 }
  0x55   :  { %2622 = shalt.err (!%p2619_p9)
}
  0x56   :  { %97 = dma.hbm_to_vmem [thread:$0]  %s2822_s21, 16, %s95_s11, [#allocation16]  }
  0x57   :  { %s2631_s22 = scalar_lea.vmem %s117_s15, 16  ;;  %s2635_s26 = scalar_lea.vmem %s117_s15, 32 }
  0x58   :  { %p2632_p10 = scmp.ne.s32.totalorder %s117_s15, %s2631_s22  ;;  %p2636_p11 = scmp.lt.s32.totalorder %s117_s15, %s117_s15 }
  0x59   :  { %p2637_p12 = scmp.lt.s32.totalorder %s2635_s26, %s2631_s22 }
  0x5b   :  { %p2638_p13 = por %p2637_p12, %p2636_p11 }
  0x5d   :  { %p2639_p0 = pnand %p2638_p13, %p2632_p10 }
  0x5f   :  { %2642 = shalt.err (!%p2639_p0)
}
  0x60   :  { %119 = dma.hbm_to_vmem [thread:$0]  %s2832_s29, 16, %s117_s15, [#allocation19]  }
  0x61   :  { %s2786_s25 = smov [#allocation21]  }
  0x62   :  { %s128_s28 = sshll.u32 %s2786_s25, 4  ;;  %s129_s28 = int_to_ptr.vmem [resolvable:$true] %s128_s28 }
  0x63   :  { %s2651_s1 = scalar_lea.vmem %s129_s28, 16  ;;  %s2655_s2 = scalar_lea.vmem %s129_s28, 32 }
  0x64   :  { %p2652_p1 = scmp.ne.s32.totalorder %s129_s28, %s2651_s1  ;;  %p2656_p2 = scmp.lt.s32.totalorder %s129_s28, %s129_s28 }
  0x65   :  { %p2657_p3 = scmp.lt.s32.totalorder %s2655_s2, %s2651_s1 }
  0x67   :  { %p2658_p4 = por %p2657_p3, %p2656_p2 }
  0x69   :  { %p2659_p5 = pnand %p2658_p4, %p2652_p1 }
  0x6b   :  { %2662 = shalt.err (!%p2659_p5)
}
  0x6c   :  { %131 = dma.hbm_to_vmem [thread:$0]  %s2842_s8, 16, %s129_s28, [#allocation22]  }
  0x6d   :  { %2721 = dma.done.wait [#allocation16], 16  }
  0x6e   :  { %2722 = vsyncadd [#allocation16], 4294967280 }
  0x6f   :  { %2723 = dma.done.wait [#allocation19], 144  }
  0x70   :  { %2724 = vsyncadd [#allocation19], 4294967152 }
  0x71   :  { %2725 = dma.done.wait [#allocation22], 16  }
  0x72   :  { %2726 = vsyncadd [#allocation22], 4294967280  ;;  %v187_v0 = vlaneseq  ;;  %v3560_v1 = vmov 0.0   ;;  %vm2788_vm0 = vmmov 0   ;;  %v2979_v5 = vld [vmem:[%s2857_s24] sm:$0xf] }
  0x73   :  { %2246 = vmatprep.subr.bf16.mxu0 %v3560_v1  ;;  %2248 = vmatprep.mubr.msk.bf16.mxu0 %vm2788_vm0, %v3560_v1  ;;  %v2982_v6 = vld [vmem:[%s2857_s24 + $0x4] sm:$0xf]  ;;  %v2985_v7 = vld [vmem:[%s2857_s24 + $0x8] sm:$0xf]  ;;  %v2992_v9 = vld [vmem:[%s2857_s24 + $0xc] sm:$0xf] }
  0x74   :  { %v188_v2 = vand.u32 127, %v187_v0  ;;  %v2995_v10 = vld [vmem:[%s2862_s30] ss:$0 sm:$0xff]  ;;  %v3001_v12 = vld [vmem:[%s2877_s20 + $0x4] sm:$0xf]  ;;  %vm224_vm10 = vcmask 1041408  }
  0x75   :  { %v2998_v11 = vld [vmem:[%s2877_s20] sm:$0xf]  ;;  %v3004_v13 = vld [vmem:[%s2877_s20 + $0x8] sm:$0xf]  ;;  %v3007_v14 = vld [vmem:[%s2877_s20 + $0xc] sm:$0xf] }
  0x76   :  { %vm190_vm1 = vcmp.lt.s32.totalorder %v188_v2, 8  ;;  %vm194_vm2 = vcmp.ge.s32.totalorder %v188_v2, 8  ;;  %vm195_vm3 = vcmp.lt.s32.totalorder %v188_v2, 16  ;;  %vm199_vm4 = vcmp.ge.s32.totalorder %v188_v2, 16  ;;  %v3010_v15 = vld [vmem:[%s2882_s27] ss:$0 sm:$0xff] }
  0x77   :  { %v2973_v3 = vsel %vm190_vm1, 1.0, %v3560_v1  ;;  %vm196_vm5 = vmand %vm194_vm2, %vm195_vm3  ;;  %vm200_vm6 = vcmp.lt.s32.totalorder %v188_v2, 24  ;;  %vm204_vm8 = vcmp.ge.s32.totalorder %v188_v2, 24  ;;  %vm205_vm9 = vcmp.lt.s32.totalorder %v188_v2, 32  ;;  %v3013_v16 = vld [vmem:[%s2887_s4] sm:$0xf] }
  0x78   :  { %v2976_v4 = vsel %vm196_vm5, 1.0, %v3560_v1  ;;  %vm2987_vm7 = vmand %vm199_vm4, %vm200_vm6  ;;  %v3016_v17 = vld [vmem:[%s2887_s4 + $0x4] sm:$0xf]  ;;  %v3019_v18 = vld [vmem:[%s2887_s4 + $0x8] sm:$0xf]  ;;  %s3588_s21 = sld [smem:[#allocation34_spill]] }
  0x79   :  { %3584 = vst [vmem:[#allocation47_spill] sm:$0xff] %v2976_v4  ;;  %v3022_v19 = vld [vmem:[%s2887_s4 + $0xc] sm:$0xf]  ;;  %v3025_v20 = vld [vmem:[%s2887_s4 + $0x10] sm:$0xf]  ;;  %s3589_s29 = sld [smem:[#allocation32_spill]]  ;;  %vm206_vm11 = vmand %vm204_vm8, %vm205_vm9 }
  0x7a   :  { %v3028_v21 = vld [vmem:[%s2887_s4 + $0x14] sm:$0xf]  ;;  %v3031_v22 = vld [vmem:[%s2887_s4 + $0x18] sm:$0xf]  ;;  %v3034_v23 = vld [vmem:[%s2887_s4 + $0x1c] sm:$0xf] }
  0x7b   :  { %v3037_v24 = vld [vmem:[%s2867_s6] sm:$0xf]  ;;  %v3040_v25 = vld [vmem:[%s2867_s6 + $0x4] sm:$0xf]  ;;  %v3043_v26 = vld [vmem:[%s2867_s6 + $0x8] sm:$0xf] }
  0x7c   :  { %v3046_v27 = vld [vmem:[%s2867_s6 + $0xc] sm:$0xf]  ;;  %v3049_v28 = vld [vmem:[%s2872_s12] ss:$0 sm:$0xff]  ;;  %v3055_v30 = vld [vmem:[%s2892_s19 + $0x4] sm:$0xf] }
  0x7d   :  { %3587 = vst [vmem:[#allocation48_spill] sm:$0xff] %v3049_v28  ;;  %v3052_v29 = vld [vmem:[%s2892_s19] sm:$0xf]  ;;  %v3058_v31 = vld [vmem:[%s2892_s19 + $0x8] sm:$0xf]  ;;  %s3592_s8 = sld [smem:[#allocation33_spill]] }
  0x7e   :  { %v3061_v32 = vld [vmem:[%s2892_s19 + $0xc] sm:$0xf]  ;;  %v3064_v33 = vld [vmem:[%s2902_s3] sm:$0xf]  ;;  %v3067_v34 = vld [vmem:[%s2902_s3 + $0x4] sm:$0xf] }
  0x7f   :  { %3590 = vst [vmem:[#allocation49_spill] sm:$0xff] %v3064_v33  ;;  %3591 = vst [vmem:[#allocation50_spill] sm:$0xff] %v3067_v34  ;;  %v3070_v35 = vld [vmem:[%s2902_s3 + $0x8] sm:$0xf]  ;;  %v3073_v36 = vld [vmem:[%s2902_s3 + $0xc] sm:$0xf] }
  0x80   :  { %3593 = vst [vmem:[#allocation51_spill] sm:$0xff] %v3070_v35  ;;  %3594 = vst [vmem:[#allocation52_spill] sm:$0xff] %v3073_v36  ;;  %v3076_v37 = vld [vmem:[%s2902_s3 + $0x10] sm:$0xf]  ;;  %v3079_v38 = vld [vmem:[%s2902_s3 + $0x14] sm:$0xf] }
  0x81   :  { %3595 = vst [vmem:[#allocation53_spill] sm:$0xff] %v3076_v37  ;;  %3596 = vst [vmem:[#allocation54_spill] sm:$0xff] %v3079_v38  ;;  %v3082_v39 = vld [vmem:[%s2902_s3 + $0x18] sm:$0xf]  ;;  %v3085_v40 = vld [vmem:[%s2902_s3 + $0x1c] sm:$0xf] }
  0x82   :  { %3597 = vst [vmem:[#allocation55_spill] sm:$0xff] %v3082_v39  ;;  %3598 = vst [vmem:[#allocation56_spill] sm:$0xff] %v3085_v40  ;;  %v3090_v41 = vsel %vm2987_vm7, 1.0, %v3560_v1  ;;  %v3095_v42 = vsel %vm206_vm11, 1.0, %v3560_v1  ;;  %v211_v43 = vld [vmem:[%s3588_s21] sm:$0x3] }
  0x83   :  { %v209_v44 = vld [vmem:[%s3589_s29] sm:$0xff]  ;;  %v210_v45 = vld [vmem:[%s3589_s29 + $0x8] sm:$0xff]  ;;  %vm296_vm12 = vcmask 1044480   ;;  %v226_v46 = vsel %vm224_vm10, %v211_v43, 0  ;;  %vm220_vm13 = vcmask 31744   ;;  %s3599_s3 = sld [smem:[#allocation35_spill]] }
  0x84   :  { %v212_v47 = vpack.c.bf16 %v210_v45, %v209_v44  ;;  %v269_v48 = vld [vmem:[%s3592_s8] sm:$0xff]  ;;  %2247 = vmatpush3.bf16.msra.mxu0 %v226_v46  ;;  %v2454_v49 = vld [vmem:[#allocation18] sm:$0x1f]   ;;  %v270_v50 = vld [vmem:[%s3592_s8 + $0x8] sm:$0xff]  ;;  %vm289_vm14 = vcmask 80896   ;;  %s3600_s19 = sld [smem:[#allocation36_spill]] }
  0x85   :  { %v271_v51 = vld [vmem:[%s3592_s8 + $0x10] sm:$0xff]  ;;  %v275_v52 = vpack.c.bf16 %v270_v50, %v269_v48  ;;  %v272_v53 = vld [vmem:[%s3592_s8 + $0x18] sm:$0xff]  ;;  %2374 = vmatprep.subr.msk.bf16.mxu1 %vm296_vm12, %v2454_v49  ;;  %v298_v54 = vsel %vm296_vm12, %v2454_v49, 0  ;;  %vm414_vm15 = vcmask 261120   ;;  %s3603_s24 = sld [smem:[#allocation37_spill]]  ;;  %s2789_s30 = smov 96  }
  0x86   :  { %v276_v55 = vpack.c.bf16 %v272_v53, %v271_v51  ;;  %2253 = vmatpush3.bf16.msra.mxu1 %v298_v54  ;;  %v2077_v60 = vld [vmem:[#allocation15] ss:$0 sm:$0xff]  ;;  %v2079_v8 = vld [vmem:[#allocation20] ss:$0 sm:$0xff]  ;;  %s2731_s6 = smov 0  }
  0x87   :  { %2249 = vmatmul.mubr.msk.bf16.vlgmr.msra.gmra.mxu0 %vm220_vm13, %v212_v47  ;;  %2254 = vmatprep.mubr.msk.bf16.mxu1 %vm289_vm14, %v275_v52 }
  0x88   :  { %2258 = vmatprep.subr.bf16.mxu1 %v3560_v1 }
  0x89   :  { %2255 = vmatmul.mubr.msk.bf16.vlgmr.msra.gmra.mxu1 %vm289_vm14, %v276_v55  ;;  %v2455_v56 = vld [vmem:[%s3599_s3 + $0x8] sm:$0xff]   ;;  %v2456_v57 = vld [vmem:[%s3599_s3] sm:$0xff]   ;;  %v2083_v55 = vld [vmem:[#allocation21] ss:$0 sm:$0xff] }
  0x8a   :  { %2262 = vmatprep.mubr.msk.bf16.mxu1 %vm2788_vm0, %v3560_v1  ;;  %2259 = vmatpush3.bf16.msra.mxu1 %v2455_v56  ;;  %v2457_v58 = vld [vmem:[%s3600_s19 + $0x8] sm:$0xff]   ;;  %v2458_v47 = vld [vmem:[%s3600_s19] sm:$0xff]  }
  0x8b   :  { %2260 = vmatprep.subr.bf16.mxu1 %v3560_v1 }
  0x8e   :  { %2261 = vmatpush3.bf16.msra.mxu1 %v2456_v57 }
  0x8f   :  { %2266 = vmatprep.subr.bf16.mxu1 %v2457_v58 }
 0x147   :  { %v262_v59 = vpop.f32.mrf.mxu0 }
 0x148   :  { %v3112_v0 = vadd.f32 %v2077_v60, %v262_v59 }
 0x149   :  { %v2250_v61 = vpop.f32.mrf.mxu0  ;;  %v2256_v62 = vpop.f32.mrf.mxu1 }
 0x14a   :  { %v3122_v49 = vadd.f32 %v2256_v62, %v2079_v8  ;;  %v2087_v62 = vld [vmem:[%s3603_s24] ss:$0 sm:$0xff] }
 0x14b   :  { %v265_v63 = vpop.f32.mrf.mxu0  ;;  %v334_v43 = vpop.f32.mrf.mxu1 }
 0x14c   :  { %v3114_v2 = vadd.f32 %v2077_v60, %v265_v63  ;;  %v3119_v48 = vadd.f32 %v2079_v8, %v334_v43  ;;  %3601 = vst [vmem:[#allocation57_spill] sm:$0xff] %v3122_v49 }
 0x14d   :  { %v2251_v44 = vpop.f32.mrf.mxu0  ;;  %v2257_v46 = vpop.f32.mrf.mxu1 }
 0x14e   :  { %v395_v45 = vpack.c.bf16 %v3114_v2, %v3112_v0  ;;  %v3124_v50 = vadd.f32 %v2257_v46, %v2079_v8 }
 0x14f   :  { %v337_v51 = vpop.f32.mrf.mxu1 }
 0x150   :  { %2263 = vmatmul.mubr.msk.bf16.vlgmr.msra.gmra.mxu1 %vm414_vm15, %v395_v45  ;;  %v3126_v52 = vadd.f32 %v2079_v8, %v337_v51  ;;  %v480_v54 = vpack.c.bf16 %v3124_v50, %v3122_v49 }
 0x151   :  { %2267 = vmatpush3.bf16.msra.mxu1 %v2457_v58 }
 0x152   :  { %3602 = vst [vmem:[#allocation58_spill] sm:$0xff] %v3126_v52  ;;  %2268 = vmatprep.subr.bf16.mxu1 %v2458_v47  ;;  %v479_v53 = vpack.c.bf16 %v3126_v52, %v3119_v48 }
 0x154   :  { %2270 = vmatprep.mubr.msk.bf16.mxu1 %vm414_vm15, %v479_v53 }
 0x155   :  { %2269 = vmatpush3.bf16.msra.mxu1 %v2458_v47 }
 0x158   :  { %2271 = vmatmul.mubr.msk.bf16.vlgmr.msra.gmra.mxu1 %vm414_vm15, %v480_v54 }
 0x210   :  { %v452_v56 = vpop.f32.mrf.mxu1 }
 0x211   :  { %v453_v57 = vadd.f32 %v2083_v55, %v452_v56 }
 0x212   :  { %v2264_v59 = vpop.f32.mrf.mxu1 }
 0x213   :  { %459 = vst.msk [vmem:[#allocation2] sm:$0xff] %vm414_vm15, %v453_v57  ;;  %471 = vrot.lane.b32.xlu1 %v453_v57, %s2782_s0  ;;  %463 = vrot.lane.b32.xlu0 %v453_v57, %s2789_s30 }
 0x214   :  { %v455_v58 = vpop.f32.mrf.mxu1 }
 0x215   :  { %v456_v60 = vadd.f32 %v2083_v55, %v455_v58 }
 0x216   :  { %v2265_v61 = vpop.f32.mrf.mxu1 }
 0x217   :  { %460 = vst.msk [vmem:[#allocation2 + $0x8] sm:$0xff] %vm414_vm15, %v456_v60  ;;  %473 = vrot.lane.b32.xlu1 %v456_v60, %s2782_s0  ;;  %465 = vrot.lane.b32.xlu0 %v456_v60, %s2789_s30 }
 0x218   :  { %v2272_v63 = vpop.f32.mrf.mxu1 }
 0x219   :  { %v548_v8 = vadd.f32 %v2272_v63, %v2087_v62 }
 0x21a   :  { %v539_v43 = vpop.f32.mrf.mxu1 }
 0x21b   :  { %v540_v44 = vadd.f32 %v2087_v62, %v539_v43 }
 0x21c   :  { %v2273_v45 = vpop.f32.mrf.mxu1 }
 0x21d   :  { %v551_v46 = vadd.f32 %v2273_v45, %v2087_v62 }
 0x21e   :  { %v542_v47 = vpop.f32.mrf.mxu1 }
 0x21f   :  { %v543_v51 = vadd.f32 %v2087_v62, %v542_v47 }
 0x285   :  { %v472_v53 = vpop.permute.xlu1 %471  ;;  %v464_v54 = vpop.permute.xlu0 %463 }
 0x286   :  { %477 = vst.msk [vmem:[#allocation4] sm:$0xff] %vm414_vm15, %v472_v53  ;;  %469 = vst.msk [vmem:[#allocation3] sm:$0xff] %vm414_vm15, %v464_v54 }
 0x289   :  { %v474_v55 = vpop.permute.xlu1 %473  ;;  %v466_v56 = vpop.permute.xlu0 %465 }
 0x28a   :  { %478 = vst.msk [vmem:[#allocation4 + $0x8] sm:$0xff] %vm414_vm15, %v474_v55  ;;  %470 = vst.msk [vmem:[#allocation3 + $0x8] sm:$0xff] %vm414_vm15, %v466_v56 }
 0x28b LB: > { %s560_s12 = sld [smem:[#allocation13 + %s2733_s6]]  ;;  %vm565_vm1 = vcmask 253952   ;;  %s564_s9 = scalar_lea.vmem [#allocation5], %s2733_s6  ;;  %s2733_s6 = sphi %s2731_s6, %s559_s6  }
 0x28c   : > { %s561_s20 = sld [smem:[#allocation14 + %s2733_s6]]  ;;  %s573_s5 = scalar_lea.vmem [#allocation7], %s2733_s6 }
 0x28d   : > { %s569_s13 = scalar_lea.vmem [#allocation6], %s2733_s6  ;;  %s559_s6 = sadd.s32 1, %s2733_s6  }
 0x28e   : > { %p556_p6 = scmp.ge.s32.totalorder %s559_s6, 32  }
 0x28f   :  { %779 = vst.msk [vmem:[#allocation10] sm:$0xff] (%p556_p6), %vm414_vm15, %v3560_v1  ;;  %780 = vst.msk [vmem:[#allocation10 + $0x8] sm:$0xff] (%p556_p6), %vm414_vm15, %v3560_v1  ;;  %s2735_s11 = smov (%p556_p6), 0  }
 0x290   :  { %781 = vst.msk [vmem:[#allocation11] sm:$0xff] (%p556_p6), %vm414_vm15, %v3560_v1  ;;  %782 = vst.msk [vmem:[#allocation11 + $0x8] sm:$0xff] (%p556_p6), %vm414_vm15, %v3560_v1 }
 0x291   : > { %s562_s27 = scalar_lea.vmem [#allocation3], %s560_s12  ;;  %s571_s4 = scalar_lea.vmem [#allocation4], %s560_s12 }
 0x292   : > { %v563_v57 = vld [vmem:[%s562_s27] sm:$0x1]  ;;  %s567_s7 = scalar_lea.vmem [#allocation2], %s561_s20  ;;  %558 = sbr.rel (!%p556_p6) target bundleno = 651 (0x28b), region = 240 }
 0x293   : > { %v572_v59 = vld [vmem:[%s571_s4] sm:$0x1]  ;;  %566 = vst.msk [vmem:[%s564_s9] sm:$0x1] %vm565_vm1, %v563_v57 }
 0x294   : > { %v568_v58 = vld [vmem:[%s567_s7] sm:$0x1]  ;;  %574 = vst.msk [vmem:[%s573_s5] sm:$0x1] %vm565_vm1, %v572_v59 }
 0x295   : > { %570 = vst.msk [vmem:[%s569_s13] sm:$0x1] %vm565_vm1, %v568_v58 }
 0x29a   :  { %v577_v60 = vld [vmem:[#allocation5 + $0x10] sm:$0xff]  ;;  %v575_v62 = vld [vmem:[#allocation5] sm:$0xff]  ;;  %v578_v45 = vld [vmem:[#allocation5 + $0x18] sm:$0xff] }
 0x29b   :  { %v576_v55 = vld [vmem:[#allocation5 + $0x8] sm:$0xff] }
 0x29c   :  { %v581_v61 = vld [vmem:[#allocation6 + $0x10] sm:$0xff]  ;;  %v579_v43 = vld [vmem:[#allocation6] sm:$0xff]  ;;  %v582_v47 = vld [vmem:[#allocation6 + $0x18] sm:$0xff] }
 0x29d   :  { %v585_v63 = vmul.f32 %v581_v61, %v577_v60  ;;  %v583_v53 = vmul.f32 %v579_v43, %v575_v62  ;;  %v586_v54 = vmul.f32 %v582_v47, %v578_v45  ;;  %v580_v56 = vld [vmem:[#allocation6 + $0x8] sm:$0xff] }
 0x29e   :  { %v584_v59 = vmul.f32 %v580_v56, %v576_v55 }
 0x29f   :  { %v589_v57 = vmul.f32 0.35355338, %v585_v63  ;;  %v587_v58 = vmul.f32 0.35355338, %v583_v53  ;;  %v590_v33 = vmul.f32 0.35355338, %v586_v54 }
 0x2a0   :  { %v588_v35 = vmul.f32 0.35355338, %v584_v59 }
 0x2a1   :  { %v2094_v34 = vclamps-f32 %v589_v57, 5.0  ;;  %v2092_v36 = vclamps-f32 %v587_v58, 5.0  ;;  %v2095_v37 = vclamps-f32 %v590_v33, 5.0 }
 0x2a2   :  { %v2093_v39 = vclamps-f32 %v588_v35, 5.0 }
 0x2a3   :  { %v3156_v38 = vmul.f32 %v2094_v34, %v548_v8  ;;  %v3158_v1 = vmul.f32 %v2092_v36, %v540_v44  ;;  %v3160_v60 = vmul.f32 %v2095_v37, %v551_v46 }
 0x2a4   :  { %v3164_v62 = vmul.f32 %v2093_v39, %v543_v51 }
 0x2a5   :  { %v605_v61 = vmul.f32 %v2973_v3, %v3156_v38  ;;  %v603_v63 = vmul.f32 %v2973_v3, %v3158_v1  ;;  %v606_v43 = vmul.f32 %v2973_v3, %v3160_v60  ;;  %v643_v8 = vmul.f32 %v2976_v4, %v3158_v1 }
 0x2a6   :  { %v604_v34 = vmul.f32 %v2973_v3, %v3164_v62  ;;  %v644_v37 = vmul.f32 %v2976_v4, %v3164_v62  ;;  %v646_v46 = vmul.f32 %v2976_v4, %v3160_v60  ;;  %v645_v45 = vmul.f32 %v2976_v4, %v3156_v38 }
 0x2a7   :  { %v613_v33 = vsel %vm414_vm15, %v605_v61, 0.0  ;;  %v607_v35 = vsel %vm414_vm15, %v603_v63, 0.0  ;;  %v616_v36 = vsel %vm414_vm15, %v606_v43, 0.0  ;;  %v647_v51 = vsel %vm414_vm15, %v643_v8, 0.0 }
 0x2a8   :  { %614 = vadd.xlane.f32.xlu1 %v613_v33  ;;  %608 = vadd.xlane.f32.xlu0 %v607_v35  ;;  %v610_v39 = vsel %vm414_vm15, %v604_v34, 0.0  ;;  %v650_v44 = vsel %vm414_vm15, %v644_v37, 0.0  ;;  %v656_v47 = vsel %vm414_vm15, %v646_v46, 0.0  ;;  %v684_v53 = vmul.f32 %v3090_v41, %v3164_v62 }
 0x2a9   :  { %v653_v54 = vsel %vm414_vm15, %v645_v45, 0.0  ;;  %v683_v55 = vmul.f32 %v3090_v41, %v3158_v1  ;;  %v686_v57 = vmul.f32 %v3090_v41, %v3160_v60  ;;  %v685_v58 = vmul.f32 %v3090_v41, %v3156_v38 }
 0x2aa   :  { %v690_v56 = vsel %vm414_vm15, %v684_v53, 0.0  ;;  %v724_v63 = vmul.f32 %v3095_v42, %v3164_v62  ;;  %v723_v33 = vmul.f32 %v3095_v42, %v3158_v1  ;;  %v726_v35 = vmul.f32 %v3095_v42, %v3160_v60 }
 0x2ab   :  { %v687_v59 = vsel %vm414_vm15, %v683_v55, 0.0  ;;  %v696_v61 = vsel %vm414_vm15, %v686_v57, 0.0  ;;  %v693_v43 = vsel %vm414_vm15, %v685_v58, 0.0  ;;  %v725_v37 = vmul.f32 %v3095_v42, %v3156_v38 }
 0x2ac   :  { %617 = vadd.xlane.f32.xlu1 %v616_v36  ;;  %611 = vadd.xlane.f32.xlu0 %v610_v39  ;;  %v730_v34 = vsel %vm414_vm15, %v724_v63, 0.0  ;;  %v727_v36 = vsel %vm414_vm15, %v723_v33, 0.0  ;;  %v736_v39 = vsel %vm414_vm15, %v726_v35, 0.0 }
 0x2ad   :  { %v733_v8 = vsel %vm414_vm15, %v725_v37, 0.0 }
 0x2b0   :  { %651 = vadd.xlane.f32.xlu1 %v650_v44  ;;  %648 = vadd.xlane.f32.xlu0 %v647_v51 }
 0x2b4   :  { %657 = vadd.xlane.f32.xlu1 %v656_v47  ;;  %654 = vadd.xlane.f32.xlu0 %v653_v54 }
 0x2b8   :  { %691 = vadd.xlane.f32.xlu1 %v690_v56  ;;  %688 = vadd.xlane.f32.xlu0 %v687_v59 }
 0x2bc   :  { %697 = vadd.xlane.f32.xlu1 %v696_v61  ;;  %694 = vadd.xlane.f32.xlu0 %v693_v43 }
 0x2c0   :  { %731 = vadd.xlane.f32.xlu1 %v730_v34  ;;  %728 = vadd.xlane.f32.xlu0 %v727_v36 }
 0x2c4   :  { %737 = vadd.xlane.f32.xlu1 %v736_v39  ;;  %734 = vadd.xlane.f32.xlu0 %v733_v8 }
 0x331   :  { %v615_v44 = vpop.xlane.xlu1 %614  ;;  %v609_v46 = vpop.xlane.xlu0 %608 }
 0x332   :  { %v2098_v53 = vclamps-f32 %v615_v44, 5.0  ;;  %v2096_v55 = vclamps-f32 %v609_v46, 5.0 }
 0x334   :  { %v631_v58 = vmul.f32 1.442695, %v2098_v53  ;;  %v627_v43 = vmul.f32 1.442695, %v2096_v55 }
 0x335   :  { %v618_v51 = vpop.xlane.xlu1 %617  ;;  %v612_v45 = vpop.xlane.xlu0 %611 }
 0x336   :  { %v2099_v56 = vclamps-f32 %v618_v51, 5.0  ;;  %v2097_v57 = vclamps-f32 %v612_v45, 5.0  ;;  %2459 = vpow2.f32 %v631_v58 }
 0x337   :  { %2461 = vpow2.f32 %v627_v43 }
 0x338   :  { %v633_v34 = vmul.f32 1.442695, %v2099_v56  ;;  %v629_v35 = vmul.f32 1.442695, %v2097_v57 }
 0x339   :  { %v652_v47 = vpop.xlane.xlu1 %651  ;;  %v649_v54 = vpop.xlane.xlu0 %648 }
 0x33a   :  { %v2101_v61 = vclamps-f32 %v652_v47, 5.0  ;;  %v2100_v33 = vclamps-f32 %v649_v54, 5.0  ;;  %2463 = vpow2.f32 %v633_v34 }
 0x33b   :  { %2465 = vpow2.f32 %v629_v35 }
 0x33c   :  { %v669_v37 = vmul.f32 1.442695, %v2101_v61  ;;  %v667_v44 = vmul.f32 1.442695, %v2100_v33 }
 0x33d   :  { %v658_v59 = vpop.xlane.xlu1 %657  ;;  %v655_v63 = vpop.xlane.xlu0 %654 }
 0x33e   :  { %v2103_v39 = vclamps-f32 %v658_v59, 5.0  ;;  %v2102_v28 = vclamps-f32 %v655_v63, 5.0  ;;  %2467 = vpow2.f32 %v669_v37 }
 0x33f   :  { %2469 = vpow2.f32 %v667_v44 }
 0x340   :  { %v673_v53 = vmul.f32 1.442695, %v2103_v39  ;;  %v671_v56 = vmul.f32 1.442695, %v2102_v28 }
 0x341   :  { %v692_v36 = vpop.xlane.xlu1 %691  ;;  %v689_v40 = vpop.xlane.xlu0 %688 }
 0x342   :  { %v2105_v8 = vclamps-f32 %v692_v36, 5.0  ;;  %v2104_v46 = vclamps-f32 %v689_v40, 5.0 }
 0x343   :  { %v2460_v28 = vpop.eup %2459 }
 0x344   :  { %v709_v51 = vmul.f32 1.442695, %v2105_v8  ;;  %v707_v45 = vmul.f32 1.442695, %v2104_v46  ;;  %v2462_v8 = vpop.eup %2461 }
 0x345   :  { %v698_v47 = vpop.xlane.xlu1 %697  ;;  %v695_v55 = vpop.xlane.xlu0 %694 }
 0x346   :  { %v2107_v54 = vclamps-f32 %v698_v47, 5.0  ;;  %v2106_v57 = vclamps-f32 %v695_v55, 5.0  ;;  %2471 = vpow2.f32 %v709_v51 }
 0x347   :  { %2473 = vpow2.f32 %v707_v45  ;;  %v2464_v46 = vpop.eup %2463 }
 0x348   :  { %v713_v59 = vmul.f32 1.442695, %v2107_v54  ;;  %v711_v58 = vmul.f32 1.442695, %v2106_v57  ;;  %2475 = vpow2.f32 %v673_v53  ;;  %v2466_v45 = vpop.eup %2465 }
 0x349   :  { %v732_v61 = vpop.xlane.xlu1 %731  ;;  %v729_v40 = vpop.xlane.xlu0 %728  ;;  %2477 = vpow2.f32 %v671_v56 }
 0x34a   :  { %v2109_v63 = vclamps-f32 %v732_v61, 5.0  ;;  %v2108_v43 = vclamps-f32 %v729_v40, 5.0  ;;  %2479 = vpow2.f32 %v713_v59  ;;  %v636_v61 = vmul.f32 %v2466_v45, %v2973_v3 }
 0x34b   :  { %2481 = vpow2.f32 %v711_v58  ;;  %v2468_v47 = vpop.eup %2467 }
 0x34c   :  { %v749_v33 = vmul.f32 1.442695, %v2109_v63  ;;  %v747_v34 = vmul.f32 1.442695, %v2108_v43  ;;  %v2470_v53 = vpop.eup %2469  ;;  %v676_v56 = vmul.f32 %v2468_v47, %v2976_v4  ;;  %v635_v43 = vmul.f32 %v2462_v8, %v2973_v3 }
 0x34d   :  { %v738_v35 = vpop.xlane.xlu1 %737  ;;  %v735_v37 = vpop.xlane.xlu0 %734  ;;  %v675_v59 = vmul.f32 %v2470_v53, %v2976_v4  ;;  %v638_v47 = vmul.f32 %v2464_v46, %v2973_v3  ;;  %v637_v8 = vmul.f32 %v2460_v28, %v2973_v3 }
 0x34e   :  { %2483 = vpow2.f32 %v749_v33  ;;  %v2111_v36 = vclamps-f32 %v738_v35, 5.0  ;;  %v2110_v39 = vclamps-f32 %v735_v37, 5.0  ;;  %v680_v35 = vadd.f32 %v676_v56, %v636_v61  ;;  %v764_v56 = vld [vmem:[#allocation7 + $0x8] sm:$0xff] }
 0x34f   :  { %2485 = vpow2.f32 %v747_v34 }
 0x350   :  { %v753_v44 = vmul.f32 1.442695, %v2111_v36  ;;  %v751_v51 = vmul.f32 1.442695, %v2110_v39  ;;  %v679_v39 = vadd.f32 %v675_v59, %v635_v43  ;;  %v763_v43 = vld [vmem:[#allocation7] sm:$0xff] }
 0x352   :  { %2487 = vpow2.f32 %v753_v44 }
 0x353   :  { %2489 = vpow2.f32 %v751_v51  ;;  %v2472_v54 = vpop.eup %2471 }
 0x354   :  { %v2474_v55 = vpop.eup %2473  ;;  %v716_v63 = vmul.f32 %v2472_v54, %v3090_v41 }
 0x355   :  { %v2476_v57 = vpop.eup %2475  ;;  %v715_v33 = vmul.f32 %v2474_v55, %v3090_v41 }
 0x356   :  { %v2478_v58 = vpop.eup %2477  ;;  %v678_v36 = vmul.f32 %v2476_v57, %v2976_v4  ;;  %v720_v53 = vadd.f32 %v716_v63, %v680_v35 }
 0x357   :  { %v2480_v40 = vpop.eup %2479  ;;  %v677_v44 = vmul.f32 %v2478_v58, %v2976_v4  ;;  %v719_v52 = vadd.f32 %v715_v33, %v679_v39  ;;  %v765_v39 = vld [vmem:[#allocation7 + $0x10] sm:$0xff] }
 0x358   :  { %v2482_v34 = vpop.eup %2481  ;;  %v718_v45 = vmul.f32 %v2480_v40, %v3090_v41  ;;  %v682_v61 = vadd.f32 %v678_v36, %v638_v47 }
 0x359   :  { %v717_v55 = vmul.f32 %v2482_v34, %v3090_v41  ;;  %v681_v4 = vadd.f32 %v677_v44, %v637_v8  ;;  %v766_v34 = vld [vmem:[#allocation7 + $0x18] sm:$0xff] }
 0x35a   :  { %v722_v63 = vadd.f32 %v718_v45, %v682_v61 }
 0x35b   :  { %v2484_v37 = vpop.eup %2483  ;;  %v721_v28 = vadd.f32 %v717_v55, %v681_v4 }
 0x35c   :  { %v2486_v51 = vpop.eup %2485  ;;  %v756_v54 = vmul.f32 %v2484_v37, %v3095_v42 }
 0x35d   :  { %v755_v57 = vmul.f32 %v2486_v51, %v3095_v42 }
 0x35e   :  { %v760_v59 = vadd.f32 %v756_v54, %v720_v53 }
 0x35f   :  { %v2488_v58 = vpop.eup %2487  ;;  %v759_v49 = vadd.f32 %v755_v57, %v719_v52 }
 0x360   :  { %v2490_v46 = vpop.eup %2489  ;;  %v768_v35 = vmul.f32 %v764_v56, %v760_v59  ;;  %776 = vst.msk [vmem:[#allocation9 + $0x8] sm:$0xff] %vm414_vm15, %v760_v59  ;;  %v758_v40 = vmul.f32 %v2488_v58, %v3095_v42 }
 0x361   :  { %v767_v33 = vmul.f32 %v763_v43, %v759_v49  ;;  %775 = vst.msk [vmem:[#allocation9] sm:$0xff] %vm414_vm15, %v759_v49  ;;  %v757_v37 = vmul.f32 %v2490_v46, %v3095_v42 }
 0x362   :  { %772 = vst.msk [vmem:[#allocation8 + $0x8] sm:$0xff] %vm414_vm15, %v768_v35  ;;  %v762_v36 = vadd.f32 %v758_v40, %v722_v63 }
 0x363   :  { %771 = vst.msk [vmem:[#allocation8] sm:$0xff] %vm414_vm15, %v767_v33  ;;  %v761_v52 = vadd.f32 %v757_v37, %v721_v28 }
 0x364   :  { %v770_v44 = vmul.f32 %v766_v34, %v762_v36  ;;  %778 = vst.msk [vmem:[#allocation9 + $0x18] sm:$0xff] %vm414_vm15, %v762_v36 }
 0x365   :  { %v769_v51 = vmul.f32 %v765_v39, %v761_v52  ;;  %777 = vst.msk [vmem:[#allocation9 + $0x10] sm:$0xff] %vm414_vm15, %v761_v52 }
 0x366   :  { %774 = vst.msk [vmem:[#allocation8 + $0x18] sm:$0xff] %vm414_vm15, %v770_v44 }
 0x367   :  { %773 = vst.msk [vmem:[#allocation8 + $0x10] sm:$0xff] %vm414_vm15, %v769_v51 }
 0x368 LB: > { %s789_s14 = sld [smem:[#allocation14 + %s2737_s11]]  ;;  %s792_s15 = scalar_lea.vmem [#allocation8], %s2737_s11  ;;  %s2737_s11 = sphi %s2735_s11, %s788_s11  }
 0x369   : > { %s799_s18 = scalar_lea.vmem [#allocation9], %s2737_s11  ;;  %s788_s11 = sadd.s32 1, %s2737_s11  }
 0x36a   : > { %p785_p7 = scmp.ge.s32.totalorder %s788_s11, 32  }
 0x36b   :  { %v3604_v8 = vmov (%p785_p7), 0.0   ;;  %v2113_v55 = vcombine.low (%p785_p7), %v2985_v7, %v2992_v9  ;;  %v2112_v59 = vcombine.low (%p785_p7), %v2979_v5, %v2982_v6  ;;  %v2118_v5 = vcombine.low (%p785_p7), %v3004_v13, %v3007_v14  ;;  %v3606_v51 = vld [vmem:[#allocation58_spill] sm:$0xff] (%p785_p7)  ;;  %s3608_s26 = sld [smem:[#allocation39_spill]] (%p785_p7) }
 0x36c   : > { %v800_v49 = vld [vmem:[%s799_s18] sm:$0x1]  ;;  %2274 = vmatprep.subr.bf16.mxu0 (%p785_p7), %v3604_v8  ;;  %2278 = vmatprep.mubr.msk.bf16.mxu0 (%p785_p7), %vm2788_vm0, %v3604_v8  ;;  %v2117_v6 = vcombine.low (%p785_p7), %v2998_v11, %v3001_v12  ;;  %v2128_v28 = vcombine.low (%p785_p7), %v3043_v26, %v3046_v27  ;;  %v1029_v11 = vpack.c.bf16 (%p785_p7), %v3164_v62, %v3158_v1  ;;  %vm982_vm2 = vcmask (%p785_p7), 523264   ;;  %s3609_s25 = sld [smem:[#allocation43_spill]] (%p785_p7) }
 0x36d   :  { %2282 = vmatprep.subr.bf16.mxu1 (%p785_p7), %v3604_v8  ;;  %2286 = vmatprep.mubr.msk.bf16.mxu1 (%p785_p7), %vm2788_vm0, %v3604_v8  ;;  %v2127_v26 = vcombine.low (%p785_p7), %v3037_v24, %v3040_v25  ;;  %v1030_v27 = vpack.c.bf16 (%p785_p7), %v3160_v60, %v3156_v38  ;;  %v2134_v1 = vcombine.low (%p785_p7), %v3058_v31, %v3061_v32  ;;  %s3612_s28 = sld [smem:[#allocation44_spill]] (%p785_p7) }
 0x36e   : > { %v793_v4 = vld [vmem:[%s792_s15] sm:$0x1]  ;;  %s790_s17 = scalar_lea.vmem [#allocation10], %s789_s14  ;;  %s797_s22 = scalar_lea.vmem [#allocation11], %s789_s14  ;;  %2275 = vmatpush3.bf16.msra.mxu0 (%p785_p7), %v2113_v55  ;;  %2283 = vmatpush3.bf16.msra.mxu1 (%p785_p7), %v2118_v5  ;;  %v2125_v24 = vcombine.low (%p785_p7), %v3031_v22, %v3034_v23  ;;  %v2124_v25 = vcombine.low (%p785_p7), %v3025_v20, %v3028_v21  ;;  %v2123_v31 = vcombine.low (%p785_p7), %v3019_v18, %v3022_v19  ;;  %v3614_v5 = vld [vmem:[#allocation54_spill] sm:$0xff] (%p785_p7) }
 0x36f   : > { %v791_v47 = vld [vmem:[%s790_s17] sm:$0x1]  ;;  %787 = sbr.rel (!%p785_p7) target bundleno = 872 (0x368), region = 251  ;;  %2276 = vmatprep.subr.bf16.mxu0 (%p785_p7), %v3604_v8  ;;  %2284 = vmatprep.subr.bf16.mxu1 (%p785_p7), %v3604_v8  ;;  %s3613_s1 = sld [smem:[#allocation45_spill]] (%p785_p7) }
 0x370   : > { %v798_v53 = vld [vmem:[%s797_s22] sm:$0x1]  ;;  %v794_v45 = vadd.f32 %v793_v4, %v791_v47  ;;  %s3618_s2 = sld [smem:[#allocation46_spill]] (%p785_p7) }
 0x371   : > { %v801_v54 = vadd.f32 %v800_v49, %v798_v53  ;;  %v3607_v49 = vld [vmem:[#allocation48_spill] sm:$0xff] (%p785_p7)  ;;  %s3621_s21 = sld [smem:[#allocation38_spill]] (%p785_p7) }
 0x372   : > { %796 = vst.msk [vmem:[%s790_s17] sm:$0x1] %vm565_vm1, %v794_v45  ;;  %2277 = vmatpush3.bf16.msra.mxu0 (%p785_p7), %v2112_v59  ;;  %2285 = vmatpush3.bf16.msra.mxu1 (%p785_p7), %v2117_v6  ;;  %v3615_v6 = vld [vmem:[#allocation53_spill] sm:$0xff] (%p785_p7)  ;;  %s3623_s29 = sld [smem:[#allocation40_spill]] (%p785_p7) }
 0x373   : > { %802 = vst.msk [vmem:[%s797_s22] sm:$0x1] %vm565_vm1, %v801_v54  ;;  %2290 = vmatprep.subr.bf16.mxu0 (%p785_p7), %v3604_v8  ;;  %2302 = vmatprep.subr.bf16.mxu1 (%p785_p7), %v2128_v28  ;;  %s3624_s8 = sld [smem:[#allocation42_spill]] (%p785_p7) }
 0x379   :  { %v803_v7 = vld [vmem:[#allocation10] sm:$0xff]  ;;  %v804_v9 = vld [vmem:[#allocation10 + $0x8] sm:$0xff] }
 0x37a   :  { %v805_v56 = vld [vmem:[#allocation11] sm:$0xff]  ;;  %v806_v57 = vld [vmem:[#allocation11 + $0x8] sm:$0xff] }
 0x37b   :  { %v807_v61 = vadd.f32 1e-06, %v805_v56  ;;  %v808_v43 = vadd.f32 1e-06, %v806_v57 }
 0x37d   :  { %2495 = vrcp.f32 %v807_v61 }
 0x37e   :  { %2497 = vrcp.f32 %v808_v43 }
 0x38a   :  { %v2496_v58 = vpop.eup %2495 }
 0x38b   :  { %v2498_v46 = vpop.eup %2497  ;;  %v811_v63 = vmul.f32 %v2496_v58, %v803_v7  ;;  %v2491_v58 = vld [vmem:[%s3608_s26 + $0x8] sm:$0xff]  }
 0x38c   :  { %v812_v35 = vmul.f32 %v2498_v46, %v804_v9  ;;  %v2492_v46 = vld [vmem:[%s3608_s26] sm:$0xff]  }
 0x38e   :  { %v813_v40 = vpack.c.bf16 %v812_v35, %v811_v63  ;;  %v3610_v63 = vld [vmem:[#allocation56_spill] sm:$0xff]  ;;  %v3611_v35 = vld [vmem:[#allocation55_spill] sm:$0xff] }
 0x390   :  { %2279 = vmatmul.mubr.msk.bf16.vlgmr.msra.gmra.mxu0 %vm414_vm15, %v813_v40  ;;  %v2144_v40 = vcombine.low %v3611_v35, %v3610_v63 }
 0x391   :  { %2298 = vmatprep.mubr.msk.bf16.mxu0 %vm2788_vm0, %v3604_v8  ;;  %2291 = vmatpush3.bf16.msra.mxu0 %v2125_v24  ;;  %v3355_v24 = vld [vmem:[%s3613_s1 + $0x8] sm:$0xf] }
 0x392   :  { %2292 = vmatprep.subr.bf16.mxu0 %v3604_v8 }
 0x395   :  { %2293 = vmatpush3.bf16.msra.mxu0 %v2124_v25  ;;  %v3358_v25 = vld [vmem:[%s3613_s1 + $0xc] sm:$0xf] }
 0x396   :  { %2294 = vmatprep.subr.bf16.mxu0 %v3604_v8 }
 0x399   :  { %2295 = vmatpush3.bf16.msra.mxu0 %v2123_v31  ;;  %v3361_v31 = vld [vmem:[%s3618_s2] ss:$0 sm:$0xff] }
 0x39a   :  { %2296 = vmatprep.subr.bf16.mxu0 %v3604_v8 }
 0x450   :  { %v863_v33 = vpop.f32.mrf.mxu0 }
 0x451   :  { %v870_v37 = vadd.f32 %v863_v33, %v3112_v0  ;;  %v3617_v33 = vld [vmem:[#allocation51_spill] sm:$0xff] }
 0x452   :  { %v2280_v34 = vpop.f32.mrf.mxu0 }
 0x453   :  { %v3263_v13 = vadd.f32 %v2995_v10, %v870_v37  ;;  %v3619_v37 = vld [vmem:[#allocation50_spill] sm:$0xff] }
 0x454   :  { %v866_v36 = vpop.f32.mrf.mxu0 }
 0x455   :  { %v871_v39 = vadd.f32 %v866_v36, %v3114_v2  ;;  %v3620_v36 = vld [vmem:[#allocation49_spill] sm:$0xff] }
 0x456   :  { %v2281_v52 = vpop.f32.mrf.mxu0 }
 0x457   :  { %v3266_v14 = vadd.f32 %v2995_v10, %v871_v39  ;;  %v2133_v10 = vcombine.low %v3052_v29, %v3055_v30  ;;  %v2122_v29 = vcombine.low %v3013_v16, %v3016_v17  ;;  %v3605_v17 = vld [vmem:[#allocation57_spill] sm:$0xff]  ;;  %v2141_v39 = vcombine.low %v3620_v36, %v3619_v37 }
 0x458   :  { %v3334_v52 = vld [vmem:[%s3609_s25] sm:$0xf] }
 0x459   :  { %v880_v12 = vpack.c.bf16 %v3266_v14, %v3263_v13  ;;  %2297 = vmatpush3.bf16.msra.mxu0 %v2122_v29  ;;  %v3364_v29 = vld [vmem:[%s2947_s10] sm:$0xf] }
 0x45a   :  { %2318 = vmatprep.subr.bf16.mxu0 %v2144_v40 }
 0x45b   :  { %2287 = vmatmul.mubr.msk.bf16.vlgmr.msra.gmra.mxu1 %vm414_vm15, %v880_v12  ;;  %v3340_v12 = vld [vmem:[%s3609_s25 + $0x8] sm:$0xf] }
 0x45c   :  { %2303 = vmatpush3.bf16.msra.mxu1 %v2128_v28  ;;  %2306 = vmatprep.mubr.msk.bf16.mxu1 %vm414_vm15, %v1029_v11  ;;  %v2143_v28 = vcombine.low %v3615_v6, %v3614_v5  ;;  %v3337_v11 = vld [vmem:[%s3609_s25 + $0x4] sm:$0xf] }
 0x45d   :  { %2304 = vmatprep.subr.bf16.mxu1 %v2127_v26 }
 0x460   :  { %2305 = vmatpush3.bf16.msra.mxu1 %v2127_v26  ;;  %v3343_v26 = vld [vmem:[%s3609_s25 + $0xc] sm:$0xf] }
 0x461   :  { %2310 = vmatprep.subr.bf16.mxu1 %v2134_v1 }
 0x463   :  { %2307 = vmatmul.mubr.msk.bf16.vlgmr.msra.gmra.mxu1 %vm414_vm15, %v1030_v27  ;;  %v3346_v27 = vld [vmem:[%s3612_s28] ss:$0 sm:$0xff] }
 0x464   :  { %2311 = vmatpush3.bf16.msra.mxu1 %v2134_v1  ;;  %v3349_v1 = vld [vmem:[%s3613_s1] sm:$0xf] }
 0x465   :  { %2312 = vmatprep.subr.bf16.mxu1 %v2133_v10 }
 0x468   :  { %2313 = vmatpush3.bf16.msra.mxu1 %v2133_v10  ;;  %v3352_v10 = vld [vmem:[%s3613_s1 + $0x4] sm:$0xf] }
 0x469   :  { %2330 = vmatprep.subr.bf16.mxu1 %v3604_v8 }
 0x51b   :  { %v936_v22 = vpop.f32.mrf.mxu1 }
 0x51c   :  { %v937_v23 = vadd.f32 %v3010_v15, %v936_v22  ;;  %v3367_v22 = vld [vmem:[%s2947_s10 + $0x4] sm:$0xf] }
 0x51d   :  { %v2288_v30 = vpop.f32.mrf.mxu1 }
 0x51e   :  { %v2120_v32 = vmul.f32 -1.442695, %v937_v23  ;;  %v3373_v30 = vld [vmem:[%s2947_s10 + $0xc] sm:$0xf] }
 0x51f   :  { %v939_v38 = vpop.f32.mrf.mxu1 }
 0x520   :  { %2499 = vpow2.f32 %v2120_v32  ;;  %v940_v20 = vadd.f32 %v3010_v15, %v939_v38  ;;  %v3376_v32 = vld [vmem:[%s2947_s10 + $0x10] sm:$0xf]  ;;  %v3379_v38 = vld [vmem:[%s2947_s10 + $0x14] sm:$0xf] }
 0x521   :  { %v2289_v21 = vpop.f32.mrf.mxu1 }
 0x522   :  { %v2121_v0 = vmul.f32 -1.442695, %v940_v20  ;;  %v3385_v21 = vld [vmem:[%s2947_s10 + $0x1c] sm:$0xf] }
 0x523   :  { %v2308_v2 = vpop.f32.mrf.mxu1 }
 0x524   :  { %2501 = vpow2.f32 %v2121_v0  ;;  %v1100_v62 = vadd.f32 %v2308_v2, %v3605_v17  ;;  %v2132_v0 = vld [vmem:[%s3621_s21] ss:$0 sm:$0xff] }
 0x525   :  { %v1083_v18 = vpop.f32.mrf.mxu1 }
 0x526   :  { %v1098_v60 = vadd.f32 %v1083_v18, %v3119_v48  ;;  %v3311_v54 = vadd.f32 %v3607_v49, %v1100_v62 }
 0x527   :  { %v2309_v19 = vpop.f32.mrf.mxu1 }
 0x528   :  { %v1101_v16 = vadd.f32 %v2309_v19, %v3124_v50  ;;  %v3305_v15 = vadd.f32 %v3607_v49, %v1098_v60 }
 0x529   :  { %v1086_v44 = vpop.f32.mrf.mxu1 }
 0x52a   :  { %v1099_v4 = vadd.f32 %v1086_v44, %v3606_v51  ;;  %v3302_v47 = vadd.f32 %v3607_v49, %v1101_v16 }
 0x52c   :  { %v3308_v53 = vadd.f32 %v3607_v49, %v1099_v4  ;;  %v1113_v55 = vpack.c.bf16 %v3302_v47, %v3311_v54 }
 0x52d   :  { %v2500_v45 = vpop.eup %2499 }
 0x52e   :  { %v949_v48 = vadd.f32 1.0, %v2500_v45  ;;  %v1112_v50 = vpack.c.bf16 %v3308_v53, %v3305_v15 }
 0x530   :  { %2314 = vmatprep.mubr.msk.bf16.mxu1 %vm414_vm15, %v1112_v50  ;;  %2503 = vrcp.f32 %v949_v48 }
 0x531   :  { %v2502_v56 = vpop.eup %2501  ;;  %2315 = vmatmul.mubr.msk.bf16.vlgmr.msra.gmra.mxu1 %vm414_vm15, %v1113_v55 }
 0x532   :  { %v950_v57 = vadd.f32 1.0, %v2502_v56  ;;  %2334 = vmatprep.mubr.msk.bf16.mxu1 %vm2788_vm0, %v3604_v8  ;;  %2331 = vmatpush3.bf16.msra.mxu1 %v2491_v58 }
 0x533   :  { %2332 = vmatprep.subr.bf16.mxu1 %v3604_v8  ;;  %v3616_v8 = vld [vmem:[#allocation52_spill] sm:$0xff] }
 0x534   :  { %2505 = vrcp.f32 %v950_v57  ;;  %v2142_v34 = vcombine.low %v3617_v33, %v3616_v8 }
 0x536   :  { %2333 = vmatpush3.bf16.msra.mxu1 %v2492_v46 }
 0x53d   :  { %v2504_v61 = vpop.eup %2503 }
 0x53e   :  { %v955_v43 = vmul.f32 %v2504_v61, %v937_v23  ;;  %v3370_v23 = vld [vmem:[%s2947_s10 + $0x8] sm:$0xf] }
 0x541   :  { %v2506_v59 = vpop.eup %2505 }
 0x542   :  { %v956_v7 = vmul.f32 %v2506_v59, %v940_v20  ;;  %v3382_v20 = vld [vmem:[%s2947_s10 + $0x18] sm:$0xf]  ;;  %s3622_s10 = sld [smem:[#allocation41_spill]] }
 0x544   :  { %v957_v9 = vpack.c.bf16 %v956_v7, %v955_v43 }
 0x546   :  { %2299 = vmatmul.mubr.msk.bf16.vlgmr.msra.gmra.mxu0 %vm982_vm2, %v957_v9 }
 0x547   :  { %2319 = vmatpush3.bf16.msra.mxu0 %v2144_v40 }
 0x548   :  { %2320 = vmatprep.subr.bf16.mxu0 %v2143_v28 }
 0x54b   :  { %2321 = vmatpush3.bf16.msra.mxu0 %v2143_v28 }
 0x54c   :  { %2322 = vmatprep.subr.bf16.mxu0 %v2142_v34 }
 0x54f   :  { %2323 = vmatpush3.bf16.msra.mxu0 %v2142_v34 }
 0x550   :  { %2324 = vmatprep.subr.bf16.mxu0 %v2141_v39 }
 0x553   :  { %2325 = vmatpush3.bf16.msra.mxu0 %v2141_v39  ;;  %v2493_v39 = vld [vmem:[%s3622_s10 + $0x8] sm:$0xff]  }
 0x554   :  { %2338 = vmatprep.subr.bf16.mxu1 %v2493_v39 }
 0x5f1   :  { %v2316_v2 = vpop.f32.mrf.mxu1 }
 0x5f2   :  { %v1181_v18 = vadd.f32 %v2316_v2, %v2132_v0  ;;  %v2147_v2 = vld [vmem:[%s3623_s29] ss:$0 sm:$0xff] }
 0x5f3   :  { %v1172_v19 = vpop.f32.mrf.mxu1 }
 0x5f4   :  { %v2139_v60 = vmul.f32 -1.442695, %v1181_v18  ;;  %v1173_v16 = vadd.f32 %v2132_v0, %v1172_v19 }
 0x5f5   :  { %v2317_v17 = vpop.f32.mrf.mxu1 }
 0x5f6   :  { %v2137_v62 = vmul.f32 -1.442695, %v1173_v16  ;;  %v1184_v44 = vadd.f32 %v2317_v17, %v2132_v0  ;;  %2507 = vpow2.f32 %v2139_v60 }
 0x5f7   :  { %v1175_v51 = vpop.f32.mrf.mxu1 }
 0x5f8   :  { %2509 = vpow2.f32 %v2137_v62  ;;  %v2140_v4 = vmul.f32 -1.442695, %v1184_v44  ;;  %v1176_v49 = vadd.f32 %v2132_v0, %v1175_v51  ;;  %v2494_v0 = vld [vmem:[%s3622_s10] sm:$0xff]  }
 0x5fa   :  { %2511 = vpow2.f32 %v2140_v4  ;;  %v2138_v45 = vmul.f32 -1.442695, %v1176_v49 }
 0x5fc   :  { %2513 = vpow2.f32 %v2138_v45 }
 0x603   :  { %v2508_v48 = vpop.eup %2507 }
 0x604   :  { %v1201_v61 = vadd.f32 1.0, %v2508_v48 }
 0x605   :  { %v2510_v50 = vpop.eup %2509 }
 0x606   :  { %v1199_v55 = vadd.f32 1.0, %v2510_v50  ;;  %v1020_v56 = vpop.f32.mrf.mxu0 }
 0x607   :  { %v2512_v57 = vpop.eup %2511  ;;  %v3389_v46 = vadd.f32 %v1020_v56, %v3263_v13 }
 0x608   :  { %v1202_v59 = vadd.f32 1.0, %v2512_v57  ;;  %v2300_v43 = vpop.f32.mrf.mxu0  ;;  %2515 = vrcp.f32 %v1199_v55 }
 0x609   :  { %v2514_v7 = vpop.eup %2513 }
 0x60a   :  { %2517 = vrcp.f32 %v1202_v59  ;;  %v1200_v9 = vadd.f32 1.0, %v2514_v7  ;;  %v1023_v58 = vpop.f32.mrf.mxu0 }
 0x60b   :  { %2519 = vrcp.f32 %v1201_v61  ;;  %v3392_v63 = vadd.f32 %v1023_v58, %v3266_v14 }
 0x60c   :  { %2521 = vrcp.f32 %v1200_v9  ;;  %v2301_v35 = vpop.f32.mrf.mxu0 }
 0x60d   :  { %v1328_v40 = vpack.c.bf16 %v3392_v63, %v3389_v46 }
 0x60f   :  { %2335 = vmatmul.mubr.msk.bf16.vlgmr.msra.gmra.mxu1 %vm414_vm15, %v1328_v40 }
 0x610   :  { %2339 = vmatpush3.bf16.msra.mxu1 %v2493_v39 }
 0x611   :  { %2340 = vmatprep.subr.bf16.mxu1 %v2494_v0 }
 0x614   :  { %2341 = vmatpush3.bf16.msra.mxu1 %v2494_v0 }
 0x615   :  { %v2516_v5 = vpop.eup %2515 }
 0x616   :  { %v1211_v13 = vmul.f32 %v2516_v5, %v1173_v16 }
 0x617   :  { %v2518_v6 = vpop.eup %2517 }
 0x618   :  { %v2520_v28 = vpop.eup %2519  ;;  %v1214_v33 = vmul.f32 %v2518_v6, %v1184_v44 }
 0x619   :  { %v2522_v8 = vpop.eup %2521  ;;  %v1213_v37 = vmul.f32 %v2520_v28, %v1181_v18 }
 0x61a   :  { %v1212_v34 = vmul.f32 %v2522_v8, %v1176_v49 }
 0x61b   :  { %v1216_v36 = vpack.c.bf16 %v1214_v33, %v1213_v37 }
 0x61c   :  { %v1215_v14 = vpack.c.bf16 %v1212_v34, %v1211_v13 }
 0x61e   :  { %2326 = vmatprep.mubr.msk.bf16.mxu0 %vm982_vm2, %v1215_v14 }
 0x61f   :  { %2327 = vmatmul.mubr.msk.bf16.vlgmr.msra.gmra.mxu0 %vm982_vm2, %v1216_v36 }
 0x6cf   :  { %v1384_v19 = vpop.f32.mrf.mxu1 }
 0x6d0   :  { %v1385_v60 = vadd.f32 %v2147_v2, %v1384_v19 }
 0x6d1   :  { %v2336_v17 = vpop.f32.mrf.mxu1 }
 0x6d2   :  { %1391 = vst.msk [vmem:[#allocation2] sm:$0xff] %vm414_vm15, %v1385_v60  ;;  %1403 = vrot.lane.b32.xlu1 %v1385_v60, %s2782_s0  ;;  %1395 = vrot.lane.b32.xlu0 %v1385_v60, %s2789_s30 }
 0x6d3   :  { %v1387_v18 = vpop.f32.mrf.mxu1 }
 0x6d4   :  { %v1388_v16 = vadd.f32 %v2147_v2, %v1387_v18 }
 0x6d5   :  { %v2337_v62 = vpop.f32.mrf.mxu1 }
 0x6d6   :  { %1392 = vst.msk [vmem:[#allocation2 + $0x8] sm:$0xff] %vm414_vm15, %v1388_v16  ;;  %1405 = vrot.lane.b32.xlu1 %v1388_v16, %s2782_s0  ;;  %1397 = vrot.lane.b32.xlu0 %v1388_v16, %s2789_s30  ;;  %s2739_s0 = smov 0  }
 0x6df   :  { %v2328_v44 = vpop.f32.mrf.mxu0 }
 0x6e0   :  { %v3418_v55 = vadd.f32 %v2328_v44, %v3311_v54  ;;  %v2151_v54 = vld [vmem:[%s3624_s8] ss:$0 sm:$0xff] }
 0x6e1   :  { %v1281_v51 = vpop.f32.mrf.mxu0 }
 0x6e2   :  { %v3412_v48 = vadd.f32 %v1281_v51, %v3305_v15 }
 0x6e3   :  { %v2329_v4 = vpop.f32.mrf.mxu0 }
 0x6e4   :  { %v3409_v49 = vadd.f32 %v2329_v4, %v3302_v47 }
 0x6e5   :  { %v1284_v45 = vpop.f32.mrf.mxu0 }
 0x6e6   :  { %v3415_v50 = vadd.f32 %v1284_v45, %v3308_v53  ;;  %v1412_v57 = vpack.c.bf16 %v3409_v49, %v3418_v55 }
 0x6e8   :  { %v1411_v56 = vpack.c.bf16 %v3415_v50, %v3412_v48 }
 0x6ea   :  { %2342 = vmatprep.mubr.msk.bf16.mxu1 %vm414_vm15, %v1411_v56 }
 0x6eb   :  { %2343 = vmatmul.mubr.msk.bf16.vlgmr.msra.gmra.mxu1 %vm414_vm15, %v1412_v57 }
 0x744   :  { %v1404_v47 = vpop.permute.xlu1 %1403  ;;  %v1396_v61 = vpop.permute.xlu0 %1395 }
 0x745   :  { %1409 = vst.msk [vmem:[#allocation4] sm:$0xff] %vm414_vm15, %v1404_v47  ;;  %1401 = vst.msk [vmem:[#allocation3] sm:$0xff] %vm414_vm15, %v1396_v61 }
 0x748   :  { %v1406_v15 = vpop.permute.xlu1 %1405  ;;  %v1398_v53 = vpop.permute.xlu0 %1397 }
 0x749   :  { %1410 = vst.msk [vmem:[#allocation4 + $0x8] sm:$0xff] %vm414_vm15, %v1406_v15  ;;  %1402 = vst.msk [vmem:[#allocation3 + $0x8] sm:$0xff] %vm414_vm15, %v1398_v53 }
 0x7ab   :  { %v2344_v59 = vpop.f32.mrf.mxu1 }
 0x7ac   :  { %v1480_v43 = vadd.f32 %v2344_v59, %v2151_v54 }
 0x7ad   :  { %v1471_v7 = vpop.f32.mrf.mxu1 }
 0x7ae   :  { %v1472_v9 = vadd.f32 %v2151_v54, %v1471_v7 }
 0x7af   :  { %v2345_v58 = vpop.f32.mrf.mxu1 }
 0x7b0   :  { %v1483_v35 = vadd.f32 %v2345_v58, %v2151_v54 }
 0x7b1   :  { %v1474_v40 = vpop.f32.mrf.mxu1 }
 0x7b2   :  { %v1475_v5 = vadd.f32 %v2151_v54, %v1474_v40 }
 0x7b3 LB: > { %s1492_s3 = sld [smem:[#allocation13 + %s2741_s0]]  ;;  %s1496_s6 = scalar_lea.vmem [#allocation5], %s2741_s0  ;;  %s2741_s0 = sphi %s2739_s0, %s1491_s0  }
 0x7b4   : > { %s1493_s19 = sld [smem:[#allocation14 + %s2741_s0]]  ;;  %s1505_s20 = scalar_lea.vmem [#allocation7], %s2741_s0 }
 0x7b5   : > { %s1501_s27 = scalar_lea.vmem [#allocation6], %s2741_s0  ;;  %s1491_s0 = sadd.s32 1, %s2741_s0  }
 0x7b6   : > { %p1488_p8 = scmp.ge.s32.totalorder %s1491_s0, 32  }
 0x7b7   :  { %v3625_v37 = vmov (%p1488_p8), 0.0   ;;  %s2743_s4 = smov (%p1488_p8), 0  }
 0x7b8   :  { %1711 = vst.msk [vmem:[#allocation10] sm:$0xff] (%p1488_p8), %vm414_vm15, %v3625_v37  ;;  %1712 = vst.msk [vmem:[#allocation10 + $0x8] sm:$0xff] (%p1488_p8), %vm414_vm15, %v3625_v37 }
 0x7b9   : > { %s1494_s24 = scalar_lea.vmem [#allocation3], %s1492_s3  ;;  %s1503_s30 = scalar_lea.vmem [#allocation4], %s1492_s3  ;;  %1713 = vst.msk [vmem:[#allocation11] sm:$0xff] (%p1488_p8), %vm414_vm15, %v3625_v37  ;;  %1714 = vst.msk [vmem:[#allocation11 + $0x8] sm:$0xff] (%p1488_p8), %vm414_vm15, %v3625_v37 }
 0x7ba   : > { %v1495_v6 = vld [vmem:[%s1494_s24] sm:$0x1]  ;;  %s1499_s12 = scalar_lea.vmem [#allocation2], %s1493_s19  ;;  %1490 = sbr.rel (!%p1488_p8) target bundleno = 1971 (0x7b3), region = 262 }
 0x7bb   : > { %v1504_v28 = vld [vmem:[%s1503_s30] sm:$0x1]  ;;  %1498 = vst.msk [vmem:[%s1496_s6] sm:$0x1] %vm565_vm1, %v1495_v6 }
 0x7bc   : > { %v1500_v8 = vld [vmem:[%s1499_s12] sm:$0x1]  ;;  %1506 = vst.msk [vmem:[%s1505_s20] sm:$0x1] %vm565_vm1, %v1504_v28  ;;  %v3626_v28 = vld [vmem:[#allocation47_spill] sm:$0xff] (%p1488_p8) }
 0x7bd   : > { %1502 = vst.msk [vmem:[%s1501_s27] sm:$0x1] %vm565_vm1, %v1500_v8 }
 0x7c2   :  { %v1509_v33 = vld [vmem:[#allocation5 + $0x10] sm:$0xff]  ;;  %v1507_v34 = vld [vmem:[#allocation5] sm:$0xff]  ;;  %v1510_v39 = vld [vmem:[#allocation5 + $0x18] sm:$0xff] }
 0x7c3   :  { %v1508_v60 = vld [vmem:[#allocation5 + $0x8] sm:$0xff] }
 0x7c4   :  { %v1513_v13 = vld [vmem:[#allocation6 + $0x10] sm:$0xff]  ;;  %v1511_v36 = vld [vmem:[#allocation6] sm:$0xff]  ;;  %v1514_v0 = vld [vmem:[#allocation6 + $0x18] sm:$0xff] }
 0x7c5   :  { %v1517_v14 = vmul.f32 %v1513_v13, %v1509_v33  ;;  %v1515_v2 = vmul.f32 %v1511_v36, %v1507_v34  ;;  %v1518_v19 = vmul.f32 %v1514_v0, %v1510_v39  ;;  %v1512_v17 = vld [vmem:[#allocation6 + $0x8] sm:$0xff] }
 0x7c6   :  { %v1516_v16 = vmul.f32 %v1512_v17, %v1508_v60 }
 0x7c7   :  { %v1521_v18 = vmul.f32 0.35355338, %v1517_v14  ;;  %v1519_v62 = vmul.f32 0.35355338, %v1515_v2  ;;  %v1522_v44 = vmul.f32 0.35355338, %v1518_v19 }
 0x7c8   :  { %v1520_v4 = vmul.f32 0.35355338, %v1516_v16 }
 0x7c9   :  { %v2158_v51 = vclamps-f32 %v1521_v18, 5.0  ;;  %v2156_v45 = vclamps-f32 %v1519_v62, 5.0  ;;  %v2159_v56 = vclamps-f32 %v1522_v44, 5.0 }
 0x7ca   :  { %v2157_v47 = vclamps-f32 %v1520_v4, 5.0 }
 0x7cb   :  { %v1533_v57 = vmul.f32 %v2158_v51, %v1480_v43  ;;  %v1531_v61 = vmul.f32 %v2156_v45, %v1472_v9  ;;  %v1534_v15 = vmul.f32 %v2159_v56, %v1483_v35 }
 0x7cc   :  { %v1532_v54 = vmul.f32 %v2157_v47, %v1475_v5 }
 0x7cd   :  { %v1537_v53 = vmul.f32 %v2973_v3, %v1533_v57  ;;  %v1535_v59 = vmul.f32 %v2973_v3, %v1531_v61  ;;  %v1538_v7 = vmul.f32 %v2973_v3, %v1534_v15  ;;  %v1575_v5 = vmul.f32 %v3626_v28, %v1531_v61 }
 0x7ce   :  { %v1536_v40 = vmul.f32 %v2973_v3, %v1532_v54  ;;  %v1576_v9 = vmul.f32 %v3626_v28, %v1532_v54  ;;  %v1578_v33 = vmul.f32 %v3626_v28, %v1534_v15  ;;  %v1577_v34 = vmul.f32 %v3626_v28, %v1533_v57 }
 0x7cf   :  { %v1545_v58 = vsel %vm414_vm15, %v1537_v53, 0.0  ;;  %v1539_v6 = vsel %vm414_vm15, %v1535_v59, 0.0  ;;  %v1548_v43 = vsel %vm414_vm15, %v1538_v7, 0.0  ;;  %v1579_v13 = vsel %vm414_vm15, %v1575_v5, 0.0 }
 0x7d0   :  { %1546 = vadd.xlane.f32.xlu1 %v1545_v58  ;;  %1540 = vadd.xlane.f32.xlu0 %v1539_v6  ;;  %v1542_v35 = vsel %vm414_vm15, %v1536_v40, 0.0  ;;  %v1582_v8 = vsel %vm414_vm15, %v1576_v9, 0.0  ;;  %v1588_v37 = vsel %vm414_vm15, %v1578_v33, 0.0  ;;  %v1616_v14 = vmul.f32 %v3090_v41, %v1532_v54 }
 0x7d1   :  { %v1585_v36 = vsel %vm414_vm15, %v1577_v34, 0.0  ;;  %v1615_v39 = vmul.f32 %v3090_v41, %v1531_v61  ;;  %v1618_v2 = vmul.f32 %v3090_v41, %v1534_v15  ;;  %v1617_v60 = vmul.f32 %v3090_v41, %v1533_v57 }
 0x7d2   :  { %v1622_v0 = vsel %vm414_vm15, %v1616_v14, 0.0  ;;  %v1656_v18 = vmul.f32 %v3095_v42, %v1532_v54  ;;  %v1655_v62 = vmul.f32 %v3095_v42, %v1531_v61  ;;  %v1658_v51 = vmul.f32 %v3095_v42, %v1534_v15 }
 0x7d3   :  { %v1619_v19 = vsel %vm414_vm15, %v1615_v39, 0.0  ;;  %v1628_v17 = vsel %vm414_vm15, %v1618_v2, 0.0  ;;  %v1625_v16 = vsel %vm414_vm15, %v1617_v60, 0.0  ;;  %v1657_v45 = vmul.f32 %v3095_v42, %v1533_v57 }
 0x7d4   :  { %1549 = vadd.xlane.f32.xlu1 %v1548_v43  ;;  %1543 = vadd.xlane.f32.xlu0 %v1542_v35  ;;  %v1662_v44 = vsel %vm414_vm15, %v1656_v18, 0.0  ;;  %v1659_v4 = vsel %vm414_vm15, %v1655_v62, 0.0  ;;  %v1668_v56 = vsel %vm414_vm15, %v1658_v51, 0.0 }
 0x7d5   :  { %v1665_v47 = vsel %vm414_vm15, %v1657_v45, 0.0 }
 0x7d8   :  { %1583 = vadd.xlane.f32.xlu1 %v1582_v8  ;;  %1580 = vadd.xlane.f32.xlu0 %v1579_v13 }
 0x7dc   :  { %1589 = vadd.xlane.f32.xlu1 %v1588_v37  ;;  %1586 = vadd.xlane.f32.xlu0 %v1585_v36 }
 0x7e0   :  { %1623 = vadd.xlane.f32.xlu1 %v1622_v0  ;;  %1620 = vadd.xlane.f32.xlu0 %v1619_v19 }
 0x7e4   :  { %1629 = vadd.xlane.f32.xlu1 %v1628_v17  ;;  %1626 = vadd.xlane.f32.xlu0 %v1625_v16 }
 0x7e8   :  { %1663 = vadd.xlane.f32.xlu1 %v1662_v44  ;;  %1660 = vadd.xlane.f32.xlu0 %v1659_v4 }
 0x7ec   :  { %1669 = vadd.xlane.f32.xlu1 %v1668_v56  ;;  %1666 = vadd.xlane.f32.xlu0 %v1665_v47 }
 0x859   :  { %v1547_v53 = vpop.xlane.xlu1 %1546  ;;  %v1541_v61 = vpop.xlane.xlu0 %1540 }
 0x85a   :  { %v2162_v58 = vclamps-f32 %v1547_v53, 5.0  ;;  %v2160_v15 = vclamps-f32 %v1541_v61, 5.0 }
 0x85c   :  { %v1563_v57 = vmul.f32 1.442695, %v2162_v58  ;;  %v1559_v8 = vmul.f32 1.442695, %v2160_v15 }
 0x85d   :  { %v1550_v54 = vpop.xlane.xlu1 %1549  ;;  %v1544_v59 = vpop.xlane.xlu0 %1543 }
 0x85e   :  { %v2163_v6 = vclamps-f32 %v1550_v54, 5.0  ;;  %v2161_v43 = vclamps-f32 %v1544_v59, 5.0  ;;  %2523 = vpow2.f32 %v1563_v57 }
 0x85f   :  { %2525 = vpow2.f32 %v1559_v8 }
 0x860   :  { %v1565_v13 = vmul.f32 1.442695, %v2163_v6  ;;  %v1561_v34 = vmul.f32 1.442695, %v2161_v43 }
 0x861   :  { %v1584_v7 = vpop.xlane.xlu1 %1583  ;;  %v1581_v40 = vpop.xlane.xlu0 %1580 }
 0x862   :  { %v2165_v35 = vclamps-f32 %v1584_v7, 5.0  ;;  %v2164_v33 = vclamps-f32 %v1581_v40, 5.0  ;;  %2527 = vpow2.f32 %v1565_v13 }
 0x863   :  { %2529 = vpow2.f32 %v1561_v34 }
 0x864   :  { %v1601_v14 = vmul.f32 1.442695, %v2165_v35  ;;  %v1599_v2 = vmul.f32 1.442695, %v2164_v33 }
 0x865   :  { %v1590_v9 = vpop.xlane.xlu1 %1589  ;;  %v1587_v5 = vpop.xlane.xlu0 %1586 }
 0x866   :  { %v2167_v36 = vclamps-f32 %v1590_v9, 5.0  ;;  %v2166_v19 = vclamps-f32 %v1587_v5, 5.0  ;;  %2531 = vpow2.f32 %v1601_v14 }
 0x867   :  { %2533 = vpow2.f32 %v1599_v2 }
 0x868   :  { %v1605_v62 = vmul.f32 1.442695, %v2167_v36  ;;  %v1603_v4 = vmul.f32 1.442695, %v2166_v19 }
 0x869   :  { %v1624_v37 = vpop.xlane.xlu1 %1623  ;;  %v1621_v0 = vpop.xlane.xlu0 %1620 }
 0x86a   :  { %v2169_v39 = vclamps-f32 %v1624_v37, 5.0  ;;  %v2168_v60 = vclamps-f32 %v1621_v0, 5.0 }
 0x86b   :  { %v2524_v43 = vpop.eup %2523 }
 0x86c   :  { %v1641_v17 = vmul.f32 1.442695, %v2169_v39  ;;  %v1639_v18 = vmul.f32 1.442695, %v2168_v60  ;;  %v2526_v57 = vpop.eup %2525 }
 0x86d   :  { %v1630_v16 = vpop.xlane.xlu1 %1629  ;;  %v1627_v51 = vpop.xlane.xlu0 %1626 }
 0x86e   :  { %v2171_v44 = vclamps-f32 %v1630_v16, 5.0  ;;  %v2170_v45 = vclamps-f32 %v1627_v51, 5.0  ;;  %2535 = vpow2.f32 %v1641_v17 }
 0x86f   :  { %2537 = vpow2.f32 %v1639_v18  ;;  %v2528_v5 = vpop.eup %2527  ;;  %v1567_v18 = vmul.f32 %v2526_v57, %v2973_v3 }
 0x870   :  { %v1645_v56 = vmul.f32 1.442695, %v2171_v44  ;;  %v1643_v47 = vmul.f32 1.442695, %v2170_v45  ;;  %2539 = vpow2.f32 %v1605_v62  ;;  %v2530_v33 = vpop.eup %2529 }
 0x871   :  { %v1664_v53 = vpop.xlane.xlu1 %1663  ;;  %v1661_v54 = vpop.xlane.xlu0 %1660  ;;  %2541 = vpow2.f32 %v1603_v4  ;;  %v1568_v19 = vmul.f32 %v2530_v33, %v2973_v3 }
 0x872   :  { %v2173_v61 = vclamps-f32 %v1664_v53, 5.0  ;;  %v2172_v59 = vclamps-f32 %v1661_v54, 5.0  ;;  %2543 = vpow2.f32 %v1645_v56  ;;  %v1570_v53 = vmul.f32 %v2528_v5, %v2973_v3 }
 0x873   :  { %2545 = vpow2.f32 %v1643_v47  ;;  %v2532_v13 = vpop.eup %2531 }
 0x874   :  { %v1681_v7 = vmul.f32 1.442695, %v2173_v61  ;;  %v1679_v58 = vmul.f32 1.442695, %v2172_v59  ;;  %v2534_v34 = vpop.eup %2533  ;;  %v1608_v36 = vmul.f32 %v2532_v13, %v3626_v28 }
 0x875   :  { %v1670_v40 = vpop.xlane.xlu1 %1669  ;;  %v1667_v6 = vpop.xlane.xlu0 %1666  ;;  %v1607_v0 = vmul.f32 %v2534_v34, %v3626_v28 }
 0x876   :  { %2547 = vpow2.f32 %v1681_v7  ;;  %v2175_v15 = vclamps-f32 %v1670_v40, 5.0  ;;  %v2174_v9 = vclamps-f32 %v1667_v6, 5.0  ;;  %v1612_v44 = vadd.f32 %v1608_v36, %v1568_v19 }
 0x877   :  { %2549 = vpow2.f32 %v1679_v58  ;;  %v1611_v45 = vadd.f32 %v1607_v0, %v1567_v18  ;;  %v1569_v7 = vmul.f32 %v2524_v43, %v2973_v3 }
 0x878   :  { %v1685_v35 = vmul.f32 1.442695, %v2175_v15  ;;  %v1683_v8 = vmul.f32 1.442695, %v2174_v9  ;;  %v1696_v15 = vld [vmem:[#allocation7 + $0x8] sm:$0xff] }
 0x87a   :  { %2551 = vpow2.f32 %v1685_v35  ;;  %v1695_v35 = vld [vmem:[#allocation7] sm:$0xff] }
 0x87b   :  { %2553 = vpow2.f32 %v1683_v8  ;;  %v2536_v37 = vpop.eup %2535 }
 0x87c   :  { %v2538_v14 = vpop.eup %2537  ;;  %v1648_v60 = vmul.f32 %v2536_v37, %v3090_v41 }
 0x87d   :  { %v2540_v39 = vpop.eup %2539  ;;  %v1647_v16 = vmul.f32 %v2538_v14, %v3090_v41 }
 0x87e   :  { %v2542_v2 = vpop.eup %2541  ;;  %v1610_v51 = vmul.f32 %v2540_v39, %v3626_v28  ;;  %v1652_v61 = vadd.f32 %v1648_v60, %v1612_v44  ;;  %v1697_v39 = vld [vmem:[#allocation7 + $0x10] sm:$0xff] }
 0x87f   :  { %v2544_v17 = vpop.eup %2543  ;;  %v1609_v56 = vmul.f32 %v2542_v2, %v3626_v28  ;;  %v1651_v58 = vadd.f32 %v1647_v16, %v1611_v45 }
 0x880   :  { %v2546_v62 = vpop.eup %2545  ;;  %v1650_v54 = vmul.f32 %v2544_v17, %v3090_v41  ;;  %v1614_v9 = vadd.f32 %v1610_v51, %v1570_v53 }
 0x881   :  { %v1649_v40 = vmul.f32 %v2546_v62, %v3090_v41  ;;  %v1613_v8 = vadd.f32 %v1609_v56, %v1569_v7  ;;  %v1698_v41 = vld [vmem:[#allocation7 + $0x18] sm:$0xff] }
 0x882   :  { %v1654_v13 = vadd.f32 %v1650_v54, %v1614_v9 }
 0x883   :  { %v2548_v4 = vpop.eup %2547  ;;  %v1653_v3 = vadd.f32 %v1649_v40, %v1613_v8 }
 0x884   :  { %v2550_v47 = vpop.eup %2549  ;;  %v1688_v59 = vmul.f32 %v2548_v4, %v3095_v42 }
 0x885   :  { %v1687_v6 = vmul.f32 %v2550_v47, %v3095_v42 }
 0x886   :  { %v1692_v57 = vadd.f32 %v1688_v59, %v1652_v61 }
 0x887   :  { %v2552_v28 = vpop.eup %2551  ;;  %v1691_v33 = vadd.f32 %v1687_v6, %v1651_v58 }
 0x888   :  { %v2554_v5 = vpop.eup %2553  ;;  %v1700_v34 = vmul.f32 %v1696_v15, %v1692_v57  ;;  %1708 = vst.msk [vmem:[#allocation9 + $0x8] sm:$0xff] %vm414_vm15, %v1692_v57  ;;  %v1690_v37 = vmul.f32 %v2552_v28, %v3095_v42 }
 0x889   :  { %v1699_v43 = vmul.f32 %v1695_v35, %v1691_v33  ;;  %1707 = vst.msk [vmem:[#allocation9] sm:$0xff] %vm414_vm15, %v1691_v33  ;;  %v1689_v14 = vmul.f32 %v2554_v5, %v3095_v42 }
 0x88a   :  { %1704 = vst.msk [vmem:[#allocation8 + $0x8] sm:$0xff] %vm414_vm15, %v1700_v34  ;;  %v1694_v36 = vadd.f32 %v1690_v37, %v1654_v13 }
 0x88b   :  { %1703 = vst.msk [vmem:[#allocation8] sm:$0xff] %vm414_vm15, %v1699_v43  ;;  %v1693_v0 = vadd.f32 %v1689_v14, %v1653_v3 }
 0x88c   :  { %v1702_v2 = vmul.f32 %v1698_v41, %v1694_v36  ;;  %1710 = vst.msk [vmem:[#allocation9 + $0x18] sm:$0xff] %vm414_vm15, %v1694_v36 }
 0x88d   :  { %v1701_v19 = vmul.f32 %v1697_v39, %v1693_v0  ;;  %1709 = vst.msk [vmem:[#allocation9 + $0x10] sm:$0xff] %vm414_vm15, %v1693_v0 }
 0x88e   :  { %1706 = vst.msk [vmem:[#allocation8 + $0x18] sm:$0xff] %vm414_vm15, %v1702_v2 }
 0x88f   :  { %1705 = vst.msk [vmem:[#allocation8 + $0x10] sm:$0xff] %vm414_vm15, %v1701_v19 }
 0x890 LB: > { %s1721_s9 = sld [smem:[#allocation14 + %s2745_s4]]  ;;  %s1724_s7 = scalar_lea.vmem [#allocation8], %s2745_s4  ;;  %s2745_s4 = sphi %s2743_s4, %s1720_s4  }
 0x891   : > { %s1731_s5 = scalar_lea.vmem [#allocation9], %s2745_s4  ;;  %s1720_s4 = sadd.s32 1, %s2745_s4  }
 0x892   : > { %p1717_p9 = scmp.ge.s32.totalorder %s1720_s4, 32  }
 0x893   :  { %v3627_v44 = vmov (%p1717_p9), 0.0   ;;  %v2177_v51 = vcombine.low (%p1717_p9), %v3340_v12, %v3343_v26  ;;  %1962 = vst.msk [vmem:[#allocation24] sm:$0xff] (%p1717_p9), %vm414_vm15, %v3412_v48  ;;  %1963 = vst.msk [vmem:[#allocation24 + $0x8] sm:$0xff] (%p1717_p9), %vm414_vm15, %v3415_v50  ;;  %v2176_v12 = vcombine.low (%p1717_p9), %v3334_v52, %v3337_v11  ;;  %v2182_v52 = vcombine.low (%p1717_p9), %v3355_v24, %v3358_v25  ;;  %s2790_s14 = smov (%p1717_p9), [#allocation24]  }
 0x894   : > { %v1732_v60 = vld [vmem:[%s1731_s5] sm:$0x1]  ;;  %2346 = vmatprep.subr.bf16.mxu0 (%p1717_p9), %v3627_v44  ;;  %2350 = vmatprep.mubr.msk.bf16.mxu0 (%p1717_p9), %vm2788_vm0, %v3627_v44  ;;  %1964 = vst.msk [vmem:[#allocation24 + $0x10] sm:$0xff] (%p1717_p9), %vm414_vm15, %v3418_v55  ;;  %1965 = vst.msk [vmem:[#allocation24 + $0x18] sm:$0xff] (%p1717_p9), %vm414_vm15, %v3409_v49  ;;  %v2181_v11 = vcombine.low (%p1717_p9), %v3349_v1, %v3352_v10  ;;  %v2189_v25 = vcombine.low (%p1717_p9), %v3382_v20, %v3385_v21  ;;  %s1983_s15 = sshll.u32 (%p1717_p9), %s2790_s14, 4  ;;  %s1984_s15 = int_to_ptr.vmem [resolvable:$true] %s1983_s15 }
 0x895   :  { %2354 = vmatprep.subr.bf16.mxu1 (%p1717_p9), %v3627_v44  ;;  %2358 = vmatprep.mubr.msk.bf16.mxu1 (%p1717_p9), %vm2788_vm0, %v3627_v44  ;;  %v2188_v1 = vcombine.low (%p1717_p9), %v3376_v32, %v3379_v38  ;;  %v2187_v10 = vcombine.low (%p1717_p9), %v3370_v23, %v3373_v30  ;;  %s2663_s18 = scalar_lea.vmem (%p1717_p9), %s1984_s15, 512  ;;  %p2668_p11 = scmp.lt.s32.totalorder (%p1717_p9), %s1984_s15, %s1984_s15 }
 0x896   : > { %v1725_v42 = vld [vmem:[%s1724_s7] sm:$0x1]  ;;  %s1722_s13 = scalar_lea.vmem [#allocation10], %s1721_s9  ;;  %s1729_s11 = scalar_lea.vmem [#allocation11], %s1721_s9  ;;  %2347 = vmatpush3.bf16.msra.mxu0 (%p1717_p9), %v2177_v51  ;;  %2355 = vmatpush3.bf16.msra.mxu1 (%p1717_p9), %v2182_v52 }
 0x897   : > { %v1723_v17 = vld [vmem:[%s1722_s13] sm:$0x1]  ;;  %1719 = sbr.rel (!%p1717_p9) target bundleno = 2192 (0x890), region = 273  ;;  %2348 = vmatprep.subr.bf16.mxu0 (%p1717_p9), %v3627_v44  ;;  %2356 = vmatprep.subr.bf16.mxu1 (%p1717_p9), %v3627_v44  ;;  %p2664_p10 = scmp.ne.s32.totalorder (%p1717_p9), %s1984_s15, %s2663_s18 }
 0x898   : > { %v1730_v18 = vld [vmem:[%s1729_s11] sm:$0x1]  ;;  %v1726_v16 = vadd.f32 %v1725_v42, %v1723_v17  ;;  %p2669_p12 = scmp.lt.s32.totalorder (%p1717_p9), %s2663_s18, %s2663_s18 }
 0x899   : > { %v1733_v62 = vadd.f32 %v1732_v60, %v1730_v18 }
 0x89a   : > { %1728 = vst.msk [vmem:[%s1722_s13] sm:$0x1] %vm565_vm1, %v1726_v16  ;;  %2349 = vmatpush3.bf16.msra.mxu0 (%p1717_p9), %v2176_v12  ;;  %2357 = vmatpush3.bf16.msra.mxu1 (%p1717_p9), %v2181_v11  ;;  %p2670_p13 = por (%p1717_p9), %p2669_p12, %p2668_p11 }
 0x89b   : > { %1734 = vst.msk [vmem:[%s1729_s11] sm:$0x1] %vm565_vm1, %v1733_v62  ;;  %2362 = vmatprep.subr.bf16.mxu0 (%p1717_p9), %v3627_v44 }
 0x89c   :  { %p2671_p0 = pnand %p2670_p13, %p2664_p10 }
 0x8a1   :  { %v1735_v49 = vld [vmem:[#allocation10] sm:$0xff]  ;;  %v1736_v48 = vld [vmem:[#allocation10 + $0x8] sm:$0xff] }
 0x8a2   :  { %v1737_v4 = vld [vmem:[#allocation11] sm:$0xff]  ;;  %v1738_v45 = vld [vmem:[#allocation11 + $0x8] sm:$0xff] }
 0x8a3   :  { %v1739_v56 = vadd.f32 1e-06, %v1737_v4  ;;  %v1740_v26 = vadd.f32 1e-06, %v1738_v45 }
 0x8a5   :  { %2555 = vrcp.f32 %v1739_v56 }
 0x8a6   :  { %2557 = vrcp.f32 %v1740_v26 }
 0x8b2   :  { %v2556_v50 = vpop.eup %2555 }
 0x8b3   :  { %v2558_v55 = vpop.eup %2557  ;;  %v1743_v47 = vmul.f32 %v2556_v50, %v1735_v49 }
 0x8b4   :  { %v1744_v53 = vmul.f32 %v2558_v55, %v1736_v48 }
 0x8b6   :  { %v1745_v61 = vpack.c.bf16 %v1744_v53, %v1743_v47 }
 0x8b8   :  { %2351 = vmatmul.mubr.msk.bf16.vlgmr.msra.gmra.mxu0 %vm414_vm15, %v1745_v61 }
 0x8b9   :  { %2370 = vmatprep.mubr.msk.bf16.mxu0 %vm2788_vm0, %v3627_v44  ;;  %2363 = vmatpush3.bf16.msra.mxu0 %v2189_v25 }
 0x8ba   :  { %2364 = vmatprep.subr.bf16.mxu0 %v3627_v44 }
 0x8bd   :  { %2365 = vmatpush3.bf16.msra.mxu0 %v2188_v1 }
 0x8be   :  { %2366 = vmatprep.subr.bf16.mxu0 %v3627_v44 }
 0x8c1   :  { %2367 = vmatpush3.bf16.msra.mxu0 %v2187_v10 }
 0x8c2   :  { %2368 = vmatprep.subr.bf16.mxu0 %v3627_v44 }
 0x978   :  { %v1795_v54 = vpop.f32.mrf.mxu0 }
 0x979   :  { %v1802_v7 = vadd.f32 %v1795_v54, %v3389_v46 }
 0x97a   :  { %v2352_v59 = vpop.f32.mrf.mxu0 }
 0x97b   :  { %v1810_v6 = vadd.f32 %v3346_v27, %v1802_v7 }
 0x97c   :  { %v1798_v58 = vpop.f32.mrf.mxu0 }
 0x97d   :  { %v1803_v40 = vadd.f32 %v1798_v58, %v3392_v63 }
 0x97e   :  { %v2353_v15 = vpop.f32.mrf.mxu0 }
 0x97f   :  { %v1811_v9 = vadd.f32 %v3346_v27, %v1803_v40  ;;  %v2186_v27 = vcombine.low %v3364_v29, %v3367_v22 }
 0x981   :  { %v1812_v24 = vpack.c.bf16 %v1811_v9, %v1810_v6  ;;  %2369 = vmatpush3.bf16.msra.mxu0 %v2186_v27 }
 0x983   :  { %2359 = vmatmul.mubr.msk.bf16.vlgmr.msra.gmra.mxu1 %vm414_vm15, %v1812_v24 }
 0xa43   :  { %v1868_v20 = vpop.f32.mrf.mxu1 }
 0xa44   :  { %v1869_v21 = vadd.f32 %v3361_v31, %v1868_v20 }
 0xa45   :  { %v2360_v46 = vpop.f32.mrf.mxu1 }
 0xa46   :  { %v2184_v63 = vmul.f32 -1.442695, %v1869_v21 }
 0xa47   :  { %v1871_v57 = vpop.f32.mrf.mxu1 }
 0xa48   :  { %2559 = vpow2.f32 %v2184_v63  ;;  %v1872_v32 = vadd.f32 %v3361_v31, %v1871_v57 }
 0xa49   :  { %v2361_v38 = vpop.f32.mrf.mxu1 }
 0xa4a   :  { %v2185_v35 = vmul.f32 -1.442695, %v1872_v32 }
 0xa4c   :  { %2561 = vpow2.f32 %v2185_v35 }
 0xa55   :  { %v2560_v23 = vpop.eup %2559 }
 0xa56   :  { %v1881_v30 = vadd.f32 1.0, %v2560_v23 }
 0xa58   :  { %2563 = vrcp.f32 %v1881_v30 }
 0xa59   :  { %v2562_v28 = vpop.eup %2561 }
 0xa5a   :  { %v1882_v8 = vadd.f32 1.0, %v2562_v28 }
 0xa5c   :  { %2565 = vrcp.f32 %v1882_v8 }
 0xa65   :  { %v2564_v29 = vpop.eup %2563 }
 0xa66   :  { %v1887_v33 = vmul.f32 %v2564_v29, %v1869_v21 }
 0xa69   :  { %v2566_v22 = vpop.eup %2565 }
 0xa6a   :  { %v1888_v5 = vmul.f32 %v2566_v22, %v1872_v32 }
 0xa6c   :  { %v1889_v13 = vpack.c.bf16 %v1888_v5, %v1887_v33 }
 0xa6e   :  { %2371 = vmatmul.mubr.msk.bf16.vlgmr.msra.gmra.mxu0 %vm982_vm2, %v1889_v13 }
 0xa6f   :  { %2674 = shalt.err (!%p2671_p0)
}
 0xa70   :  { %s2791_s17 = smov 128   ;;  %s2792_s22 = smov 8  }
 0xa71   :  { %1989 = dma.vmem_to_hbm [thread:$0]  %s1984_s15, 512, %s2957_s23, [#allocation25], %s2791_s17, %s2791_s17, %s2792_s22  }
 0xa72   :  { %s2793_s26 = smov [#allocation23]  }
 0xa73   :  { %s1971_s25 = sshll.u32 %s2793_s26, 4  ;;  %s1972_s25 = int_to_ptr.vmem [resolvable:$true] %s1971_s25 }
 0xa74   :  { %s2683_s28 = scalar_lea.vmem %s1972_s25, 256  ;;  %p2688_p2 = scmp.lt.s32.totalorder %s1972_s25, %s1972_s25 }
 0xa75   :  { %p2684_p1 = scmp.ne.s32.totalorder %s1972_s25, %s2683_s28  ;;  %p2689_p3 = scmp.lt.s32.totalorder %s2683_s28, %s2683_s28 }
 0xa77   :  { %p2690_p4 = por %p2689_p3, %p2688_p2 }
 0xa79   :  { %p2691_p5 = pnand %p2690_p4, %p2684_p1 }
 0xb2e   :  { %v1951_v31 = vpop.f32.mrf.mxu0 }
 0xb2f   :  { %v1958_v34 = vadd.f32 %v1951_v31, %v1810_v6 }
 0xb30   :  { %v2372_v37 = vpop.f32.mrf.mxu0 }
 0xb31   :  { %1960 = vst.msk [vmem:[#allocation23] sm:$0xff] %vm414_vm15, %v1958_v34 }
 0xb32   :  { %v1954_v3 = vpop.f32.mrf.mxu0 }
 0xb33   :  { %v1959_v43 = vadd.f32 %v1954_v3, %v1811_v9 }
 0xb34   :  { %v2373_v41 = vpop.f32.mrf.mxu0 }
 0xb35   :  { %1961 = vst.msk [vmem:[#allocation23 + $0x8] sm:$0xff] %vm414_vm15, %v1959_v43 }
 0xb36   :  { %2694 = shalt.err (!%p2691_p5)
}
 0xb37   :  { %1977 = dma.vmem_to_hbm [thread:$0]  %s1972_s25, 256, %s2952_s16, [#allocation17], %s2791_s17, %s2791_s17, %s2792_s22  }
 0xb38   :  { %2727 = dma.done.wait [#allocation17], 256  }
 0xb39   :  { %2728 = vsyncadd [#allocation17], 4294967040 }
 0xb3a   :  { %2729 = dma.done.wait [#allocation25], 512  }
 0xb3b   :  { %2730 = vsyncadd [#allocation25], 4294966784 }
 0xb3c   :  { %1996 = vsyncpa [#allocation16], 1 }
 0xb3d   :  { %1997 = vsyncpa [#allocation19], 1 }
 0xb3e   :  { %1998 = vsyncpa [#allocation22], 1 }
 0xb3f   :  { %1999 = vsyncpa [#allocation17], 1 }
 0xb40   :  { %2000 = vsyncpa [#allocation25], 1 }

</bundles_post_ra>
